<compile_context>
chip_gen: v7x
topology: tpu7x:2x2x1
jax: 0.10.0
libtpu: 0.0.40
codegen_flags: <defaults>
</compile_context>

<pallas_src>
import functools

import jax
import jax.numpy as jnp
import numpy as np
from jax.experimental import pallas as pl
from jax.experimental.pallas import tpu as pltpu

BT_MIN = 8  # f32 sublane count — minimum batch tile


def _round_up(n, m):
    return ((n + m - 1) // m) * m


# ---------------------------------------------------------------------------
# Kernel: one (batch tile, time block).  State is carried in VMEM scratch
# across the (innermost, "arbitrary") time-block grid axis.
# ---------------------------------------------------------------------------
def lstm_kernel(gx0_ref, whh0_ref, wih1_ref, whh1_ref, b1_ref, wfc_ref, bfc_ref,
                out_ref, h0_ref, c0_ref, h1_ref, c1_ref, *, seq_len, unroll):
    t_blk = pl.program_id(1)
    n_tblk = pl.num_programs(1)
    Tt, Bt, G = gx0_ref.shape
    Hp = whh0_ref.shape[0]

    # Only the last time block can contain padded (beyond seq_len) steps; the mask is
    # compiled in only when the time padding is actually non-zero (static check).
    need_mask = (seq_len % Tt) != 0

    @pl.when(t_blk == 0)
    def _():
        h0_ref[...] = jnp.zeros_like(h0_ref)
        c0_ref[...] = jnp.zeros_like(c0_ref)
        h1_ref[...] = jnp.zeros_like(h1_ref)
        c1_ref[...] = jnp.zeros_like(c1_ref)

    # Hoist weight loads (already bf16) and the bias broadcast out of the time loop
    # (JAX does not CSE broadcast_in_dim inside an unrolled loop body).
    whh0 = whh0_ref[...]                                  # (Hp, 4Hp)  bf16
    wih1 = wih1_ref[...]                                  # (Hp, 4Hp)  bf16
    whh1 = whh1_ref[...]                                  # (Hp, 4Hp)  bf16
    b1 = jnp.broadcast_to(b1_ref[...], (Bt, 4 * Hp))      # (Bt, 4Hp)  f32

    def activate(gates, c):
        # Gate column order is (i, f, o, g): one wide sigmoid + one tanh per layer.
        # Hp is a multiple of 128, so every slice stays lane-aligned.
        sg = jax.nn.sigmoid(gates[:, :3 * Hp])
        g = jnp.tanh(gates[:, 3 * Hp:])
        i = sg[:, 0 * Hp:1 * Hp]
        f = sg[:, 1 * Hp:2 * Hp]
        o = sg[:, 2 * Hp:3 * Hp]
        c_new = f * c + i * g                             # f32 elementwise (v5e-safe)
        h_new = o * jnp.tanh(c_new)
        return h_new, c_new

    t_base = t_blk * Tt

    def step(t, carry):
        h0, c0, h1, c1 = carry
        # Layer 0: x_t @ W_ih0 + b0 was precomputed (gx0, bf16); only the recurrent
        # matmul remains on the serial critical path.  bf16 operands, f32 accumulate.
        g0 = gx0_ref[t].astype(jnp.float32) + jnp.dot(
            h0.astype(jnp.bfloat16), whh0, preferred_element_type=jnp.float32)
        h0n, c0n = activate(g0, c0)
        # Layer 1: two MXU dots summed (no per-step lane concatenate).
        g1 = (jnp.dot(h0n.astype(jnp.bfloat16), wih1, preferred_element_type=jnp.float32)
              + jnp.dot(h1.astype(jnp.bfloat16), whh1, preferred_element_type=jnp.float32)
              + b1)
        h1n, c1n = activate(g1, c1)
        if need_mask:
            valid = (t_base + t) < seq_len               # scalar; freezes padded steps
            h0n = jnp.where(valid, h0n, h0)
            c0n = jnp.where(valid, c0n, c0)
            h1n = jnp.where(valid, h1n, h1)
            c1n = jnp.where(valid, c1n, c1)
        return h0n, c0n, h1n, c1n

    carry = (h0_ref[...], c0_ref[...], h1_ref[...], c1_ref[...])
    h0, c0, h1, c1 = jax.lax.fori_loop(0, Tt, step, carry, unroll=unroll)
    h0_ref[...] = h0
    c0_ref[...] = c0
    h1_ref[...] = h1
    c1_ref[...] = c1

    # Final Linear on the last timestep's layer-1 hidden state (done once, f32).
    @pl.when(t_blk == n_tblk - 1)
    def _():
        out_ref[...] = (jnp.dot(h1, wfc_ref[...], preferred_element_type=jnp.float32)
                        + bfc_ref[...]).astype(out_ref.dtype)


# ---------------------------------------------------------------------------
# Wrapper
# ---------------------------------------------------------------------------
def lstm_forward(x, kp, output_size, *, bt=None, tt=None, unroll=8):
    """x: (B, T, D) float32.  kp: padded/fused kernel params.  Returns (B, output_size)."""
    B, T, D = x.shape
    Hp = kp["whh0"].shape[0]
    G = kp["whh0"].shape[1]           # 4 * Hp
    Op = kp["wfc"].shape[1]

    # Batch tile: fill MXU rows (up to 128) without over-padding small batches.
    # (On v7x, for moderate B it can pay to cap bt at round_up(B/2, 8) so both
    #  TensorCores get a batch tile.)
    if bt is None:
        bt = min(128, _round_up(B, BT_MIN))
    bt = max(BT_MIN, _round_up(bt, BT_MIN))
    Bp = _round_up(max(B, bt), bt)

    # Time tile: bounds VMEM to 2 x tt x bt x 4Hp (bf16) regardless of T.
    if tt is None:
        tt = min(T, 64)
    tt = max(1, min(tt, T))
    Tp = _round_up(T, tt)

    # Phase 1 (fully parallel, in XLA): layer-0 input projection + bias as ONE large
    # GEMM, hoisted out of the serial recurrence.  Transpose/pad the *narrow* x first
    # so the GEMM output lands directly in the time-major padded layout the kernel
    # consumes; store it in bf16 (halves the dominant DMA + VMEM residency).
    xt = jnp.transpose(x, (1, 0, 2))                          # (T, B, D)
    xt = jnp.pad(xt, ((0, Tp - T), (0, Bp - B), (0, 0)))      # (Tp, Bp, D)
    gx0 = (xt.reshape(Tp * Bp, D) @ kp["wih0"] + kp["b0"])
    gx0 = gx0.astype(jnp.bfloat16).reshape(Tp, Bp, G)         # (Tp, Bp, 4Hp) bf16

    grid = (Bp // bt, Tp // tt)  # (parallel batch tiles, arbitrary time blocks)
    kernel = functools.partial(lstm_kernel, seq_len=T, unroll=min(unroll, tt))

    out = pl.pallas_call(
        kernel,
        out_shape=jax.ShapeDtypeStruct((Bp, Op), jnp.float32),
        grid=grid,
        in_specs=[
            pl.BlockSpec((tt, bt, G), lambda b, t: (t, b, 0)),   # gx0 time chunk (bf16)
            # Grid-invariant weights (small at Hp=128; for very large H consider
            # pipeline_mode=pl.Buffered(1) or streaming K-tiles from HBM).
            pl.BlockSpec((Hp, G), lambda b, t: (0, 0)),          # W_hh layer0 (bf16)
            pl.BlockSpec((Hp, G), lambda b, t: (0, 0)),          # W_ih layer1 (bf16)
            pl.BlockSpec((Hp, G), lambda b, t: (0, 0)),          # W_hh layer1 (bf16)
            pl.BlockSpec((1, G), lambda b, t: (0, 0)),           # b_ih1 + b_hh1 (f32)
            pl.BlockSpec((Hp, Op), lambda b, t: (0, 0)),         # fc weight (f32)
            pl.BlockSpec((1, Op), lambda b, t: (0, 0)),          # fc bias (f32)
        ],
        out_specs=pl.BlockSpec((bt, Op), lambda b, t: (b, 0)),
        scratch_shapes=[pltpu.VMEM((bt, Hp), jnp.float32)] * 4,  # h0, c0, h1, c1
        compiler_params=pltpu.CompilerParams(
            dimension_semantics=("parallel", "arbitrary"),
            vmem_limit_bytes=64 * 1024 * 1024),
    )(gx0, kp["whh0"], kp["wih1"], kp["whh1"], kp["b1"], kp["wfc"], kp["bfc"])

    return out[:B, :output_size]


# ---------------------------------------------------------------------------
# Parameters
# ---------------------------------------------------------------------------
def make_params(key, input_size, hidden_size, output_size):
    """Raw PyTorch-layout parameters, init mimicking U(-1/sqrt(H), 1/sqrt(H))."""
    H, D, O = hidden_size, input_size, output_size
    k = 1.0 / np.sqrt(H)
    keys = jax.random.split(key, 10)
    u = lambda kk, shape: jax.random.uniform(kk, shape, jnp.float32, -k, k)
    return {
        "wih0": u(keys[0], (4 * H, D)), "whh0": u(keys[1], (4 * H, H)),
        "bih0": u(keys[2], (4 * H,)),   "bhh0": u(keys[3], (4 * H,)),
        "wih1": u(keys[4], (4 * H, H)), "whh1": u(keys[5], (4 * H, H)),
        "bih1": u(keys[6], (4 * H,)),   "bhh1": u(keys[7], (4 * H,)),
        "wfc":  u(keys[8], (O, H)),     "bfc":  u(keys[9], (O,)),
    }


# PyTorch gate order along 4H is (i, f, g, o); the kernel wants (i, f, o, g) so the
# sigmoid gates are contiguous (one wide sigmoid + one tanh per layer).
_GATE_ORDER = (0, 1, 3, 2)


def prepare_params(p, hidden_size, output_size):
    """Transpose, per-gate zero-pad H->Hp (lane-aligned), reorder gates to (i,f,o,g),
    pre-cast recurrent weights to bf16, pad FC to lane-dense Op.

    Zero padding keeps padded h/c lanes exactly 0 through the recurrence
    (sigmoid(0)=0.5, tanh(0)=0 => c_pad stays 0, h_pad stays 0)."""
    H, O = hidden_size, output_size
    Hp = _round_up(H, 128)
    Op = _round_up(O, 128)

    def pad_gate_cols(w):   # (K, 4H) -> (K, 4Hp), per-gate column pad + reorder
        return jnp.concatenate(
            [jnp.pad(w[:, k * H:(k + 1) * H], ((0, 0), (0, Hp - H)))
             for k in _GATE_ORDER], axis=1)

    def pad_gate_vec(b):    # (4H,) -> (4Hp,), per-gate pad + reorder
        return jnp.concatenate(
            [jnp.pad(b[k * H:(k + 1) * H], (0, Hp - H)) for k in _GATE_ORDER])

    wih0 = pad_gate_cols(p["wih0"].T)                                   # (D, 4Hp) f32
    b0 = pad_gate_vec(p["bih0"] + p["bhh0"])                            # (4Hp,)   f32
    whh0 = pad_gate_cols(jnp.pad(p["whh0"].T, ((0, Hp - H), (0, 0))))   # (Hp, 4Hp)
    wih1 = pad_gate_cols(jnp.pad(p["wih1"].T, ((0, Hp - H), (0, 0))))   # (Hp, 4Hp)
    whh1 = pad_gate_cols(jnp.pad(p["whh1"].T, ((0, Hp - H), (0, 0))))   # (Hp, 4Hp)
    b1 = pad_gate_vec(p["bih1"] + p["bhh1"])[None, :]                   # (1, 4Hp) f32

    wfc = jnp.pad(p["wfc"].T, ((0, Hp - H), (0, Op - O)))               # (Hp, Op) f32
    bfc = jnp.pad(p["bfc"], (0, Op - O))[None, :]                       # (1, Op)  f32

    return {
        "wih0": wih0, "b0": b0,
        "whh0": whh0.astype(jnp.bfloat16),
        "wih1": wih1.astype(jnp.bfloat16),
        "whh1": whh1.astype(jnp.bfloat16),
        "b1": b1, "wfc": wfc, "bfc": bfc,
    }


# ---------------------------------------------------------------------------
# Pure-JAX reference (PyTorch nn.LSTM + Linear semantics, full f32)
# ---------------------------------------------------------------------------
def reference_forward(x, p):
    H = p["whh0"].shape[1]
    B = x.shape[0]

    def cell(x_t, h, c, wih, whh, bih, bhh):
        gates = x_t @ wih.T + h @ whh.T + bih + bhh
        i = jax.nn.sigmoid(gates[:, 0 * H:1 * H])
        f = jax.nn.sigmoid(gates[:, 1 * H:2 * H])
        g = jnp.tanh(gates[:, 2 * H:3 * H])
        o = jax.nn.sigmoid(gates[:, 3 * H:4 * H])
        c_new = f * c + i * g
        return o * jnp.tanh(c_new), c_new

    def step(state, x_t):
        h0, c0, h1, c1 = state
        h0, c0 = cell(x_t, h0, c0, p["wih0"], p["whh0"], p["bih0"], p["bhh0"])
        h1, c1 = cell(h0, h1, c1, p["wih1"], p["whh1"], p["bih1"], p["bhh1"])
        return (h0, c0, h1, c1), None

    z = jnp.zeros((B, H), jnp.float32)
    (_, _, h1, _), _ = jax.lax.scan(step, (z, z, z, z), jnp.swapaxes(x, 0, 1))
    return h1 @ p["wfc"].T + p["bfc"]


if __name__ == "__main__":
    # hidden_size=50, num_layers=2 per the PyTorch spec; small B/T/D/O for the demo.
    # T=10 with tt=4 exercises the time-tiled grid (3 time blocks, last one padded).
    B, T, D, H, O = 4, 10, 16, 50, 4

    key = jax.random.PRNGKey(0)
    kx, kparam = jax.random.split(key)
    x = jax.random.normal(kx, (B, T, D), dtype=jnp.float32)

    raw = make_params(kparam, D, H, O)
    kp = prepare_params(raw, H, O)

    out = lstm_forward(x, kp, O, tt=4)
    out = jax.block_until_ready(out)

    ref = reference_forward(x, raw)
    # Kernel uses bf16 MXU operands and bf16-stored gx0 (f32 accumulation, f32
    # gates/state) -> compare against the pure-f32 reference with bf16 tolerance.
    np.testing.assert_allclose(np.asarray(out), np.asarray(ref), rtol=5e-2, atol=5e-2)

    print("KERNEL_OK")
</pallas_src>

<mosaic_0001>
module attributes {stable_mosaic.version = 11 : i64} {
  func.func @lstm_kernel(%arg0: i32, %arg1: i32, %arg2: memref<4x8x512xbf16, #tpu.memory_space<vmem>>, %arg3: memref<128x512xbf16, #tpu.memory_space<vmem>>, %arg4: memref<128x512xbf16, #tpu.memory_space<vmem>>, %arg5: memref<128x512xbf16, #tpu.memory_space<vmem>>, %arg6: memref<1x512xf32, #tpu.memory_space<vmem>>, %arg7: memref<128x128xf32, #tpu.memory_space<vmem>>, %arg8: memref<1x128xf32, #tpu.memory_space<vmem>>, %arg9: memref<8x128xf32, #tpu.memory_space<vmem>>, %arg10: memref<8x128xf32, #tpu.memory_space<vmem>>, %arg11: memref<8x128xf32, #tpu.memory_space<vmem>>, %arg12: memref<8x128xf32, #tpu.memory_space<vmem>>, %arg13: memref<8x128xf32, #tpu.memory_space<vmem>>) attributes {dimension_semantics = [#tpu.dimension_semantics<parallel>, #tpu.dimension_semantics<arbitrary>], iteration_bounds = array<i64: 1, 3>, scalar_prefetch = 0 : i64, scratch_operands = 4 : i64, tpu.core_type = #tpu.core_type<tc>, window_params = [{transform_indices = @transform_0, window_bounds = array<i64: 4, 8, 512>}, {pipeline_mode = #tpu.pipeline_mode<synchronous>, transform_indices = @transform_1, window_bounds = array<i64: 128, 512>}, {pipeline_mode = #tpu.pipeline_mode<synchronous>, transform_indices = @transform_2, window_bounds = array<i64: 128, 512>}, {pipeline_mode = #tpu.pipeline_mode<synchronous>, transform_indices = @transform_3, window_bounds = array<i64: 128, 512>}, {pipeline_mode = #tpu.pipeline_mode<synchronous>, transform_indices = @transform_4, window_bounds = array<i64: 1, 512>}, {pipeline_mode = #tpu.pipeline_mode<synchronous>, transform_indices = @transform_5, window_bounds = array<i64: 128, 128>}, {pipeline_mode = #tpu.pipeline_mode<synchronous>, transform_indices = @transform_6, window_bounds = array<i64: 1, 128>}, {transform_indices = @transform_7, window_bounds = array<i64: 8, 128>}]} {
    %c0_i32 = arith.constant 0 : i32
    %0 = arith.cmpi eq, %arg1, %c0_i32 : i32
    %1 = arith.extui %0 : i1 to i32
    %c0_i32_0 = arith.constant 0 : i32
    %2 = arith.cmpi ne, %1, %c0_i32_0 : i32
    scf.if %2 {
      %cst_58 = arith.constant 0.000000e+00 : f32
      %225 = vector.broadcast %cst_58 : f32 to vector<8x128xf32>
      %c0_59 = arith.constant 0 : index
      %c0_60 = arith.constant 0 : index
      %226 = vector.load %arg10[%c0_59, %c0_60] : memref<8x128xf32, #tpu.memory_space<vmem>>, vector<8x128xf32>
      tpu.vector_store %arg10[%c0_59, %c0_60], %225 {strides = array<i32>} : memref<8x128xf32, #tpu.memory_space<vmem>>, vector<8x128xf32>,
      %cst_61 = arith.constant 0.000000e+00 : f32
      %227 = vector.broadcast %cst_61 : f32 to vector<8x128xf32>
      %c0_62 = arith.constant 0 : index
      %c0_63 = arith.constant 0 : index
      %228 = vector.load %arg11[%c0_62, %c0_63] : memref<8x128xf32, #tpu.memory_space<vmem>>, vector<8x128xf32>
      tpu.vector_store %arg11[%c0_62, %c0_63], %227 {strides = array<i32>} : memref<8x128xf32, #tpu.memory_space<vmem>>, vector<8x128xf32>,
      %cst_64 = arith.constant 0.000000e+00 : f32
      %229 = vector.broadcast %cst_64 : f32 to vector<8x128xf32>
      %c0_65 = arith.constant 0 : index
      %c0_66 = arith.constant 0 : index
      %230 = vector.load %arg12[%c0_65, %c0_66] : memref<8x128xf32, #tpu.memory_space<vmem>>, vector<8x128xf32>
      tpu.vector_store %arg12[%c0_65, %c0_66], %229 {strides = array<i32>} : memref<8x128xf32, #tpu.memory_space<vmem>>, vector<8x128xf32>,
      %cst_67 = arith.constant 0.000000e+00 : f32
      %231 = vector.broadcast %cst_67 : f32 to vector<8x128xf32>
      %c0_68 = arith.constant 0 : index
      %c0_69 = arith.constant 0 : index
      %232 = vector.load %arg13[%c0_68, %c0_69] : memref<8x128xf32, #tpu.memory_space<vmem>>, vector<8x128xf32>
      tpu.vector_store %arg13[%c0_68, %c0_69], %231 {strides = array<i32>} : memref<8x128xf32, #tpu.memory_space<vmem>>, vector<8x128xf32>,
    } else {
    }
    %c0 = arith.constant 0 : index
    %c0_1 = arith.constant 0 : index
    %3 = vector.load %arg3[%c0, %c0_1] : memref<128x512xbf16, #tpu.memory_space<vmem>>, vector<128x512xbf16>
    %c0_2 = arith.constant 0 : index
    %c0_3 = arith.constant 0 : index
    %4 = vector.load %arg4[%c0_2, %c0_3] : memref<128x512xbf16, #tpu.memory_space<vmem>>, vector<128x512xbf16>
    %c0_4 = arith.constant 0 : index
    %c0_5 = arith.constant 0 : index
    %5 = vector.load %arg5[%c0_4, %c0_5] : memref<128x512xbf16, #tpu.memory_space<vmem>>, vector<128x512xbf16>
    %c0_6 = arith.constant 0 : index
    %c0_7 = arith.constant 0 : index
    %6 = vector.load %arg6[%c0_6, %c0_7] : memref<1x512xf32, #tpu.memory_space<vmem>>, vector<1x512xf32>
    %7 = vector.shape_cast %6 : vector<1x512xf32> to vector<1x512xf32>
    %8 = vector.broadcast %7 : vector<1x512xf32> to vector<8x512xf32>
    %c4_i32 = arith.constant 4 : i32
    %9 = arith.muli %arg1, %c4_i32 : i32
    %c0_8 = arith.constant 0 : index
    %c0_9 = arith.constant 0 : index
    %10 = vector.load %arg10[%c0_8, %c0_9] : memref<8x128xf32, #tpu.memory_space<vmem>>, vector<8x128xf32>
    %c0_10 = arith.constant 0 : index
    %c0_11 = arith.constant 0 : index
    %11 = vector.load %arg11[%c0_10, %c0_11] : memref<8x128xf32, #tpu.memory_space<vmem>>, vector<8x128xf32>
    %c0_12 = arith.constant 0 : index
    %c0_13 = arith.constant 0 : index
    %12 = vector.load %arg12[%c0_12, %c0_13] : memref<8x128xf32, #tpu.memory_space<vmem>>, vector<8x128xf32>
    %c0_14 = arith.constant 0 : index
    %c0_15 = arith.constant 0 : index
    %13 = vector.load %arg13[%c0_14, %c0_15] : memref<8x128xf32, #tpu.memory_space<vmem>>, vector<8x128xf32>
    %c0_i32_16 = arith.constant 0 : i32
    %14 = arith.index_cast %c0_i32_16 : i32 to index
    %c0_17 = arith.constant 0 : index
    %c0_18 = arith.constant 0 : index
    %15 = vector.load %arg2[%14, %c0_17, %c0_18] : memref<4x8x512xbf16, #tpu.memory_space<vmem>>, vector<1x8x512xbf16>
    %16 = vector.shape_cast %15 : vector<1x8x512xbf16> to vector<8x512xbf16>
    %17 = arith.extf %16 : vector<8x512xbf16> to vector<8x512xf32>
    %18 = arith.truncf %10 : vector<8x128xf32> to vector<8x128xbf16>
    %cst = arith.constant dense<0.000000e+00> : vector<8x512xf32>
    %19 = tpu.matmul %18, %3, %cst {dimension_numbers = #tpu.dot_dimension_numbers<[1], [0], [0], [1], [0, 0, 1, 1], [], []>} : vector<8x128xbf16>, vector<128x512xbf16>, vector<8x512xf32> -> vector<8x512xf32>
    %20 = arith.addf %17, %19 : vector<8x512xf32>
    %21 = vector.extract_strided_slice %20 {offsets = [0, 0], sizes = [8, 384], strides = [1, 1]} : vector<8x512xf32> to vector<8x384xf32>
    %22 = arith.negf %21 : vector<8x384xf32>
    %23 = math.exp %22 : vector<8x384xf32>
    %cst_19 = arith.constant 1.000000e+00 : f32
    %24 = vector.broadcast %cst_19 : f32 to vector<8x384xf32>
    %25 = arith.addf %24, %23 : vector<8x384xf32>
    %26 = arith.divf %24, %25 : vector<8x384xf32>
    %27 = vector.extract_strided_slice %20 {offsets = [0, 384], sizes = [8, 128], strides = [1, 1]} : vector<8x512xf32> to vector<8x128xf32>
    %28 = math.tanh %27 : vector<8x128xf32>
    %29 = vector.extract_strided_slice %26 {offsets = [0, 0], sizes = [8, 128], strides = [1, 1]} : vector<8x384xf32> to vector<8x128xf32>
    %30 = vector.extract_strided_slice %26 {offsets = [0, 128], sizes = [8, 128], strides = [1, 1]} : vector<8x384xf32> to vector<8x128xf32>
    %31 = vector.extract_strided_slice %26 {offsets = [0, 256], sizes = [8, 128], strides = [1, 1]} : vector<8x384xf32> to vector<8x128xf32>
    %32 = arith.mulf %30, %11 : vector<8x128xf32>
    %33 = arith.mulf %29, %28 : vector<8x128xf32>
    %34 = arith.addf %32, %33 : vector<8x128xf32>
    %35 = math.tanh %34 : vector<8x128xf32>
    %36 = arith.mulf %31, %35 : vector<8x128xf32>
    %37 = arith.truncf %36 : vector<8x128xf32> to vector<8x128xbf16>
    %cst_20 = arith.constant dense<0.000000e+00> : vector<8x512xf32>
    %38 = tpu.matmul %37, %4, %cst_20 {dimension_numbers = #tpu.dot_dimension_numbers<[1], [0], [0], [1], [0, 0, 1, 1], [], []>} : vector<8x128xbf16>, vector<128x512xbf16>, vector<8x512xf32> -> vector<8x512xf32>
    %39 = arith.truncf %12 : vector<8x128xf32> to vector<8x128xbf16>
    %cst_21 = arith.constant dense<0.000000e+00> : vector<8x512xf32>
    %40 = tpu.matmul %39, %5, %cst_21 {dimension_numbers = #tpu.dot_dimension_numbers<[1], [0], [0], [1], [0, 0, 1, 1], [], []>} : vector<8x128xbf16>, vector<128x512xbf16>, vector<8x512xf32> -> vector<8x512xf32>
    %41 = arith.addf %38, %40 : vector<8x512xf32>
    %42 = arith.addf %41, %8 : vector<8x512xf32>
    %43 = vector.extract_strided_slice %42 {offsets = [0, 0], sizes = [8, 384], strides = [1, 1]} : vector<8x512xf32> to vector<8x384xf32>
    %44 = arith.negf %43 : vector<8x384xf32>
    %45 = math.exp %44 : vector<8x384xf32>
    %cst_22 = arith.constant 1.000000e+00 : f32
    %46 = vector.broadcast %cst_22 : f32 to vector<8x384xf32>
    %47 = arith.addf %46, %45 : vector<8x384xf32>
    %48 = arith.divf %46, %47 : vector<8x384xf32>
    %49 = vector.extract_strided_slice %42 {offsets = [0, 384], sizes = [8, 128], strides = [1, 1]} : vector<8x512xf32> to vector<8x128xf32>
    %50 = math.tanh %49 : vector<8x128xf32>
    %51 = vector.extract_strided_slice %48 {offsets = [0, 0], sizes = [8, 128], strides = [1, 1]} : vector<8x384xf32> to vector<8x128xf32>
    %52 = vector.extract_strided_slice %48 {offsets = [0, 128], sizes = [8, 128], strides = [1, 1]} : vector<8x384xf32> to vector<8x128xf32>
    %53 = vector.extract_strided_slice %48 {offsets = [0, 256], sizes = [8, 128], strides = [1, 1]} : vector<8x384xf32> to vector<8x128xf32>
    %54 = arith.mulf %52, %13 : vector<8x128xf32>
    %55 = arith.mulf %51, %50 : vector<8x128xf32>
    %56 = arith.addf %54, %55 : vector<8x128xf32>
    %57 = math.tanh %56 : vector<8x128xf32>
    %58 = arith.mulf %53, %57 : vector<8x128xf32>
    %59 = arith.addi %9, %c0_i32_16 : i32
    %c10_i32 = arith.constant 10 : i32
    %60 = arith.cmpi slt, %59, %c10_i32 : i32
    %61 = arith.select %60, %36, %10 : vector<8x128xf32>
    %62 = arith.select %60, %34, %11 : vector<8x128xf32>
    %63 = arith.select %60, %58, %12 : vector<8x128xf32>
    %64 = arith.select %60, %56, %13 : vector<8x128xf32>
    %c1_i32 = arith.constant 1 : i32
    %65 = arith.index_cast %c1_i32 : i32 to index
    %c0_23 = arith.constant 0 : index
    %c0_24 = arith.constant 0 : index
    %66 = vector.load %arg2[%65, %c0_23, %c0_24] : memref<4x8x512xbf16, #tpu.memory_space<vmem>>, vector<1x8x512xbf16>
    %67 = vector.shape_cast %66 : vector<1x8x512xbf16> to vector<8x512xbf16>
    %68 = arith.extf %67 : vector<8x512xbf16> to vector<8x512xf32>
    %69 = arith.truncf %61 : vector<8x128xf32> to vector<8x128xbf16>
    %cst_25 = arith.constant dense<0.000000e+00> : vector<8x512xf32>
    %70 = tpu.matmul %69, %3, %cst_25 {dimension_numbers = #tpu.dot_dimension_numbers<[1], [0], [0], [1], [0, 0, 1, 1], [], []>} : vector<8x128xbf16>, vector<128x512xbf16>, vector<8x512xf32> -> vector<8x512xf32>
    %71 = arith.addf %68, %70 : vector<8x512xf32>
    %72 = vector.extract_strided_slice %71 {offsets = [0, 0], sizes = [8, 384], strides = [1, 1]} : vector<8x512xf32> to vector<8x384xf32>
    %73 = arith.negf %72 : vector<8x384xf32>
    %74 = math.exp %73 : vector<8x384xf32>
    %cst_26 = arith.constant 1.000000e+00 : f32
    %75 = vector.broadcast %cst_26 : f32 to vector<8x384xf32>
    %76 = arith.addf %75, %74 : vector<8x384xf32>
    %77 = arith.divf %75, %76 : vector<8x384xf32>
    %78 = vector.extract_strided_slice %71 {offsets = [0, 384], sizes = [8, 128], strides = [1, 1]} : vector<8x512xf32> to vector<8x128xf32>
    %79 = math.tanh %78 : vector<8x128xf32>
    %80 = vector.extract_strided_slice %77 {offsets = [0, 0], sizes = [8, 128], strides = [1, 1]} : vector<8x384xf32> to vector<8x128xf32>
    %81 = vector.extract_strided_slice %77 {offsets = [0, 128], sizes = [8, 128], strides = [1, 1]} : vector<8x384xf32> to vector<8x128xf32>
    %82 = vector.extract_strided_slice %77 {offsets = [0, 256], sizes = [8, 128], strides = [1, 1]} : vector<8x384xf32> to vector<8x128xf32>
    %83 = arith.mulf %81, %62 : vector<8x128xf32>
    %84 = arith.mulf %80, %79 : vector<8x128xf32>
    %85 = arith.addf %83, %84 : vector<8x128xf32>
    %86 = math.tanh %85 : vector<8x128xf32>
    %87 = arith.mulf %82, %86 : vector<8x128xf32>
    %88 = arith.truncf %87 : vector<8x128xf32> to vector<8x128xbf16>
    %cst_27 = arith.constant dense<0.000000e+00> : vector<8x512xf32>
    %89 = tpu.matmul %88, %4, %cst_27 {dimension_numbers = #tpu.dot_dimension_numbers<[1], [0], [0], [1], [0, 0, 1, 1], [], []>} : vector<8x128xbf16>, vector<128x512xbf16>, vector<8x512xf32> -> vector<8x512xf32>
    %90 = arith.truncf %63 : vector<8x128xf32> to vector<8x128xbf16>
    %cst_28 = arith.constant dense<0.000000e+00> : vector<8x512xf32>
    %91 = tpu.matmul %90, %5, %cst_28 {dimension_numbers = #tpu.dot_dimension_numbers<[1], [0], [0], [1], [0, 0, 1, 1], [], []>} : vector<8x128xbf16>, vector<128x512xbf16>, vector<8x512xf32> -> vector<8x512xf32>
    %92 = arith.addf %89, %91 : vector<8x512xf32>
    %93 = arith.addf %92, %8 : vector<8x512xf32>
    %94 = vector.extract_strided_slice %93 {offsets = [0, 0], sizes = [8, 384], strides = [1, 1]} : vector<8x512xf32> to vector<8x384xf32>
    %95 = arith.negf %94 : vector<8x384xf32>
    %96 = math.exp %95 : vector<8x384xf32>
    %cst_29 = arith.constant 1.000000e+00 : f32
    %97 = vector.broadcast %cst_29 : f32 to vector<8x384xf32>
    %98 = arith.addf %97, %96 : vector<8x384xf32>
    %99 = arith.divf %97, %98 : vector<8x384xf32>
    %100 = vector.extract_strided_slice %93 {offsets = [0, 384], sizes = [8, 128], strides = [1, 1]} : vector<8x512xf32> to vector<8x128xf32>
    %101 = math.tanh %100 : vector<8x128xf32>
    %102 = vector.extract_strided_slice %99 {offsets = [0, 0], sizes = [8, 128], strides = [1, 1]} : vector<8x384xf32> to vector<8x128xf32>
    %103 = vector.extract_strided_slice %99 {offsets = [0, 128], sizes = [8, 128], strides = [1, 1]} : vector<8x384xf32> to vector<8x128xf32>
    %104 = vector.extract_strided_slice %99 {offsets = [0, 256], sizes = [8, 128], strides = [1, 1]} : vector<8x384xf32> to vector<8x128xf32>
    %105 = arith.mulf %103, %64 : vector<8x128xf32>
    %106 = arith.mulf %102, %101 : vector<8x128xf32>
    %107 = arith.addf %105, %106 : vector<8x128xf32>
    %108 = math.tanh %107 : vector<8x128xf32>
    %109 = arith.mulf %104, %108 : vector<8x128xf32>
    %110 = arith.addi %9, %c1_i32 : i32
    %c10_i32_30 = arith.constant 10 : i32
    %111 = arith.cmpi slt, %110, %c10_i32_30 : i32
    %112 = arith.select %111, %87, %61 : vector<8x128xf32>
    %113 = arith.select %111, %85, %62 : vector<8x128xf32>
    %114 = arith.select %111, %109, %63 : vector<8x128xf32>
    %115 = arith.select %111, %107, %64 : vector<8x128xf32>
    %c2_i32 = arith.constant 2 : i32
    %116 = arith.index_cast %c2_i32 : i32 to index
    %c0_31 = arith.constant 0 : index
    %c0_32 = arith.constant 0 : index
    %117 = vector.load %arg2[%116, %c0_31, %c0_32] : memref<4x8x512xbf16, #tpu.memory_space<vmem>>, vector<1x8x512xbf16>
    %118 = vector.shape_cast %117 : vector<1x8x512xbf16> to vector<8x512xbf16>
    %119 = arith.extf %118 : vector<8x512xbf16> to vector<8x512xf32>
    %120 = arith.truncf %112 : vector<8x128xf32> to vector<8x128xbf16>
    %cst_33 = arith.constant dense<0.000000e+00> : vector<8x512xf32>
    %121 = tpu.matmul %120, %3, %cst_33 {dimension_numbers = #tpu.dot_dimension_numbers<[1], [0], [0], [1], [0, 0, 1, 1], [], []>} : vector<8x128xbf16>, vector<128x512xbf16>, vector<8x512xf32> -> vector<8x512xf32>
    %122 = arith.addf %119, %121 : vector<8x512xf32>
    %123 = vector.extract_strided_slice %122 {offsets = [0, 0], sizes = [8, 384], strides = [1, 1]} : vector<8x512xf32> to vector<8x384xf32>
    %124 = arith.negf %123 : vector<8x384xf32>
    %125 = math.exp %124 : vector<8x384xf32>
    %cst_34 = arith.constant 1.000000e+00 : f32
    %126 = vector.broadcast %cst_34 : f32 to vector<8x384xf32>
    %127 = arith.addf %126, %125 : vector<8x384xf32>
    %128 = arith.divf %126, %127 : vector<8x384xf32>
    %129 = vector.extract_strided_slice %122 {offsets = [0, 384], sizes = [8, 128], strides = [1, 1]} : vector<8x512xf32> to vector<8x128xf32>
    %130 = math.tanh %129 : vector<8x128xf32>
    %131 = vector.extract_strided_slice %128 {offsets = [0, 0], sizes = [8, 128], strides = [1, 1]} : vector<8x384xf32> to vector<8x128xf32>
    %132 = vector.extract_strided_slice %128 {offsets = [0, 128], sizes = [8, 128], strides = [1, 1]} : vector<8x384xf32> to vector<8x128xf32>
    %133 = vector.extract_strided_slice %128 {offsets = [0, 256], sizes = [8, 128], strides = [1, 1]} : vector<8x384xf32> to vector<8x128xf32>
    %134 = arith.mulf %132, %113 : vector<8x128xf32>
    %135 = arith.mulf %131, %130 : vector<8x128xf32>
    %136 = arith.addf %134, %135 : vector<8x128xf32>
    %137 = math.tanh %136 : vector<8x128xf32>
    %138 = arith.mulf %133, %137 : vector<8x128xf32>
    %139 = arith.truncf %138 : vector<8x128xf32> to vector<8x128xbf16>
    %cst_35 = arith.constant dense<0.000000e+00> : vector<8x512xf32>
    %140 = tpu.matmul %139, %4, %cst_35 {dimension_numbers = #tpu.dot_dimension_numbers<[1], [0], [0], [1], [0, 0, 1, 1], [], []>} : vector<8x128xbf16>, vector<128x512xbf16>, vector<8x512xf32> -> vector<8x512xf32>
    %141 = arith.truncf %114 : vector<8x128xf32> to vector<8x128xbf16>
    %cst_36 = arith.constant dense<0.000000e+00> : vector<8x512xf32>
    %142 = tpu.matmul %141, %5, %cst_36 {dimension_numbers = #tpu.dot_dimension_numbers<[1], [0], [0], [1], [0, 0, 1, 1], [], []>} : vector<8x128xbf16>, vector<128x512xbf16>, vector<8x512xf32> -> vector<8x512xf32>
    %143 = arith.addf %140, %142 : vector<8x512xf32>
    %144 = arith.addf %143, %8 : vector<8x512xf32>
    %145 = vector.extract_strided_slice %144 {offsets = [0, 0], sizes = [8, 384], strides = [1, 1]} : vector<8x512xf32> to vector<8x384xf32>
    %146 = arith.negf %145 : vector<8x384xf32>
    %147 = math.exp %146 : vector<8x384xf32>
    %cst_37 = arith.constant 1.000000e+00 : f32
    %148 = vector.broadcast %cst_37 : f32 to vector<8x384xf32>
    %149 = arith.addf %148, %147 : vector<8x384xf32>
    %150 = arith.divf %148, %149 : vector<8x384xf32>
    %151 = vector.extract_strided_slice %144 {offsets = [0, 384], sizes = [8, 128], strides = [1, 1]} : vector<8x512xf32> to vector<8x128xf32>
    %152 = math.tanh %151 : vector<8x128xf32>
    %153 = vector.extract_strided_slice %150 {offsets = [0, 0], sizes = [8, 128], strides = [1, 1]} : vector<8x384xf32> to vector<8x128xf32>
    %154 = vector.extract_strided_slice %150 {offsets = [0, 128], sizes = [8, 128], strides = [1, 1]} : vector<8x384xf32> to vector<8x128xf32>
    %155 = vector.extract_strided_slice %150 {offsets = [0, 256], sizes = [8, 128], strides = [1, 1]} : vector<8x384xf32> to vector<8x128xf32>
    %156 = arith.mulf %154, %115 : vector<8x128xf32>
    %157 = arith.mulf %153, %152 : vector<8x128xf32>
    %158 = arith.addf %156, %157 : vector<8x128xf32>
    %159 = math.tanh %158 : vector<8x128xf32>
    %160 = arith.mulf %155, %159 : vector<8x128xf32>
    %161 = arith.addi %9, %c2_i32 : i32
    %c10_i32_38 = arith.constant 10 : i32
    %162 = arith.cmpi slt, %161, %c10_i32_38 : i32
    %163 = arith.select %162, %138, %112 : vector<8x128xf32>
    %164 = arith.select %162, %136, %113 : vector<8x128xf32>
    %165 = arith.select %162, %160, %114 : vector<8x128xf32>
    %166 = arith.select %162, %158, %115 : vector<8x128xf32>
    %c3_i32 = arith.constant 3 : i32
    %167 = arith.index_cast %c3_i32 : i32 to index
    %c0_39 = arith.constant 0 : index
    %c0_40 = arith.constant 0 : index
    %168 = vector.load %arg2[%167, %c0_39, %c0_40] : memref<4x8x512xbf16, #tpu.memory_space<vmem>>, vector<1x8x512xbf16>
    %169 = vector.shape_cast %168 : vector<1x8x512xbf16> to vector<8x512xbf16>
    %170 = arith.extf %169 : vector<8x512xbf16> to vector<8x512xf32>
    %171 = arith.truncf %163 : vector<8x128xf32> to vector<8x128xbf16>
    %cst_41 = arith.constant dense<0.000000e+00> : vector<8x512xf32>
    %172 = tpu.matmul %171, %3, %cst_41 {dimension_numbers = #tpu.dot_dimension_numbers<[1], [0], [0], [1], [0, 0, 1, 1], [], []>} : vector<8x128xbf16>, vector<128x512xbf16>, vector<8x512xf32> -> vector<8x512xf32>
    %173 = arith.addf %170, %172 : vector<8x512xf32>
    %174 = vector.extract_strided_slice %173 {offsets = [0, 0], sizes = [8, 384], strides = [1, 1]} : vector<8x512xf32> to vector<8x384xf32>
    %175 = arith.negf %174 : vector<8x384xf32>
    %176 = math.exp %175 : vector<8x384xf32>
    %cst_42 = arith.constant 1.000000e+00 : f32
    %177 = vector.broadcast %cst_42 : f32 to vector<8x384xf32>
    %178 = arith.addf %177, %176 : vector<8x384xf32>
    %179 = arith.divf %177, %178 : vector<8x384xf32>
    %180 = vector.extract_strided_slice %173 {offsets = [0, 384], sizes = [8, 128], strides = [1, 1]} : vector<8x512xf32> to vector<8x128xf32>
    %181 = math.tanh %180 : vector<8x128xf32>
    %182 = vector.extract_strided_slice %179 {offsets = [0, 0], sizes = [8, 128], strides = [1, 1]} : vector<8x384xf32> to vector<8x128xf32>
    %183 = vector.extract_strided_slice %179 {offsets = [0, 128], sizes = [8, 128], strides = [1, 1]} : vector<8x384xf32> to vector<8x128xf32>
    %184 = vector.extract_strided_slice %179 {offsets = [0, 256], sizes = [8, 128], strides = [1, 1]} : vector<8x384xf32> to vector<8x128xf32>
    %185 = arith.mulf %183, %164 : vector<8x128xf32>
    %186 = arith.mulf %182, %181 : vector<8x128xf32>
    %187 = arith.addf %185, %186 : vector<8x128xf32>
    %188 = math.tanh %187 : vector<8x128xf32>
    %189 = arith.mulf %184, %188 : vector<8x128xf32>
    %190 = arith.truncf %189 : vector<8x128xf32> to vector<8x128xbf16>
    %cst_43 = arith.constant dense<0.000000e+00> : vector<8x512xf32>
    %191 = tpu.matmul %190, %4, %cst_43 {dimension_numbers = #tpu.dot_dimension_numbers<[1], [0], [0], [1], [0, 0, 1, 1], [], []>} : vector<8x128xbf16>, vector<128x512xbf16>, vector<8x512xf32> -> vector<8x512xf32>
    %192 = arith.truncf %165 : vector<8x128xf32> to vector<8x128xbf16>
    %cst_44 = arith.constant dense<0.000000e+00> : vector<8x512xf32>
    %193 = tpu.matmul %192, %5, %cst_44 {dimension_numbers = #tpu.dot_dimension_numbers<[1], [0], [0], [1], [0, 0, 1, 1], [], []>} : vector<8x128xbf16>, vector<128x512xbf16>, vector<8x512xf32> -> vector<8x512xf32>
    %194 = arith.addf %191, %193 : vector<8x512xf32>
    %195 = arith.addf %194, %8 : vector<8x512xf32>
    %196 = vector.extract_strided_slice %195 {offsets = [0, 0], sizes = [8, 384], strides = [1, 1]} : vector<8x512xf32> to vector<8x384xf32>
    %197 = arith.negf %196 : vector<8x384xf32>
    %198 = math.exp %197 : vector<8x384xf32>
    %cst_45 = arith.constant 1.000000e+00 : f32
    %199 = vector.broadcast %cst_45 : f32 to vector<8x384xf32>
    %200 = arith.addf %199, %198 : vector<8x384xf32>
    %201 = arith.divf %199, %200 : vector<8x384xf32>
    %202 = vector.extract_strided_slice %195 {offsets = [0, 384], sizes = [8, 128], strides = [1, 1]} : vector<8x512xf32> to vector<8x128xf32>
    %203 = math.tanh %202 : vector<8x128xf32>
    %204 = vector.extract_strided_slice %201 {offsets = [0, 0], sizes = [8, 128], strides = [1, 1]} : vector<8x384xf32> to vector<8x128xf32>
    %205 = vector.extract_strided_slice %201 {offsets = [0, 128], sizes = [8, 128], strides = [1, 1]} : vector<8x384xf32> to vector<8x128xf32>
    %206 = vector.extract_strided_slice %201 {offsets = [0, 256], sizes = [8, 128], strides = [1, 1]} : vector<8x384xf32> to vector<8x128xf32>
    %207 = arith.mulf %205, %166 : vector<8x128xf32>
    %208 = arith.mulf %204, %203 : vector<8x128xf32>
    %209 = arith.addf %207, %208 : vector<8x128xf32>
    %210 = math.tanh %209 : vector<8x128xf32>
    %211 = arith.mulf %206, %210 : vector<8x128xf32>
    %212 = arith.addi %9, %c3_i32 : i32
    %c10_i32_46 = arith.constant 10 : i32
    %213 = arith.cmpi slt, %212, %c10_i32_46 : i32
    %214 = arith.select %213, %189, %163 : vector<8x128xf32>
    %215 = arith.select %213, %187, %164 : vector<8x128xf32>
    %216 = arith.select %213, %211, %165 : vector<8x128xf32>
    %217 = arith.select %213, %209, %166 : vector<8x128xf32>
    %c4_i32_47 = arith.constant 4 : i32
    %c0_48 = arith.constant 0 : index
    %c0_49 = arith.constant 0 : index
    %218 = vector.load %arg10[%c0_48, %c0_49] : memref<8x128xf32, #tpu.memory_space<vmem>>, vector<8x128xf32>
    tpu.vector_store %arg10[%c0_48, %c0_49], %214 {strides = array<i32>} : memref<8x128xf32, #tpu.memory_space<vmem>>, vector<8x128xf32>,
    %c0_50 = arith.constant 0 : index
    %c0_51 = arith.constant 0 : index
    %219 = vector.load %arg11[%c0_50, %c0_51] : memref<8x128xf32, #tpu.memory_space<vmem>>, vector<8x128xf32>
    tpu.vector_store %arg11[%c0_50, %c0_51], %215 {strides = array<i32>} : memref<8x128xf32, #tpu.memory_space<vmem>>, vector<8x128xf32>,
    %c0_52 = arith.constant 0 : index
    %c0_53 = arith.constant 0 : index
    %220 = vector.load %arg12[%c0_52, %c0_53] : memref<8x128xf32, #tpu.memory_space<vmem>>, vector<8x128xf32>
    tpu.vector_store %arg12[%c0_52, %c0_53], %216 {strides = array<i32>} : memref<8x128xf32, #tpu.memory_space<vmem>>, vector<8x128xf32>,
    %c0_54 = arith.constant 0 : index
    %c0_55 = arith.constant 0 : index
    %221 = vector.load %arg13[%c0_54, %c0_55] : memref<8x128xf32, #tpu.memory_space<vmem>>, vector<8x128xf32>
    tpu.vector_store %arg13[%c0_54, %c0_55], %217 {strides = array<i32>} : memref<8x128xf32, #tpu.memory_space<vmem>>, vector<8x128xf32>,
    %c2_i32_56 = arith.constant 2 : i32
    %222 = arith.cmpi eq, %arg1, %c2_i32_56 : i32
    %223 = arith.extui %222 : i1 to i32
    %c0_i32_57 = arith.constant 0 : i32
    %224 = arith.cmpi ne, %223, %c0_i32_57 : i32
    scf.if %224 {
      %c0_58 = arith.constant 0 : index
      %c0_59 = arith.constant 0 : index
      %225 = vector.load %arg7[%c0_58, %c0_59] : memref<128x128xf32, #tpu.memory_space<vmem>>, vector<128x128xf32>
      %cst_60 = arith.constant dense<0.000000e+00> : vector<8x128xf32>
      %226 = tpu.matmul %216, %225, %cst_60 {dimension_numbers = #tpu.dot_dimension_numbers<[1], [0], [0], [1], [0, 0, 1, 1], [], []>} : vector<8x128xf32>, vector<128x128xf32>, vector<8x128xf32> -> vector<8x128xf32>
      %c0_61 = arith.constant 0 : index
      %c0_62 = arith.constant 0 : index
      %227 = vector.load %arg8[%c0_61, %c0_62] : memref<1x128xf32, #tpu.memory_space<vmem>>, vector<1x128xf32>
      %228 = vector.broadcast %227 : vector<1x128xf32> to vector<8x128xf32>
      %229 = arith.addf %226, %228 : vector<8x128xf32>
      %c0_63 = arith.constant 0 : index
      %c0_64 = arith.constant 0 : index
      %230 = vector.load %arg9[%c0_63, %c0_64] : memref<8x128xf32, #tpu.memory_space<vmem>>, vector<8x128xf32>
      tpu.vector_store %arg9[%c0_63, %c0_64], %229 {strides = array<i32>} : memref<8x128xf32, #tpu.memory_space<vmem>>, vector<8x128xf32>,
    } else {
    }
    return
  }
  func.func @transform_0(%arg0: i32, %arg1: i32) -> (i32, i32, i32) {
    %c0_i32 = arith.constant 0 : i32
    %c0_i32_0 = arith.constant 0 : i32
    return %arg1, %arg0, %c0_i32 : i32, i32, i32
  }
  func.func @transform_1(%arg0: i32, %arg1: i32) -> (i32, i32) {
    %c0_i32 = arith.constant 0 : i32
    %c0_i32_0 = arith.constant 0 : i32
    %c0_i32_1 = arith.constant 0 : i32
    return %c0_i32, %c0_i32_0 : i32, i32
  }
  func.func @transform_2(%arg0: i32, %arg1: i32) -> (i32, i32) {
    %c0_i32 = arith.constant 0 : i32
    %c0_i32_0 = arith.constant 0 : i32
    %c0_i32_1 = arith.constant 0 : i32
    return %c0_i32, %c0_i32_0 : i32, i32
  }
  func.func @transform_3(%arg0: i32, %arg1: i32) -> (i32, i32) {
    %c0_i32 = arith.constant 0 : i32
    %c0_i32_0 = arith.constant 0 : i32
    %c0_i32_1 = arith.constant 0 : i32
    return %c0_i32, %c0_i32_0 : i32, i32
  }
  func.func @transform_4(%arg0: i32, %arg1: i32) -> (i32, i32) {
    %c0_i32 = arith.constant 0 : i32
    %c0_i32_0 = arith.constant 0 : i32
    %c0_i32_1 = arith.constant 0 : i32
    return %c0_i32, %c0_i32_0 : i32, i32
  }
  func.func @transform_5(%arg0: i32, %arg1: i32) -> (i32, i32) {
    %c0_i32 = arith.constant 0 : i32
    %c0_i32_0 = arith.constant 0 : i32
    %c0_i32_1 = arith.constant 0 : i32
    return %c0_i32, %c0_i32_0 : i32, i32
  }
  func.func @transform_6(%arg0: i32, %arg1: i32) -> (i32, i32) {
    %c0_i32 = arith.constant 0 : i32
    %c0_i32_0 = arith.constant 0 : i32
    %c0_i32_1 = arith.constant 0 : i32
    return %c0_i32, %c0_i32_0 : i32, i32
  }
  func.func @transform_7(%arg0: i32, %arg1: i32) -> (i32, i32) {
    %c0_i32 = arith.constant 0 : i32
    %c0_i32_0 = arith.constant 0 : i32
    return %arg0, %c0_i32 : i32, i32
  }
}

</mosaic_0001>

<bundles_post_ra>
// kernel: tpu_custom_call.1
= control target key start
LH: loop header
LB: loop body
LE: loop exit
PB: predicated region body
PF: predicated region fallthrough
CT: control target
= control target key end

     0   :  { %s4706_s0 = inlined_call_operand.hbm [shape: bf16[12,8,512], index: 0, kind: input, shape index: {}]   ;;  %s4707_s1 = inlined_call_operand.hbm [shape: bf16[128,512], index: 1, kind: input, shape index: {}]   ;;  %s4708_s2 = inlined_call_operand.hbm [shape: bf16[128,512], index: 2, kind: input, shape index: {}]   ;;  %s4709_s3 = inlined_call_operand.hbm [shape: bf16[128,512], index: 3, kind: input, shape index: {}]   ;;  %s4710_s4 = inlined_call_operand.hbm [shape: f32[1,512], index: 4, kind: input, shape index: {}]   ;;  %s4711_s5 = inlined_call_operand.hbm [shape: f32[128,128], index: 5, kind: input, shape index: {}]   ;;  %s4712_s6 = inlined_call_operand.hbm [shape: f32[1,128], index: 6, kind: input, shape index: {}]   ;;  %s4713_s7 = inlined_call_operand.hbm [shape: f32[8,128], index: 7, kind: output, shape index: {}]  }
   0x1   :  { %4860 = sst [smem:[#allocation78_spill]] %s4707_s1 }
   0x2   :  { %4861 = sst [smem:[#allocation79_spill]] %s4709_s3 }
   0x3   :  { %4862 = sst [smem:[#allocation80_spill]] %s4713_s7 }
   0x4   :  { %12 = vsyncpa [#allocation7], 0 }
   0x5   :  { %14 = vsyncpa [#allocation7 + $0x1], 0 }
   0x6   :  { %15 = vsyncpa [#allocation10], 0 }
   0x7   :  { %16 = vsyncpa [#allocation13], 0 }
   0x8   :  { %17 = vsyncpa [#allocation16], 0 }
   0x9   :  { %18 = vsyncpa [#allocation8], 0  ;;  %s3599_s24 = smov 0   ;;  %s3601_s25 = smov 0  }
   0xa   :  { %s3603_s26 = smov 0   ;;  %s3605_s27 = smov 0  }
   0xb   :  { %s3607_s28 = smov 0   ;;  %s3609_s29 = smov 0  }
   0xc LB: > { %s4714_s30 = sadd.s32 4294967295, %s3540_s29   ;;  %p2518_p0 = scmp.ge.s32.totalorder %s3540_s29, 1  ;;  %s3540_s29 = sphi %s3609_s29, %s24_s29   ;;  %s3536_s28 = sphi %s3607_s28, %s5072_s28   ;;  %s3532_s27 = sphi %s3605_s27, %s5071_s27   ;;  %s3528_s26 = sphi %s3603_s26, %s5070_s26   ;;  %s3524_s25 = sphi %s3601_s25, %s5069_s25   ;;  %s3520_s24 = sphi %s3599_s24, %s5068_s24  }
   0xd   : > { %p3633_p1 = scmp.eq.s32.totalorder %s4714_s30, 0  ;;  %p221_p2 = scmp.lt.s32.totalorder %s3540_s29, 4 }
   0xe   : > { %s3542_s10 = smov [#allocation9]   ;;  %s3543_s13 = smov [#allocation12]  }
   0xf   : > { %s4863_s8 = scalar_select %p3633_p1, 1, 0 }
  0x10   : > { %p3638_p3 = pnand %p2518_p0, %p221_p2  ;;  %s233_s11 = sshll.u32 %s3542_s10, 4  ;;  %s3642_s11 = int_to_ptr.vmem [resolvable:$true] %s233_s11 }
  0x11   : > { %s259_s14 = sshll.u32 %s3543_s13, 4  ;;  %s3544_s15 = smov [#allocation15]   ;;  %s3652_s14 = int_to_ptr.vmem [resolvable:$true] %s259_s14 }
  0x12   : > { %s4864_s9 = scalar_select %p3638_p3, 1, 0 }
  0x13   : > { %p2780_p4 = pneg %p3638_p3  ;;  %s3654_s16 = sshll.u32 %s3544_s15, 4  ;;  %s284_s16 = int_to_ptr.vmem [resolvable:$true] %s3654_s16 }
  0x14   : > { %s4866_s1 = sld [smem:[#allocation78_spill]] }
  0x15   : > { %p3648_p5 = pnand %p2780_p4, %p3633_p1 }
  0x17   : > { %p3664_p7 = pneg %p3648_p5 }
  0x1a   : > { %s3250_s19 = scalar_lea.hbm %s4866_s1, 4096 }
  0x1b   : > { %p3251_p6 = scmp.ne.s32.totalorder %s4866_s1, %s3250_s19  ;;  %p3257_p10 = scmp.lt.u32.totalorder %s3250_s19, %s4866_s1 }
  0x1d   : > { %p3253_p8 = pnand %p3664_p7, %p3251_p6 }
  0x1f   : > { %p3254_p9 = pneg %p3253_p8 }
  0x21   : > { %p3259_p11 = pnand %p3257_p10, %p3254_p9 }
  0x23   : > { %3262 = shalt.err (!%p3259_p11)
}
  0x24   : > { %s3263_s13 = scalar_lea.vmem %s3642_s11, 4096  ;;  %p3271_p2 = scmp.lt.s32.totalorder %s3642_s11, %s3642_s11 }
  0x25   : > { %p3264_p12 = scmp.ne.s32.totalorder %s3642_s11, %s3263_s13  ;;  %p3272_p4 = scmp.lt.s32.totalorder %s3263_s13, %s3263_s13 }
  0x27   : > { %p3266_p13 = pnand %p3264_p12, %p3664_p7  ;;  %p3273_p6 = por %p3272_p4, %p3271_p2 }
  0x29   : > { %p3267_p0 = pneg %p3266_p13 }
  0x2b   : > { %p3274_p8 = pnand %p3273_p6, %p3267_p0 }
  0x2d   : > { %3277 = shalt.err (!%p3274_p8)
}
  0x2e   : > { %s4719_s15 = smov 256   ;;  %s4721_s17 = smov 16  }
  0x2f   : > { %2783 = dma.hbm_to_vmem [thread:$0]  (!%p3648_p5), %s4866_s1, 4096, %s3642_s11, [#allocation10], %s4719_s15, %s4719_s15, %s4721_s17  }
  0x30   : > { %s4868_s3 = sld [smem:[#allocation79_spill]] }
  0x36   : > { %s3278_s23 = scalar_lea.hbm %s4868_s3, 4096 }
  0x37   : > { %p3279_p9 = scmp.ne.s32.totalorder %s4868_s3, %s3278_s23  ;;  %p3285_p12 = scmp.lt.u32.totalorder %s3278_s23, %s4868_s3 }
  0x39   : > { %p3281_p10 = pnand %p3279_p9, %p3664_p7 }
  0x3b   : > { %p3282_p11 = pneg %p3281_p10 }
  0x3d   : > { %p3287_p13 = pnand %p3285_p12, %p3282_p11 }
  0x3f   : > { %3290 = shalt.err (!%p3287_p13)
}
  0x40   : > { %s3291_s11 = scalar_lea.vmem %s3652_s14, 4096  ;;  %p3299_p6 = scmp.lt.s32.totalorder %s3652_s14, %s3652_s14 }
  0x41   : > { %p3292_p0 = scmp.ne.s32.totalorder %s3652_s14, %s3291_s11  ;;  %p3300_p8 = scmp.lt.s32.totalorder %s3291_s11, %s3291_s11 }
  0x43   : > { %p3294_p2 = pnand %p3292_p0, %p3664_p7  ;;  %p3301_p9 = por %p3300_p8, %p3299_p6 }
  0x45   : > { %p3295_p4 = pneg %p3294_p2 }
  0x47   : > { %p3302_p10 = pnand %p3301_p9, %p3295_p4 }
  0x49   : > { %3305 = shalt.err (!%p3302_p10)
}
  0x4a   : > { %2789 = dma.hbm_to_vmem [thread:$0]  (!%p3648_p5), %s4868_s3, 4096, %s3652_s14, [#allocation13], %s4719_s15, %s4719_s15, %s4721_s17  }
  0x4b   : > { %s3306_s20 = scalar_lea.hbm %s4711_s5, 2048 }
  0x4c   : > { %p3307_p11 = scmp.ne.s32.totalorder %s4711_s5, %s3306_s20  ;;  %p3313_p0 = scmp.lt.u32.totalorder %s3306_s20, %s4711_s5 }
  0x4e   : > { %p3309_p12 = pnand %p3307_p11, %p3664_p7 }
  0x50   : > { %p3310_p13 = pneg %p3309_p12 }
  0x52   : > { %p3315_p2 = pnand %p3313_p0, %p3310_p13 }
  0x54   : > { %3318 = shalt.err (!%p3315_p2)
}
  0x55   : > { %s3319_s11 = scalar_lea.vmem %s284_s16, 2048  ;;  %p3327_p9 = scmp.lt.s32.totalorder %s284_s16, %s284_s16 }
  0x56   : > { %p3320_p4 = scmp.ne.s32.totalorder %s284_s16, %s3319_s11  ;;  %p3328_p10 = scmp.lt.s32.totalorder %s3319_s11, %s3319_s11 }
  0x58   : > { %p3322_p6 = pnand %p3320_p4, %p3664_p7  ;;  %p3329_p3 = por %p3328_p10, %p3327_p9 }
  0x5a   : > { %p3323_p8 = pneg %p3322_p6 }
  0x5c   : > { %p3330_p1 = pnand %p3329_p3, %p3323_p8 }
  0x5e   : > { %3333 = shalt.err (!%p3330_p1)
}
  0x5f   : > { %s3547_s14 = smov 128   ;;  %s3548_s7 = smov 8  }
  0x60   : > { %2795 = dma.hbm_to_vmem [thread:$0]  (!%p3648_p5), %s4711_s5, 2048, %s284_s16, [#allocation16], %s3547_s14, %s3547_s14, %s3548_s7  }
  0x61   : > { %s3549_s19 = smov [#allocation11]   ;;  %s3550_s21 = smov [#allocation14]  }
  0x62   : > { %s246_s20 = sshll.u32 %s3549_s19, 4  ;;  %s273_s23 = sshll.u32 %s3550_s21, 4  ;;  %s247_s20 = int_to_ptr.vmem [resolvable:$true] %s246_s20  ;;  %s274_s23 = int_to_ptr.vmem [resolvable:$true] %s273_s23 }
  0x63   : > { %s3334_s11 = scalar_lea.hbm %s4708_s2, 4096 }
  0x64   : > { %p3335_p1 = scmp.ne.s32.totalorder %s4708_s2, %s3334_s11  ;;  %p3341_p12 = scmp.lt.u32.totalorder %s3334_s11, %s4708_s2 }
  0x66   : > { %p3337_p3 = pnand %p3335_p1, %p3664_p7 }
  0x68   : > { %p3338_p11 = pneg %p3337_p3 }
  0x6a   : > { %p3343_p13 = pnand %p3341_p12, %p3338_p11 }
  0x6c   : > { %3346 = shalt.err (!%p3343_p13)
}
  0x6d   : > { %s3347_s16 = scalar_lea.vmem %s247_s20, 4096  ;;  %p3355_p6 = scmp.lt.s32.totalorder %s247_s20, %s247_s20 }
  0x6e   : > { %p3348_p0 = scmp.ne.s32.totalorder %s247_s20, %s3347_s16  ;;  %p3356_p8 = scmp.lt.s32.totalorder %s3347_s16, %s3347_s16 }
  0x70   : > { %p3350_p2 = pnand %p3348_p0, %p3664_p7  ;;  %p3357_p9 = por %p3356_p8, %p3355_p6 }
  0x72   : > { %p3351_p4 = pneg %p3350_p2 }
  0x74   : > { %p3358_p10 = pnand %p3357_p9, %p3351_p4 }
  0x76   : > { %3361 = shalt.err (!%p3358_p10)
}
  0x77   : > { %s4869_s15 = smov 16   ;;  %s4870_s17 = smov 256  }
  0x78   : > { %2786 = dma.hbm_to_vmem [thread:$0]  (!%p3648_p5), %s4708_s2, 4096, %s247_s20, [#allocation10], %s4870_s17, %s4870_s17, %s4869_s15  }
  0x79   : > { %s3362_s30 = scalar_lea.hbm %s4710_s4, 64 }
  0x7a   : > { %p3363_p1 = scmp.ne.s32.totalorder %s4710_s4, %s3362_s30  ;;  %p3369_p12 = scmp.lt.u32.totalorder %s3362_s30, %s4710_s4 }
  0x7c   : > { %p3365_p3 = pnand %p3363_p1, %p3664_p7 }
  0x7e   : > { %p3366_p11 = pneg %p3365_p3 }
  0x80   : > { %p3371_p13 = pnand %p3369_p12, %p3366_p11 }
  0x82   : > { %3374 = shalt.err (!%p3371_p13)
}
  0x83   : > { %s3375_s13 = scalar_lea.vmem %s274_s23, 64  ;;  %p3383_p6 = scmp.lt.s32.totalorder %s274_s23, %s274_s23 }
  0x84   : > { %p3376_p0 = scmp.ne.s32.totalorder %s274_s23, %s3375_s13  ;;  %p3384_p8 = scmp.lt.s32.totalorder %s3375_s13, %s3375_s13 }
  0x86   : > { %p3378_p2 = pnand %p3376_p0, %p3664_p7  ;;  %p3385_p9 = por %p3384_p8, %p3383_p6 }
  0x88   : > { %p3379_p4 = pneg %p3378_p2 }
  0x8a   : > { %p3386_p10 = pnand %p3385_p9, %p3379_p4 }
  0x8c   : > { %3389 = shalt.err (!%p3386_p10)
}
  0x8d   : > { %2792 = dma.hbm_to_vmem [thread:$0]  (!%p3648_p5), %s4710_s4, 64, %s274_s23, [#allocation13]  }
  0x8e   : > { %s3551_s16 = smov [#allocation17]   ;;  %s3390_s7 = scalar_lea.hbm %s4712_s6, 16 }
  0x8f   : > { %s297_s1 = sshll.u32 %s3551_s16, 4  ;;  %p3391_p1 = scmp.ne.s32.totalorder %s4712_s6, %s3390_s7  ;;  %s298_s1 = int_to_ptr.vmem [resolvable:$true] %s297_s1 }
  0x90   : > { %p3397_p12 = scmp.lt.u32.totalorder %s3390_s7, %s4712_s6 }
  0x91   : > { %p3393_p3 = pnand %p3391_p1, %p3664_p7 }
  0x93   : > { %p3394_p11 = pneg %p3393_p3 }
  0x95   : > { %p3399_p13 = pnand %p3397_p12, %p3394_p11 }
  0x97   : > { %3402 = shalt.err (!%p3399_p13)
}
  0x98   : > { %s3403_s23 = scalar_lea.vmem %s298_s1, 16  ;;  %s3410_s10 = scalar_lea.vmem %s298_s1, 32 }
  0x99   : > { %p3404_p0 = scmp.ne.s32.totalorder %s298_s1, %s3403_s23  ;;  %p3411_p6 = scmp.lt.s32.totalorder %s298_s1, %s298_s1 }
  0x9a   : > { %p3412_p8 = scmp.lt.s32.totalorder %s3410_s10, %s3403_s23 }
  0x9b   : > { %p3406_p2 = pnand %p3404_p0, %p3664_p7 }
  0x9c   : > { %p3413_p9 = por %p3412_p8, %p3411_p6 }
  0x9d   : > { %p3407_p4 = pneg %p3406_p2 }
  0x9f   : > { %p3414_p10 = pnand %p3413_p9, %p3407_p4 }
  0xa1   : > { %3417 = shalt.err (!%p3414_p10)
}
  0xa2   : > { %2798 = dma.hbm_to_vmem [thread:$0]  (!%p3648_p5), %s4712_s6, 16, %s298_s1, [#allocation16]  }
  0xa3   : > { %s33_s22 = sadd.s32 1, %s3536_s28  ;;  %s45_s11 = sadd.s32 1, %s3528_s26 }
  0xa4   : > { %p34_p7 = scmp.ge.s32.totalorder %s33_s22, 3  ;;  %p52_p1 = scmp.ne.s32.totalorder %s3528_s26, %s3524_s25 }
  0xa5   : > { %p53_p3 = scmp.eq.s32.totalorder %s3540_s29, 0  ;;  %p58_p11 = scmp.ne.s32.totalorder %s3524_s25, %s3520_s24 }
  0xa6   : > { %s5074_s22 = smov (%p34_p7, %s33_s22), 0  ;;  %p4872_p13 = scmp.ne.s32.totalorder %s4863_s8, 0 }
  0xa7   : > { %p3799_p12 = por %p53_p3, %p52_p1  ;;  %s40_s1 = ssub.s32 %s3536_s28, %s5074_s22 }
  0xa8   : > { %p3805_p0 = por %p4872_p13, %p58_p11  ;;  %p2809_p5 = scmp.lt.s32.totalorder %s3540_s29, 3 }
  0xa9   : > { %p43_p2 = scmp.eq.s32.totalorder %s40_s1, 0  ;;  %s308_s3 = sand.u32 1, %s3528_s26  }
  0xaa   : > { %s2526_s14 = sshll.u32 %s308_s3, 6  ;;  %s2673_s24 = sshll.u32 %s3536_s28, 10 }
  0xab   : > { %s3814_s7 = scalar_select %p43_p2, %s3528_s26, %s45_s11  }
  0xac   : > { %s3820_s19 = scalar_lea.hbm %s4706_s0, %s2673_s24  ;;  %s312_s21 = scalar_lea.vmem [#allocation6], %s2526_s14 }
  0xad   : > { %s322_s23 = sshll.u32 %s312_s21, 4  ;;  %p3826_p4 = pnand %p2809_p5, %p3799_p12  ;;  %s3822_s23 = int_to_ptr.vmem [resolvable:$true] %s322_s23 }
  0xae   : > { %s3830_s13 = scalar_lea.sflag [#allocation7], %s308_s3  ;;  %s3418_s20 = scalar_lea.hbm %s3820_s19, 1024 }
  0xaf   : > { %p3419_p6 = scmp.ne.s32.totalorder %s3820_s19, %s3418_s20  ;;  %p3420_p8 = pneg %p3826_p4 }
  0xb0   : > { %s3423_s12 = scalar_lea.hbm %s4706_s0, 3072  ;;  %p3424_p7 = scmp.lt.u32.totalorder %s3820_s19, %s4706_s0 }
  0xb1   : > { %p3421_p9 = pnand %p3420_p8, %p3419_p6  ;;  %p3425_p1 = scmp.lt.u32.totalorder %s3423_s12, %s3418_s20 }
  0xb2   : > { %p3427_p11 = scmp.lt.u32.totalorder %s3418_s20, %s3820_s19 }
  0xb3   : > { %p3422_p10 = pneg %p3421_p9  ;;  %p3426_p3 = por %p3425_p1, %p3424_p7 }
  0xb5   : > { %p3428_p12 = por %p3427_p11, %p3426_p3 }
  0xb7   : > { %p3429_p13 = pnand %p3428_p12, %p3422_p10 }
  0xb9   : > { %3432 = shalt.err (!%p3429_p13)
}
  0xba   : > { %s3433_s3 = scalar_lea.vmem %s3822_s23, 1024  ;;  %s3552_s30 = smov [#allocation6]  }
  0xbb   : > { %p3434_p5 = scmp.ne.s32.totalorder %s3822_s23, %s3433_s3  ;;  %s3438_s18 = sshll.u32 %s3552_s30, 4  ;;  %s3439_s18 = int_to_ptr.vmem [resolvable:$false] %s3438_s18 }
  0xbc   : > { %s3440_s21 = scalar_lea.vmem %s3439_s18, 2048  ;;  %p3441_p9 = scmp.lt.s32.totalorder %s3822_s23, %s3439_s18 }
  0xbd   : > { %p3436_p2 = pnand %p3434_p5, %p3420_p8  ;;  %p3442_p7 = scmp.lt.s32.totalorder %s3440_s21, %s3433_s3 }
  0xbf   : > { %p3437_p6 = pneg %p3436_p2  ;;  %p3443_p1 = por %p3442_p7, %p3441_p9 }
  0xc1   : > { %p3444_p3 = pnand %p3443_p1, %p3437_p6 }
  0xc3   : > { %3447 = shalt.err (!%p3444_p3)
}
  0xc4   : > { %2802 = dma.hbm_to_vmem [thread:$0]  (!%p3826_p4), %s3820_s19, 1024, %s3822_s23, %s3830_s13, %s4870_s17, %s4870_s17, %s4869_s15  }
  0xc5   : > { %p4875_p8 = scmp.ne.s32.totalorder %s4864_s9, 0 }
  0xc7   : > { %334 = sbr.rel (%p4875_p8) target bundleno = 1936 (0x790), region = 48 }
  0xce   : > { %s336_s20 = sand.u32 1, %s3524_s25  }
  0xcf   : > { %s2531_s11 = sshll.u32 %s336_s20, 6  ;;  %s337_s1 = scalar_lea.sflag [#allocation7], %s336_s20 }
  0xd0   : > { %s3864_s12 = scalar_lea.vmem [#allocation6], %s2531_s11 }
  0xd1   : > { %3499 = dma.done.wait (%p3805_p0), %s337_s1, 1024  }
  0xd2   : > { %3501 = vsyncadd (%p3805_p0), %s337_s1, 4294966272  ;;  %p4876_p10 = scmp.ne.s32.totalorder %s4863_s8, 0 }
  0xd4   : > { %3503 = dma.done.wait (%p4876_p10), [#allocation10], 8192  }
  0xd5   : > { %3505 = vsyncadd (%p4876_p10), [#allocation10], 4294959104 }
  0xd6   : > { %3507 = dma.done.wait (%p4876_p10), [#allocation13], 4160  }
  0xd7   : > { %3509 = vsyncadd (%p4876_p10), [#allocation13], 4294963136 }
  0xd8   : > { %3511 = dma.done.wait (%p4876_p10), [#allocation16], 2064  }
  0xd9   : > { %3513 = vsyncadd (%p4876_p10), [#allocation16], 4294965232  ;;  %p2538_p0 = scmp.ne.s32.totalorder %s3532_s27, 0 }
  0xda   : > { %v3553_v0 = vmov (!%p2538_p0), 0.0  }
  0xdb   : > { %395 = sbr.rel (%p2538_p0) target bundleno = 226 (0xe2), region = 80  ;;  %396 = vst [vmem:[#allocation2] sm:$0xff] (!%p2538_p0), %v3553_v0  ;;  %397 = vst [vmem:[#allocation3] sm:$0xff] (!%p2538_p0), %v3553_v0 }
  0xdc   : > { %398 = vst [vmem:[#allocation4] sm:$0xff] (!%p2538_p0), %v3553_v0  ;;  %399 = vst [vmem:[#allocation5] sm:$0xff] (!%p2538_p0), %v3553_v0 }
  0xe2 PF: > { %v3883_v1 = vld [vmem:[#allocation9 + $0x4] ss:$16 sps:$4 sm:$0xff]   ;;  %v3885_v2 = vld [vmem:[#allocation9] ss:$16 sps:$4 sm:$0xff]   ;;  %v4723_v3 = vmov 0   ;;  %s4210_s8 = sshll.u32 %s3532_s27, 2 }
  0xe3   : > { %722 = vmatprep.mubr.bf16.mxu0 %v4723_v3  ;;  %763 = vmatprep.mubr.bf16.mxu1 %v4723_v3  ;;  %v3890_v4 = vld [vmem:[#allocation9 + $0x24] ss:$16 sps:$4 sm:$0xff]   ;;  %v3893_v5 = vld [vmem:[#allocation9 + $0x20] ss:$16 sps:$4 sm:$0xff]   ;;  %v3898_v7 = vld [vmem:[#allocation9 + $0xc] ss:$16 sps:$4 sm:$0xff]  }
  0xe4   : > { %690 = vmatprep.subr.bf16.mxu0 %v3883_v1  ;;  %v3896_v6 = vld [vmem:[#allocation9 + $0x44] ss:$16 sps:$4 sm:$0xff]   ;;  %v3900_v8 = vld [vmem:[#allocation9 + $0x8] ss:$16 sps:$4 sm:$0xff]   ;;  %v3903_v9 = vld [vmem:[#allocation9 + $0x40] ss:$16 sps:$4 sm:$0xff]   ;;  %731 = vmatprep.subr.bf16.mxu1 %v3898_v7 }
  0xe5   : > { %691 = vmatpush1.bf16.msra.mxu0 %v3885_v2  ;;  %v3907_v10 = vld [vmem:[#allocation9 + $0x64] ss:$16 sps:$4 sm:$0xff]   ;;  %732 = vmatpush1.bf16.msra.mxu1 %v3900_v8  ;;  %v3910_v11 = vld [vmem:[#allocation9 + $0x2c] ss:$16 sps:$4 sm:$0xff]   ;;  %v3912_v12 = vld [vmem:[#allocation9 + $0x28] ss:$16 sps:$4 sm:$0xff]  }
  0xe6   : > { %692 = vmatprep.subr.bf16.mxu0 %v3890_v4  ;;  %733 = vmatprep.subr.bf16.mxu1 %v3910_v11  ;;  %v3916_v13 = vld [vmem:[#allocation9 + $0x60] ss:$16 sps:$4 sm:$0xff]   ;;  %v3918_v14 = vld [vmem:[#allocation9 + $0x84] ss:$16 sps:$4 sm:$0xff]   ;;  %v3920_v15 = vld [vmem:[#allocation9 + $0x4c] ss:$16 sps:$4 sm:$0xff]  }
  0xe7   : > { %v3924_v16 = vld [vmem:[#allocation9 + $0x48] ss:$16 sps:$4 sm:$0xff]   ;;  %v3927_v17 = vld [vmem:[#allocation9 + $0x6c] ss:$16 sps:$4 sm:$0xff]   ;;  %v3930_v18 = vld [vmem:[#allocation9 + $0x80] ss:$16 sps:$4 sm:$0xff]  }
  0xe8   : > { %v3933_v19 = vld [vmem:[#allocation9 + $0xa4] ss:$16 sps:$4 sm:$0xff]   ;;  %v3936_v20 = vld [vmem:[#allocation9 + $0x68] ss:$16 sps:$4 sm:$0xff]   ;;  %v3939_v21 = vld [vmem:[#allocation9 + $0x8c] ss:$16 sps:$4 sm:$0xff]  }
  0xe9   : > { %693 = vmatpush1.bf16.msra.mxu0 %v3893_v5  ;;  %734 = vmatpush1.bf16.msra.mxu1 %v3912_v12  ;;  %v3941_v22 = vld [vmem:[#allocation9 + $0xa0] ss:$16 sps:$4 sm:$0xff]   ;;  %v3944_v23 = vld [vmem:[#allocation9 + $0xc4] ss:$16 sps:$4 sm:$0xff]   ;;  %v3948_v24 = vld [vmem:[#allocation9 + $0x88] ss:$16 sps:$4 sm:$0xff]  }
  0xea   : > { %694 = vmatprep.subr.bf16.mxu0 %v3896_v6  ;;  %735 = vmatprep.subr.bf16.mxu1 %v3920_v15  ;;  %v3951_v25 = vld [vmem:[#allocation9 + $0xac] ss:$16 sps:$4 sm:$0xff]   ;;  %v3953_v26 = vld [vmem:[#allocation9 + $0xc0] ss:$16 sps:$4 sm:$0xff]   ;;  %v3956_v27 = vld [vmem:[#allocation9 + $0xe4] ss:$16 sps:$4 sm:$0xff]  }
  0xeb   : > { %v3960_v28 = vld [vmem:[#allocation9 + $0xa8] ss:$16 sps:$4 sm:$0xff]   ;;  %v3963_v29 = vld [vmem:[#allocation9 + $0xcc] ss:$16 sps:$4 sm:$0xff]   ;;  %v3965_v30 = vld [vmem:[#allocation9 + $0xe0] ss:$16 sps:$4 sm:$0xff]  }
  0xec   : > { %v3967_v31 = vld [vmem:[#allocation2] sm:$0xff]  ;;  %v3970_v32 = vld [vmem:[#allocation9 + $0xc8] ss:$16 sps:$4 sm:$0xff]   ;;  %v3977_v34 = vld [vmem:[#allocation9 + $0xec] ss:$16 sps:$4 sm:$0xff]   ;;  %p1314_p4 = scmp.lt.s32.totalorder %s4210_s8, 10 }
  0xed   : > { %695 = vmatpush1.bf16.msra.mxu0 %v3903_v9  ;;  %736 = vmatpush1.bf16.msra.mxu1 %v3924_v16  ;;  %v3974_v33 = vld [vmem:[#allocation12 + $0x4] ss:$16 sps:$4 sm:$0xff]   ;;  %v529_v35 = vpack.c.bf16 %v3967_v31, %v3967_v31  ;;  %v3981_v36 = vld [vmem:[#allocation9 + $0xe8] ss:$16 sps:$4 sm:$0xff]   ;;  %v3984_v37 = vld [vmem:[#allocation12] ss:$16 sps:$4 sm:$0xff]  }
  0xee   : > { %696 = vmatprep.subr.bf16.mxu0 %v3907_v10  ;;  %737 = vmatprep.subr.bf16.mxu1 %v3927_v17  ;;  %v3988_v38 = vld [vmem:[#allocation12 + $0x24] ss:$16 sps:$4 sm:$0xff]   ;;  %v3991_v39 = vld [vmem:[#allocation12 + $0xc] ss:$16 sps:$4 sm:$0xff]   ;;  %v3993_v40 = vld [vmem:[#allocation12 + $0x20] ss:$16 sps:$4 sm:$0xff]  }
  0xef   : > { %v3995_v41 = vld [vmem:[#allocation12 + $0x8] ss:$16 sps:$4 sm:$0xff]   ;;  %v3997_v42 = vld [vmem:[#allocation12 + $0x44] ss:$16 sps:$4 sm:$0xff]   ;;  %v4000_v43 = vld [vmem:[#allocation12 + $0x2c] ss:$16 sps:$4 sm:$0xff]  }
  0xf0   : > { %v4006_v44 = vld [vmem:[#allocation12 + $0x40] ss:$16 sps:$4 sm:$0xff]   ;;  %v4008_v45 = vld [vmem:[#allocation12 + $0x28] ss:$16 sps:$4 sm:$0xff]   ;;  %v4010_v46 = vld [vmem:[#allocation12 + $0x64] ss:$16 sps:$4 sm:$0xff]  }
  0xf1   : > { %697 = vmatpush1.bf16.msra.mxu0 %v3916_v13  ;;  %738 = vmatpush1.bf16.msra.mxu1 %v3936_v20  ;;  %4877 = vst [vmem:[#allocation24_spill] sm:$0xff] %v4010_v46  ;;  %v4013_v47 = vld [vmem:[#allocation12 + $0x4c] ss:$16 sps:$4 sm:$0xff]   ;;  %v4018_v48 = vld [vmem:[#allocation12 + $0x60] ss:$16 sps:$4 sm:$0xff]   ;;  %s1634_s15 = sadd.s32 1, %s4210_s8 }
  0xf2   : > { %698 = vmatprep.subr.bf16.mxu0 %v3918_v14  ;;  %739 = vmatprep.subr.bf16.mxu1 %v3939_v21  ;;  %4878 = vst [vmem:[#allocation25_spill] sm:$0xff] %v4018_v48  ;;  %v4021_v49 = vld [vmem:[#allocation12 + $0x48] ss:$16 sps:$4 sm:$0xff]   ;;  %v4023_v50 = vld [vmem:[#allocation12 + $0x84] ss:$16 sps:$4 sm:$0xff]   ;;  %p4308_p11 = scmp.lt.s32.totalorder %s1634_s15, 10 }
  0xf3   : > { %4879 = vst [vmem:[#allocation26_spill] sm:$0xff] %v4021_v49  ;;  %4880 = vst [vmem:[#allocation27_spill] sm:$0xff] %v4023_v50  ;;  %v4026_v51 = vld [vmem:[#allocation12 + $0x6c] ss:$16 sps:$4 sm:$0xff]   ;;  %v4031_v52 = vld [vmem:[#allocation12 + $0x68] ss:$16 sps:$4 sm:$0xff]  }
  0xf4   : > { %4881 = vst [vmem:[#allocation28_spill] sm:$0xff] %v4026_v51  ;;  %4882 = vst [vmem:[#allocation29_spill] sm:$0xff] %v4031_v52  ;;  %v4038_v53 = vld [vmem:[#allocation12 + $0x80] ss:$16 sps:$4 sm:$0xff]   ;;  %v4040_v54 = vld [vmem:[#allocation12 + $0x8c] ss:$16 sps:$4 sm:$0xff]  }
  0xf5   : > { %699 = vmatpush1.bf16.msra.mxu0 %v3930_v18  ;;  %740 = vmatpush1.bf16.msra.mxu1 %v3948_v24  ;;  %4883 = vst [vmem:[#allocation30_spill] sm:$0xff] %v4038_v53  ;;  %4884 = vst [vmem:[#allocation31_spill] sm:$0xff] %v4040_v54  ;;  %v4042_v55 = vld [vmem:[#allocation12 + $0x88] ss:$16 sps:$4 sm:$0xff]   ;;  %v4047_v56 = vld [vmem:[#allocation12 + $0xa4] ss:$16 sps:$4 sm:$0xff]  }
  0xf6   : > { %700 = vmatprep.subr.bf16.mxu0 %v3933_v19  ;;  %741 = vmatprep.subr.bf16.mxu1 %v3951_v25  ;;  %4885 = vst [vmem:[#allocation32_spill] sm:$0xff] %v4042_v55  ;;  %4886 = vst [vmem:[#allocation33_spill] sm:$0xff] %v4047_v56  ;;  %v4049_v57 = vld [vmem:[#allocation12 + $0xa0] ss:$16 sps:$4 sm:$0xff]   ;;  %v4051_v58 = vld [vmem:[#allocation12 + $0xac] ss:$16 sps:$4 sm:$0xff]  }
  0xf7   : > { %4887 = vst [vmem:[#allocation34_spill] sm:$0xff] %v4049_v57  ;;  %4888 = vst [vmem:[#allocation35_spill] sm:$0xff] %v4051_v58  ;;  %v4054_v59 = vld [vmem:[#allocation12 + $0xa8] ss:$16 sps:$4 sm:$0xff]   ;;  %v4059_v60 = vld [vmem:[#allocation12 + $0xc4] ss:$16 sps:$4 sm:$0xff]  }
  0xf8   : > { %4889 = vst [vmem:[#allocation36_spill] sm:$0xff] %v4054_v59  ;;  %4890 = vst [vmem:[#allocation37_spill] sm:$0xff] %v4059_v60  ;;  %v4061_v61 = vld [vmem:[#allocation12 + $0xc0] ss:$16 sps:$4 sm:$0xff]   ;;  %v4063_v62 = vld [vmem:[#allocation12 + $0xcc] ss:$16 sps:$4 sm:$0xff]  }
  0xf9   : > { %701 = vmatpush1.bf16.msra.mxu0 %v3941_v22  ;;  %742 = vmatpush1.bf16.msra.mxu1 %v3960_v28  ;;  %4891 = vst [vmem:[#allocation38_spill] sm:$0xff] %v4061_v61  ;;  %4892 = vst [vmem:[#allocation39_spill] sm:$0xff] %v4063_v62  ;;  %v4066_v63 = vld [vmem:[#allocation12 + $0xc8] ss:$16 sps:$4 sm:$0xff]   ;;  %v4071_v0 = vld [vmem:[#allocation12 + $0xe4] ss:$16 sps:$4 sm:$0xff]  }
  0xfa   : > { %702 = vmatprep.subr.bf16.mxu0 %v3944_v23  ;;  %743 = vmatprep.subr.bf16.mxu1 %v3963_v29  ;;  %4893 = vst [vmem:[#allocation40_spill] sm:$0xff] %v4066_v63  ;;  %4894 = vst [vmem:[#allocation41_spill] sm:$0xff] %v4071_v0  ;;  %s1315_s9 = scalar_select %p1314_p4, 1, 0 }
  0xfb   : > { %s1636_s16 = scalar_select %p4308_p11, 1, 0 }
  0xfc   : > { %s1955_s19 = sadd.s32 2, %s4210_s8  ;;  %s2276_s13 = sadd.s32 3, %s4210_s8 }
  0xfd   : > { %703 = vmatpush1.bf16.msra.mxu0 %v3953_v26  ;;  %744 = vmatpush1.bf16.msra.mxu1 %v3970_v32  ;;  %p4523_p12 = scmp.lt.s32.totalorder %s1955_s19, 10  ;;  %p4630_p13 = scmp.lt.s32.totalorder %s2276_s13, 10 }
  0xfe   : > { %704 = vmatprep.subr.bf16.mxu0 %v3956_v27  ;;  %745 = vmatprep.subr.bf16.mxu1 %v3977_v34  ;;  %p2666_p5 = scmp.ne.s32.totalorder %s3532_s27, 2 }
  0xff   : > { %s1957_s10 = scalar_select %p4523_p12, 1, 0 }
 0x100   : > { %s2278_s24 = scalar_select %p4630_p13, 1, 0 }
 0x101   : > { %705 = vmatpush1.bf16.msra.mxu0 %v3965_v30  ;;  %746 = vmatpush1.bf16.msra.mxu1 %v3981_v36  ;;  %vm3556_vm4 = vmmov (!%p2666_p5), 0  }
 0x102   : > { %962 = vmatprep.subr.bf16.mxu0 %v3974_v33  ;;  %1003 = vmatprep.subr.bf16.mxu1 %v3991_v39 }
 0x104   : > { %723 = vmatmul.mubr.bf16.vlgmr.msra.gmra.mrb[0].mxu0 %v529_v35  ;;  %764 = vmatmul.mubr.bf16.vlgmr.msra.gmra.mrb[0].mxu1 %v529_v35  ;;  %v4073_v35 = vld [vmem:[#allocation12 + $0xe0] ss:$16 sps:$4 sm:$0xff]  }
 0x105   : > { %963 = vmatpush1.bf16.msra.mxu0 %v3984_v37  ;;  %994 = vmatprep.mubr.bf16.mxu0 %v4723_v3  ;;  %4895 = vst [vmem:[#allocation42_spill] sm:$0xff] %v4073_v35 }
 0x106   : > { %964 = vmatprep.subr.bf16.mxu0 %v3988_v38  ;;  %1004 = vmatpush1.bf16.msra.mxu1 %v3995_v41 }
 0x107   : > { %1005 = vmatprep.subr.bf16.mxu1 %v4000_v43  ;;  %1035 = vmatprep.mubr.bf16.mxu1 %v4723_v3  ;;  %v4075_v3 = vld [vmem:[#allocation12 + $0xec] ss:$16 sps:$4 sm:$0xff]  }
 0x108   : > { %4896 = vst [vmem:[#allocation43_spill] sm:$0xff] %v4075_v3 }
 0x109   : > { %965 = vmatpush1.bf16.msra.mxu0 %v3993_v40 }
 0x10a   : > { %966 = vmatprep.subr.bf16.mxu0 %v3997_v42  ;;  %1006 = vmatpush1.bf16.msra.mxu1 %v4008_v45 }
 0x10b   : > { %1007 = vmatprep.subr.bf16.mxu1 %v4013_v47 }
 0x10d   : > { %967 = vmatpush1.bf16.msra.mxu0 %v4006_v44 }
 0x10e   : > { %968 = vmatprep.subr.bf16.mxu0 %v4010_v46  ;;  %1008 = vmatpush1.bf16.msra.mxu1 %v4021_v49 }
 0x10f   : > { %1009 = vmatprep.subr.bf16.mxu1 %v4026_v51 }
 0x111   : > { %969 = vmatpush1.bf16.msra.mxu0 %v4018_v48 }
 0x112   : > { %970 = vmatprep.subr.bf16.mxu0 %v4023_v50  ;;  %1010 = vmatpush1.bf16.msra.mxu1 %v4031_v52 }
 0x113   : > { %1011 = vmatprep.subr.bf16.mxu1 %v4040_v54 }
 0x115   : > { %971 = vmatpush1.bf16.msra.mxu0 %v4038_v53 }
 0x116   : > { %1012 = vmatpush1.bf16.msra.mxu1 %v4042_v55  ;;  %972 = vmatprep.subr.bf16.mxu0 %v4047_v56  ;;  %v4159_v56 = vld [vmem:[#allocation11 + $0xcc] ss:$16 sps:$4 sm:$0xff]  }
 0x117   : > { %1013 = vmatprep.subr.bf16.mxu1 %v4051_v58  ;;  %v4106_v58 = vld [vmem:[#allocation11 + $0x28] ss:$16 sps:$4 sm:$0xff]   ;;  %4925 = vst [vmem:[#allocation71_spill] sm:$0xff] %v4159_v56 }
 0x118   : > { %4907 = vst [vmem:[#allocation53_spill] sm:$0xff] %v4106_v58 }
 0x119   : > { %973 = vmatpush1.bf16.msra.mxu0 %v4049_v57  ;;  %v4091_v57 = vld [vmem:[#allocation11] ss:$16 sps:$4 sm:$0xff]  }
 0x11a   : > { %1014 = vmatpush1.bf16.msra.mxu1 %v4054_v59  ;;  %974 = vmatprep.subr.bf16.mxu0 %v4059_v60  ;;  %v4078_v59 = vld [vmem:[#allocation12 + $0xe8] ss:$16 sps:$4 sm:$0xff]   ;;  %v4082_v60 = vld [vmem:[#allocation4] sm:$0xff]  ;;  %4901 = vst [vmem:[#allocation48_spill] sm:$0xff] %v4091_v57 }
 0x11b   : > { %1015 = vmatprep.subr.bf16.mxu1 %v4063_v62  ;;  %4897 = vst [vmem:[#allocation44_spill] sm:$0xff] %v4078_v59  ;;  %4898 = vst [vmem:[#allocation45_spill] sm:$0xff] %v4082_v60  ;;  %v4089_v62 = vld [vmem:[#allocation11 + $0xc] ss:$16 sps:$4 sm:$0xff]  }
 0x11c   : > { %4900 = vst [vmem:[#allocation47_spill] sm:$0xff] %v4089_v62 }
 0x11d   : > { %975 = vmatpush1.bf16.msra.mxu0 %v4061_v61  ;;  %v4087_v61 = vld [vmem:[#allocation11 + $0x4] ss:$16 sps:$4 sm:$0xff]  }
 0x11e   : > { %1016 = vmatpush1.bf16.msra.mxu1 %v4066_v63  ;;  %976 = vmatprep.subr.bf16.mxu0 %v4071_v0  ;;  %v801_v63 = vpack.c.bf16 %v4082_v60, %v4082_v60  ;;  %4899 = vst [vmem:[#allocation46_spill] sm:$0xff] %v4087_v61  ;;  %v4093_v0 = vld [vmem:[#allocation11 + $0x8] ss:$16 sps:$4 sm:$0xff]   ;;  %v4101_v60 = vld [vmem:[#allocation11 + $0x2c] ss:$16 sps:$4 sm:$0xff]  }
 0x11f   : > { %1017 = vmatprep.subr.bf16.mxu1 %v4075_v3  ;;  %4902 = vst [vmem:[#allocation49_spill] sm:$0xff] %v4093_v0  ;;  %4904 = vst [vmem:[#allocation51_spill] sm:$0xff] %v4101_v60  ;;  %v4104_v3 = vld [vmem:[#allocation11 + $0x20] ss:$16 sps:$4 sm:$0xff]  }
 0x120   : > { %4906 = vst [vmem:[#allocation52_spill] sm:$0xff] %v4104_v3 }
 0x121   : > { %977 = vmatpush1.bf16.msra.mxu0 %v4073_v35  ;;  %v4905_v35 = vmov 0  }
 0x122   : > { %1018 = vmatpush1.bf16.msra.mxu1 %v4078_v59  ;;  %1204 = vmatprep.subr.bf16.mxu0 %v4087_v61  ;;  %v4099_v59 = vld [vmem:[#allocation11 + $0x24] ss:$16 sps:$4 sm:$0xff]  }
 0x123   : > { %1245 = vmatprep.subr.bf16.mxu1 %v4089_v62  ;;  %4903 = vst [vmem:[#allocation50_spill] sm:$0xff] %v4099_v59  ;;  %v4119_v62 = vld [vmem:[#allocation11 + $0x48] ss:$16 sps:$4 sm:$0xff]   ;;  %v4157_v61 = vld [vmem:[#allocation11 + $0xc4] ss:$16 sps:$4 sm:$0xff]  }
 0x124   : > { %995 = vmatmul.mubr.bf16.vlgmr.msra.gmra.mrb[4].mxu0 %v801_v63  ;;  %4911 = vst [vmem:[#allocation57_spill] sm:$0xff] %v4119_v62  ;;  %4924 = vst [vmem:[#allocation70_spill] sm:$0xff] %v4157_v61 }
 0x125   : > { %1036 = vmatmul.mubr.bf16.vlgmr.msra.gmra.mrb[4].mxu1 %v801_v63  ;;  %1205 = vmatpush1.bf16.msra.mxu0 %v4091_v57  ;;  %v4113_v63 = vld [vmem:[#allocation11 + $0x44] ss:$16 sps:$4 sm:$0xff]   ;;  %v4117_v57 = vld [vmem:[#allocation11 + $0x40] ss:$16 sps:$4 sm:$0xff]  }
 0x126   : > { %1246 = vmatpush1.bf16.msra.mxu1 %v4093_v0  ;;  %1236 = vmatprep.mubr.bf16.mxu0 %v4905_v35  ;;  %4908 = vst [vmem:[#allocation54_spill] sm:$0xff] %v4113_v63  ;;  %v4115_v0 = vld [vmem:[#allocation11 + $0x4c] ss:$16 sps:$4 sm:$0xff]   ;;  %4910 = vst [vmem:[#allocation56_spill] sm:$0xff] %v4117_v57 }
 0x127   : > { %1277 = vmatprep.mubr.bf16.mxu1 %v4905_v35  ;;  %1206 = vmatprep.subr.bf16.mxu0 %v4099_v59  ;;  %4909 = vst [vmem:[#allocation55_spill] sm:$0xff] %v4115_v0  ;;  %v4131_v59 = vld [vmem:[#allocation11 + $0x68] ss:$16 sps:$4 sm:$0xff]  }
 0x128   : > { %1247 = vmatprep.subr.bf16.mxu1 %v4101_v60  ;;  %v4125_v60 = vld [vmem:[#allocation11 + $0x64] ss:$16 sps:$4 sm:$0xff]   ;;  %4915 = vst [vmem:[#allocation61_spill] sm:$0xff] %v4131_v59 }
 0x129   : > { %1207 = vmatpush1.bf16.msra.mxu0 %v4104_v3  ;;  %4912 = vst [vmem:[#allocation58_spill] sm:$0xff] %v4125_v60  ;;  %v4127_v3 = vld [vmem:[#allocation11 + $0x6c] ss:$16 sps:$4 sm:$0xff]  }
 0x12a   : > { %1248 = vmatpush1.bf16.msra.mxu1 %v4106_v58  ;;  %1208 = vmatprep.subr.bf16.mxu0 %v4113_v63  ;;  %4913 = vst [vmem:[#allocation59_spill] sm:$0xff] %v4127_v3  ;;  %v4129_v58 = vld [vmem:[#allocation11 + $0x60] ss:$16 sps:$4 sm:$0xff]   ;;  %v4143_v63 = vld [vmem:[#allocation11 + $0x88] ss:$16 sps:$4 sm:$0xff]  }
 0x12b   : > { %1249 = vmatprep.subr.bf16.mxu1 %v4115_v0  ;;  %4914 = vst [vmem:[#allocation60_spill] sm:$0xff] %v4129_v58  ;;  %v4137_v0 = vld [vmem:[#allocation11 + $0x84] ss:$16 sps:$4 sm:$0xff]   ;;  %4919 = vst [vmem:[#allocation65_spill] sm:$0xff] %v4143_v63 }
 0x12c   : > { %4916 = vst [vmem:[#allocation62_spill] sm:$0xff] %v4137_v0 }
 0x12d   : > { %1209 = vmatpush1.bf16.msra.mxu0 %v4117_v57  ;;  %v4139_v57 = vld [vmem:[#allocation11 + $0x8c] ss:$16 sps:$4 sm:$0xff]  }
 0x12e   : > { %1250 = vmatpush1.bf16.msra.mxu1 %v4119_v62  ;;  %1210 = vmatprep.subr.bf16.mxu0 %v4125_v60  ;;  %4917 = vst [vmem:[#allocation63_spill] sm:$0xff] %v4139_v57  ;;  %v4141_v62 = vld [vmem:[#allocation11 + $0x80] ss:$16 sps:$4 sm:$0xff]   ;;  %v4155_v60 = vld [vmem:[#allocation11 + $0xa8] ss:$16 sps:$4 sm:$0xff]  }
 0x12f   : > { %1251 = vmatprep.subr.bf16.mxu1 %v4127_v3  ;;  %4918 = vst [vmem:[#allocation64_spill] sm:$0xff] %v4141_v62  ;;  %v4149_v3 = vld [vmem:[#allocation11 + $0xa4] ss:$16 sps:$4 sm:$0xff]   ;;  %4923 = vst [vmem:[#allocation69_spill] sm:$0xff] %v4155_v60 }
 0x130   : > { %4920 = vst [vmem:[#allocation66_spill] sm:$0xff] %v4149_v3 }
 0x131   : > { %1211 = vmatpush1.bf16.msra.mxu0 %v4129_v58  ;;  %v4151_v58 = vld [vmem:[#allocation11 + $0xac] ss:$16 sps:$4 sm:$0xff]  }
 0x132   : > { %1252 = vmatpush1.bf16.msra.mxu1 %v4131_v59  ;;  %1212 = vmatprep.subr.bf16.mxu0 %v4137_v0  ;;  %4921 = vst [vmem:[#allocation67_spill] sm:$0xff] %v4151_v58  ;;  %v4153_v59 = vld [vmem:[#allocation11 + $0xa0] ss:$16 sps:$4 sm:$0xff]   ;;  %v4173_v0 = vld [vmem:[#allocation11 + $0xec] ss:$16 sps:$4 sm:$0xff]  }
 0x133   : > { %1253 = vmatprep.subr.bf16.mxu1 %v4139_v57  ;;  %4922 = vst [vmem:[#allocation68_spill] sm:$0xff] %v4153_v59  ;;  %v4170_v57 = vld [vmem:[#allocation11 + $0xe4] ss:$16 sps:$4 sm:$0xff]   ;;  %4929 = vst [vmem:[#allocation75_spill] sm:$0xff] %v4173_v0 }
 0x134   : > { %4928 = vst [vmem:[#allocation74_spill] sm:$0xff] %v4170_v57 }
 0x135   : > { %1213 = vmatpush1.bf16.msra.mxu0 %v4141_v62  ;;  %v4164_v62 = vld [vmem:[#allocation11 + $0xc0] ss:$16 sps:$4 sm:$0xff]  }
 0x136   : > { %1254 = vmatpush1.bf16.msra.mxu1 %v4143_v63  ;;  %1214 = vmatprep.subr.bf16.mxu0 %v4149_v3  ;;  %4926 = vst [vmem:[#allocation72_spill] sm:$0xff] %v4164_v62  ;;  %v4168_v63 = vld [vmem:[#allocation11 + $0xc8] ss:$16 sps:$4 sm:$0xff]  }
 0x137   : > { %1255 = vmatprep.subr.bf16.mxu1 %v4151_v58  ;;  %4927 = vst [vmem:[#allocation73_spill] sm:$0xff] %v4168_v63  ;;  %v4176_v58 = vld [vmem:[#allocation11 + $0xe0] ss:$16 sps:$4 sm:$0xff]   ;;  %v524_v3 = vld [vmem:[%s3864_s12 + $0x8] sm:$0xff] }
 0x138   : > { %4930 = vst [vmem:[#allocation76_spill] sm:$0xff] %v4176_v58 }
 0x139   : > { %1215 = vmatpush1.bf16.msra.mxu0 %v4153_v59 }
 0x13a   : > { %1256 = vmatpush1.bf16.msra.mxu1 %v4155_v60  ;;  %1216 = vmatprep.subr.bf16.mxu0 %v4157_v61  ;;  %v4180_v60 = vld [vmem:[#allocation11 + $0xe8] ss:$16 sps:$4 sm:$0xff]  }
 0x13b   : > { %1257 = vmatprep.subr.bf16.mxu1 %v4159_v56  ;;  %4931 = vst [vmem:[#allocation77_spill] sm:$0xff] %v4180_v60  ;;  %v523_v56 = vld [vmem:[%s3864_s12] sm:$0xff] }
 0x13c   : > { %v526_v61 = vunpack.c.h.bf16 %v523_v56 }
 0x13d   : > { %1217 = vmatpush1.bf16.msra.mxu0 %v4164_v62  ;;  %v525_v62 = vunpack.c.l.bf16 %v523_v56 }
 0x13e   : > { %1258 = vmatpush1.bf16.msra.mxu1 %v4168_v63  ;;  %1218 = vmatprep.subr.bf16.mxu0 %v4170_v57 }
 0x13f   : > { %1259 = vmatprep.subr.bf16.mxu1 %v4173_v0  ;;  %v527_v0 = vunpack.c.l.bf16 %v524_v3 }
 0x141   : > { %1219 = vmatpush1.bf16.msra.mxu0 %v4176_v58 }
 0x142   : > { %1260 = vmatpush1.bf16.msra.mxu1 %v4180_v60  ;;  %1330 = vmatprep.subr.bf16.mxu0 %v3883_v1 }
 0x143   : > { %1371 = vmatprep.subr.bf16.mxu1 %v3898_v7  ;;  %v528_v7 = vunpack.c.h.bf16 %v524_v3 }
 0x1d7   : > { %v724_v59 = vpop.f32.mrb[0].mxu0  ;;  %v765_v58 = vpop.f32.mrb[0].mxu1 }
 0x1d8   : > { %v772_v63 = vadd.f32 %v724_v59, %v525_v62  ;;  %v726_v55 = vpop.f32.mrb[1].mxu0  ;;  %v767_v60 = vpop.f32.mrb[1].mxu1  ;;  %v774_v1 = vadd.f32 %v765_v58, %v527_v0  ;;  %v4952_v0 = vld [vmem:[#allocation43_spill] sm:$0xff] }
 0x1d9   : > { %v773_v57 = vadd.f32 %v726_v55, %v526_v61  ;;  %v728_v53 = vpop.f32.mrb[2].mxu0  ;;  %v769_v48 = vpop.f32.mrb[2].mxu1  ;;  %v775_v56 = vadd.f32 %v767_v60, %v528_v7  ;;  %v4955_v7 = vld [vmem:[#allocation46_spill] sm:$0xff] }
 0x1da   : > { %v2572_v54 = vmul.f32 -1.442695, %v772_v63  ;;  %v729_v50 = vpop.f32.mrb[3].mxu0  ;;  %v770_v51 = vpop.f32.mrb[3].mxu1  ;;  %v2574_v46 = vmul.f32 -1.442695, %v774_v1 }
 0x1db   : > { %v2573_v52 = vmul.f32 -1.442695, %v773_v57  ;;  %v4953_v63 = vld [vmem:[#allocation42_spill] sm:$0xff]  ;;  %v4954_v1 = vld [vmem:[#allocation44_spill] sm:$0xff] }
 0x1dc   : > { %3026 = vpow2.f32 %v2572_v54  ;;  %v4189_v54 = vld [vmem:[#allocation3] sm:$0xff] }
 0x1dd   : > { %3028 = vpow2.f32 %v2573_v52 }
 0x1de   : > { %3030 = vpow2.f32 %v2574_v46 }
 0x1df   : > { %3032 = vtanh.f32 %v775_v56  ;;  %v4956_v56 = vld [vmem:[#allocation47_spill] sm:$0xff] }
 0x1e6   : > { %v3027_v49 = vpop.eup %3026 }
 0x1e7   : > { %v3029_v59 = vpop.eup %3028  ;;  %v785_v62 = vadd.f32 1.0, %v3027_v49 }
 0x1e8   : > { %v786_v53 = vadd.f32 1.0, %v3029_v59  ;;  %v3031_v50 = vpop.eup %3030  ;;  %v498_v59 = vlaneseq }
 0x1e9   : > { %3034 = vrcp.f32 %v785_v62  ;;  %v3033_v55 = vpop.eup %3032  ;;  %v787_v57 = vadd.f32 1.0, %v3031_v50  ;;  %v496_v50 = vld [vmem:[#allocation14] sm:$0xf] }
 0x1ea   : > { %3036 = vrcp.f32 %v786_v53  ;;  %v499_v62 = vshrl.u32 %v498_v59, 7 }
 0x1eb   : > { %3038 = vrcp.f32 %v787_v57 }
 0x1ec   : > { %v500_v53 = vsub.s32 0, %v499_v62 }
 0x1f3   : > { %v3035_v52 = vpop.eup %3034 }
 0x1f4   : > { %v3037_v58 = vpop.eup %3036  ;;  %v796_v48 = vmul.f32 %v3035_v52, %v3033_v55  ;;  %v504_v55 = vsub.s32 1, %v499_v62  ;;  %v4278_v52 = vrot.slane %v496_v50, %v500_v53 }
 0x1f5   : > { %v795_v3 = vmul.f32 %v3037_v58, %v4189_v54  ;;  %v3039_v46 = vpop.eup %3038 }
 0x1f7   : > { %v4192_v51 = vadd.f32 %v796_v48, %v795_v3  ;;  %v4280_v48 = vrot.slane %v496_v50, %v504_v55 }
 0x1f9   : > { %3040 = vtanh.f32 %v4192_v51 }
 0x203   : > { %v3041_v49 = vpop.eup %3040 }
 0x204   : > { %v799_v60 = vmul.f32 %v3041_v49, %v3039_v46 }
 0x206   : > { %v800_v61 = vpack.c.bf16 %v799_v60, %v799_v60 }
 0x208   : > { %1237 = vmatmul.mubr.bf16.vlgmr.msra.gmra.mrb[8].mxu0 %v800_v61  ;;  %1278 = vmatmul.mubr.bf16.vlgmr.msra.gmra.mrb[8].mxu1 %v800_v61 }
 0x209   : > { %1331 = vmatpush1.bf16.msra.mxu0 %v3885_v2  ;;  %1372 = vmatpush1.bf16.msra.mxu1 %v3900_v8  ;;  %v1316_v2 = vstv %s1315_s9  ;;  %v4934_v8 = vld [vmem:[#allocation26_spill] sm:$0xff] }
 0x20a   : > { %1332 = vmatprep.subr.bf16.mxu0 %v3890_v4  ;;  %1373 = vmatprep.subr.bf16.mxu1 %v3910_v11  ;;  %vm4229_vm0 = vcmp.eq.s32.totalorder %v1316_v2, 1  ;;  %v4937_v11 = vld [vmem:[#allocation25_spill] sm:$0xff] }
 0x20b   : > { %1362 = vmatprep.mubr.bf16.mxu0 %v4905_v35  ;;  %1403 = vmatprep.mubr.bf16.mxu1 %v4905_v35 }
 0x20d   : > { %1333 = vmatpush1.bf16.msra.mxu0 %v3893_v5  ;;  %1374 = vmatpush1.bf16.msra.mxu1 %v3912_v12  ;;  %v4236_v5 = vsel %vm4229_vm0, %v799_v60, %v3967_v31  ;;  %v4938_v12 = vld [vmem:[#allocation29_spill] sm:$0xff]  ;;  %v4949_v31 = vld [vmem:[#allocation38_spill] sm:$0xff] }
 0x20e   : > { %1334 = vmatprep.subr.bf16.mxu0 %v3896_v6  ;;  %1375 = vmatprep.subr.bf16.mxu1 %v3920_v15  ;;  %v1329_v6 = vpack.c.bf16 %v4236_v5, %v4236_v5  ;;  %v996_v15 = vpop.f32.mrb[4].mxu0 }
 0x211   : > { %1335 = vmatpush1.bf16.msra.mxu0 %v3903_v9  ;;  %1376 = vmatpush1.bf16.msra.mxu1 %v3924_v16  ;;  %v4935_v9 = vld [vmem:[#allocation24_spill] sm:$0xff]  ;;  %v4941_v16 = vld [vmem:[#allocation30_spill] sm:$0xff] }
 0x212   : > { %1336 = vmatprep.subr.bf16.mxu0 %v3907_v10  ;;  %1377 = vmatprep.subr.bf16.mxu1 %v3927_v17  ;;  %v4936_v10 = vld [vmem:[#allocation28_spill] sm:$0xff] }
 0x213   : > { %v4942_v17 = vld [vmem:[#allocation32_spill] sm:$0xff] }
 0x215   : > { %1337 = vmatpush1.bf16.msra.mxu0 %v3916_v13  ;;  %1378 = vmatpush1.bf16.msra.mxu1 %v3936_v20  ;;  %v4939_v13 = vld [vmem:[#allocation27_spill] sm:$0xff] }
 0x216   : > { %1338 = vmatprep.subr.bf16.mxu0 %v3918_v14  ;;  %1379 = vmatprep.subr.bf16.mxu1 %v3939_v21  ;;  %v4940_v14 = vld [vmem:[#allocation31_spill] sm:$0xff] }
 0x217   : > { %v4944_v20 = vld [vmem:[#allocation35_spill] sm:$0xff] }
 0x219   : > { %1339 = vmatpush1.bf16.msra.mxu0 %v3930_v18  ;;  %1380 = vmatpush1.bf16.msra.mxu1 %v3948_v24  ;;  %v998_v18 = vpop.f32.mrb[5].mxu0 }
 0x21a   : > { %1340 = vmatprep.subr.bf16.mxu0 %v3933_v19  ;;  %1381 = vmatprep.subr.bf16.mxu1 %v3951_v25  ;;  %v4943_v19 = vld [vmem:[#allocation33_spill] sm:$0xff]  ;;  %v1000_v21 = vpop.f32.mrb[6].mxu0 }
 0x21d   : > { %1341 = vmatpush1.bf16.msra.mxu0 %v3941_v22  ;;  %1382 = vmatpush1.bf16.msra.mxu1 %v3960_v28  ;;  %v1037_v22 = vpop.f32.mrb[4].mxu1 }
 0x21e   : > { %1342 = vmatprep.subr.bf16.mxu0 %v3944_v23  ;;  %1383 = vmatprep.subr.bf16.mxu1 %v3963_v29  ;;  %v1001_v23 = vpop.f32.mrb[7].mxu0  ;;  %v1039_v24 = vpop.f32.mrb[5].mxu1  ;;  %v4947_v29 = vld [vmem:[#allocation37_spill] sm:$0xff] }
 0x21f   : > { %v1041_v25 = vpop.f32.mrb[6].mxu1 }
 0x220   : > { %v1042_v28 = vpop.f32.mrb[7].mxu1  ;;  %v508_v25 = vsub.s32 2, %v499_v62 }
 0x221   : > { %1343 = vmatpush1.bf16.msra.mxu0 %v3953_v26  ;;  %1384 = vmatpush1.bf16.msra.mxu1 %v3970_v32  ;;  %v4945_v26 = vld [vmem:[#allocation34_spill] sm:$0xff]  ;;  %v4950_v32 = vld [vmem:[#allocation40_spill] sm:$0xff] }
 0x222   : > { %1344 = vmatprep.subr.bf16.mxu0 %v3956_v27  ;;  %1385 = vmatprep.subr.bf16.mxu1 %v3977_v34  ;;  %v4946_v27 = vld [vmem:[#allocation36_spill] sm:$0xff] }
 0x225   : > { %1345 = vmatpush1.bf16.msra.mxu0 %v3965_v30  ;;  %1386 = vmatpush1.bf16.msra.mxu1 %v3981_v36  ;;  %v4948_v30 = vld [vmem:[#allocation39_spill] sm:$0xff] }
 0x226   : > { %1442 = vmatprep.subr.bf16.mxu0 %v3974_v33  ;;  %1483 = vmatprep.subr.bf16.mxu1 %v3991_v39  ;;  %v4951_v33 = vld [vmem:[#allocation41_spill] sm:$0xff] }
 0x228   : > { %1363 = vmatmul.mubr.bf16.vlgmr.msra.gmra.mrb[12].mxu0 %v1329_v6  ;;  %1404 = vmatmul.mubr.bf16.vlgmr.msra.gmra.mrb[12].mxu1 %v1329_v6 }
 0x229   : > { %1443 = vmatpush1.bf16.msra.mxu0 %v3984_v37  ;;  %1484 = vmatpush1.bf16.msra.mxu1 %v3995_v41 }
 0x22a   : > { %1444 = vmatprep.subr.bf16.mxu0 %v3988_v38  ;;  %1485 = vmatprep.subr.bf16.mxu1 %v4000_v43 }
 0x22b   : > { %1474 = vmatprep.mubr.bf16.mxu0 %v4905_v35  ;;  %1515 = vmatprep.mubr.bf16.mxu1 %v4905_v35 }
 0x22d   : > { %1445 = vmatpush1.bf16.msra.mxu0 %v3993_v40  ;;  %1486 = vmatpush1.bf16.msra.mxu1 %v4008_v45 }
 0x22e   : > { %1446 = vmatprep.subr.bf16.mxu0 %v3997_v42  ;;  %1487 = vmatprep.subr.bf16.mxu1 %v4013_v47 }
 0x231   : > { %1447 = vmatpush1.bf16.msra.mxu0 %v4006_v44  ;;  %1488 = vmatpush1.bf16.msra.mxu1 %v4934_v8 }
 0x232   : > { %1448 = vmatprep.subr.bf16.mxu0 %v4935_v9  ;;  %1489 = vmatprep.subr.bf16.mxu1 %v4936_v10 }
 0x235   : > { %1449 = vmatpush1.bf16.msra.mxu0 %v4937_v11  ;;  %1490 = vmatpush1.bf16.msra.mxu1 %v4938_v12 }
 0x236   : > { %1450 = vmatprep.subr.bf16.mxu0 %v4939_v13  ;;  %1491 = vmatprep.subr.bf16.mxu1 %v4940_v14 }
 0x239   : > { %1451 = vmatpush1.bf16.msra.mxu0 %v4941_v16  ;;  %1492 = vmatpush1.bf16.msra.mxu1 %v4942_v17 }
 0x23a   : > { %1452 = vmatprep.subr.bf16.mxu0 %v4943_v19  ;;  %1493 = vmatprep.subr.bf16.mxu1 %v4944_v20 }
 0x23d   : > { %1453 = vmatpush1.bf16.msra.mxu0 %v4945_v26  ;;  %1494 = vmatpush1.bf16.msra.mxu1 %v4946_v27 }
 0x23e   : > { %1454 = vmatprep.subr.bf16.mxu0 %v4947_v29  ;;  %1495 = vmatprep.subr.bf16.mxu1 %v4948_v30 }
 0x241   : > { %1455 = vmatpush1.bf16.msra.mxu0 %v4949_v31  ;;  %1496 = vmatpush1.bf16.msra.mxu1 %v4950_v32 }
 0x242   : > { %1456 = vmatprep.subr.bf16.mxu0 %v4951_v33  ;;  %1497 = vmatprep.subr.bf16.mxu1 %v4952_v0 }
 0x245   : > { %1457 = vmatpush1.bf16.msra.mxu0 %v4953_v63  ;;  %1498 = vmatpush1.bf16.msra.mxu1 %v4954_v1  ;;  %v512_v1 = vsub.s32 3, %v499_v62  ;;  %v2642_v62 = vld [vmem:[%s3864_s12 + $0x10] sm:$0xff] }
 0x246   : > { %1524 = vmatprep.subr.bf16.mxu0 %v4955_v7  ;;  %1565 = vmatprep.subr.bf16.mxu1 %v4956_v56 }
 0x2db   : > { %v1238_v57 = vpop.f32.mrb[8].mxu0  ;;  %v1279_v58 = vpop.f32.mrb[8].mxu1 }
 0x2dc   : > { %v1239_v3 = vadd.f32 %v1238_v57, %v996_v15  ;;  %v1280_v46 = vadd.f32 %v1279_v58, %v1037_v22  ;;  %v1240_v49 = vpop.f32.mrb[9].mxu0  ;;  %v1281_v60 = vpop.f32.mrb[9].mxu1  ;;  %v4284_v15 = vrot.slane %v496_v50, %v508_v25  ;;  %v4286_v22 = vrot.slane %v496_v50, %v512_v1  ;;  %v4291_v1 = vld [vmem:[#allocation5] sm:$0xff] }
 0x2dd   : > { %v1241_v61 = vadd.f32 %v1240_v49, %v998_v18  ;;  %v1282_v2 = vadd.f32 %v1281_v60, %v1039_v24  ;;  %v1242_v6 = vpop.f32.mrb[10].mxu0  ;;  %v1283_v21 = vpop.f32.mrb[10].mxu1  ;;  %v1326_v50 = vunpack.c.h.bf16 %v2642_v62 }
 0x2de   : > { %v1286_v23 = vadd.f32 %v1239_v3, %v4278_v52  ;;  %v1243_v28 = vpop.f32.mrb[11].mxu0  ;;  %v1284_v59 = vpop.f32.mrb[11].mxu1  ;;  %4957 = vst [vmem:[#allocation26_spill] sm:$0xff] %v4286_v22  ;;  %v1288_v18 = vadd.f32 %v1280_v46, %v4284_v15 }
 0x2df   : > { %v1287_v53 = vadd.f32 %v1241_v61, %v4280_v48  ;;  %v1289_v24 = vadd.f32 %v1282_v2, %v4286_v22  ;;  %v1325_v61 = vunpack.c.l.bf16 %v2642_v62 }
 0x2e0   : > { %v2639_v56 = vmul.f32 -1.442695, %v1286_v23  ;;  %v2641_v55 = vmul.f32 -1.442695, %v1288_v18 }
 0x2e1   : > { %v2640_v7 = vmul.f32 -1.442695, %v1287_v53 }
 0x2e2   : > { %3042 = vpow2.f32 %v2639_v56 }
 0x2e3   : > { %3044 = vpow2.f32 %v2640_v7 }
 0x2e4   : > { %3046 = vtanh.f32 %v1289_v24 }
 0x2e5   : > { %3048 = vpow2.f32 %v2641_v55 }
 0x2ec   : > { %v3043_v57 = vpop.eup %3042 }
 0x2ed   : > { %v1299_v58 = vadd.f32 1.0, %v3043_v57  ;;  %v3045_v3 = vpop.eup %3044 }
 0x2ee   : > { %v1300_v49 = vadd.f32 1.0, %v3045_v3  ;;  %v3047_v56 = vpop.eup %3046  ;;  %v2643_v3 = vld [vmem:[%s3864_s12 + $0x18] sm:$0xff] }
 0x2ef   : > { %3050 = vrcp.f32 %v1299_v58  ;;  %v3049_v60 = vpop.eup %3048 }
 0x2f0   : > { %3052 = vrcp.f32 %v1300_v49  ;;  %v1301_v6 = vadd.f32 1.0, %v3049_v60  ;;  %v1328_v60 = vunpack.c.h.bf16 %v2643_v3 }
 0x2f2   : > { %3054 = vrcp.f32 %v1301_v6 }
 0x2f9   : > { %v3051_v7 = vpop.eup %3050 }
 0x2fa   : > { %v1310_v46 = vmul.f32 %v3051_v7, %v3047_v56  ;;  %v3053_v2 = vpop.eup %3052  ;;  %v1327_v56 = vunpack.c.l.bf16 %v2643_v3  ;;  %v4964_v3 = vld [vmem:[#allocation52_spill] sm:$0xff] }
 0x2fb   : > { %v1364_v21 = vpop.f32.mrb[12].mxu0  ;;  %v1405_v23 = vpop.f32.mrb[12].mxu1  ;;  %v1309_v25 = vmul.f32 %v3053_v2, %v4291_v1 }
 0x2fc   : > { %v1412_v28 = vadd.f32 %v1364_v21, %v1325_v61  ;;  %v1366_v59 = vpop.f32.mrb[13].mxu0  ;;  %v1407_v53 = vpop.f32.mrb[13].mxu1  ;;  %v1414_v61 = vadd.f32 %v1405_v23, %v1327_v56  ;;  %v4966_v56 = vld [vmem:[#allocation54_spill] sm:$0xff] }
 0x2fd   : > { %v1413_v18 = vadd.f32 %v1366_v59, %v1326_v50  ;;  %v1368_v24 = vpop.f32.mrb[14].mxu0  ;;  %v1409_v55 = vpop.f32.mrb[14].mxu1  ;;  %v4294_v57 = vadd.f32 %v1310_v46, %v1309_v25  ;;  %v1415_v7 = vadd.f32 %v1407_v53, %v1328_v60  ;;  %v4959_v53 = vld [vmem:[#allocation48_spill] sm:$0xff]  ;;  %v4967_v60 = vld [vmem:[#allocation55_spill] sm:$0xff] }
 0x2fe   : > { %v2644_v58 = vmul.f32 -1.442695, %v1412_v28  ;;  %v1369_v49 = vpop.f32.mrb[15].mxu0  ;;  %v1410_v22 = vpop.f32.mrb[15].mxu1  ;;  %v2646_v2 = vmul.f32 -1.442695, %v1414_v61 }
 0x2ff   : > { %v2645_v62 = vmul.f32 -1.442695, %v1413_v18  ;;  %3056 = vtanh.f32 %v4294_v57  ;;  %v3055_v50 = vpop.eup %3054  ;;  %v4958_v22 = vld [vmem:[#allocation45_spill] sm:$0xff]  ;;  %v4962_v55 = vld [vmem:[#allocation50_spill] sm:$0xff] }
 0x300   : > { %3058 = vpow2.f32 %v2644_v58  ;;  %v4960_v24 = vld [vmem:[#allocation49_spill] sm:$0xff]  ;;  %v4963_v58 = vld [vmem:[#allocation51_spill] sm:$0xff] }
 0x301   : > { %3060 = vpow2.f32 %v2645_v62  ;;  %v4965_v49 = vld [vmem:[#allocation53_spill] sm:$0xff] }
 0x302   : > { %3062 = vtanh.f32 %v1415_v7 }
 0x303   : > { %3064 = vpow2.f32 %v2646_v2  ;;  %v4968_v2 = vld [vmem:[#allocation56_spill] sm:$0xff] }
 0x309   : > { %v3057_v21 = vpop.eup %3056 }
 0x30a   : > { %v3059_v46 = vpop.eup %3058  ;;  %v1313_v25 = vmul.f32 %v3057_v21, %v3055_v50  ;;  %v4969_v21 = vld [vmem:[#allocation57_spill] sm:$0xff] }
 0x30b   : > { %v1425_v28 = vadd.f32 1.0, %v3059_v46  ;;  %v3061_v59 = vpop.eup %3060  ;;  %v4324_v46 = vstv %s1636_s16 }
 0x30c   : > { %v4301_v6 = vsel %vm4229_vm0, %v1313_v25, %v4958_v22  ;;  %v1426_v18 = vadd.f32 1.0, %v3061_v59  ;;  %v3063_v62 = vpop.eup %3062  ;;  %v4970_v22 = vld [vmem:[#allocation58_spill] sm:$0xff]  ;;  %vm1638_vm1 = vcmp.eq.s32.totalorder %v4324_v46, 1 }
 0x30d   : > { %3066 = vrcp.f32 %v1425_v28  ;;  %v1441_v23 = vpack.c.bf16 %v4301_v6, %v4301_v6  ;;  %v3065_v61 = vpop.eup %3064  ;;  %v1319_v28 = vsel %vm4229_vm0, %v4192_v51, %v4189_v54  ;;  %v4976_v51 = vld [vmem:[#allocation64_spill] sm:$0xff] }
 0x30e   : > { %3068 = vrcp.f32 %v1426_v18  ;;  %v1427_v59 = vadd.f32 1.0, %v3065_v61  ;;  %v4971_v18 = vld [vmem:[#allocation59_spill] sm:$0xff]  ;;  %v4977_v61 = vld [vmem:[#allocation65_spill] sm:$0xff] }
 0x30f   : > { %1475 = vmatmul.mubr.bf16.vlgmr.msra.gmra.mrb[16].mxu0 %v1441_v23  ;;  %1516 = vmatmul.mubr.bf16.vlgmr.msra.gmra.mrb[16].mxu1 %v1441_v23 }
 0x310   : > { %1525 = vmatpush1.bf16.msra.mxu0 %v4959_v53  ;;  %1566 = vmatpush1.bf16.msra.mxu1 %v4960_v24  ;;  %3070 = vrcp.f32 %v1427_v59  ;;  %v4981_v59 = vld [vmem:[#allocation69_spill] sm:$0xff] }
 0x311   : > { %1526 = vmatprep.subr.bf16.mxu0 %v4962_v55  ;;  %1567 = vmatprep.subr.bf16.mxu1 %v4963_v58 }
 0x312   : > { %1556 = vmatprep.mubr.bf16.mxu0 %v4905_v35  ;;  %1597 = vmatprep.mubr.bf16.mxu1 %v4905_v35 }
 0x314   : > { %1527 = vmatpush1.bf16.msra.mxu0 %v4964_v3  ;;  %1568 = vmatpush1.bf16.msra.mxu1 %v4965_v49 }
 0x315   : > { %1528 = vmatprep.subr.bf16.mxu0 %v4966_v56  ;;  %1569 = vmatprep.subr.bf16.mxu1 %v4967_v60  ;;  %v4975_v60 = vld [vmem:[#allocation63_spill] sm:$0xff] }
 0x317   : > { %v3067_v7 = vpop.eup %3066 }
 0x318   : > { %v1436_v50 = vmul.f32 %v3067_v7, %v3063_v62  ;;  %1529 = vmatpush1.bf16.msra.mxu0 %v4968_v2  ;;  %1570 = vmatpush1.bf16.msra.mxu1 %v4969_v21  ;;  %v3069_v25 = vpop.eup %3068  ;;  %v4972_v7 = vld [vmem:[#allocation60_spill] sm:$0xff]  ;;  %v4973_v21 = vld [vmem:[#allocation61_spill] sm:$0xff]  ;;  %v4974_v2 = vld [vmem:[#allocation62_spill] sm:$0xff] }
 0x319   : > { %1530 = vmatprep.subr.bf16.mxu0 %v4970_v22  ;;  %1571 = vmatprep.subr.bf16.mxu1 %v4971_v18  ;;  %v1435_v23 = vmul.f32 %v3069_v25, %v1319_v28  ;;  %v4978_v25 = vld [vmem:[#allocation66_spill] sm:$0xff] }
 0x31b   : > { %v1437_v62 = vadd.f32 %v1436_v50, %v1435_v23  ;;  %v4979_v50 = vld [vmem:[#allocation67_spill] sm:$0xff]  ;;  %v4980_v23 = vld [vmem:[#allocation68_spill] sm:$0xff] }
 0x31c   : > { %1531 = vmatpush1.bf16.msra.mxu0 %v4972_v7  ;;  %1572 = vmatpush1.bf16.msra.mxu1 %v4973_v21  ;;  %v3071_v21 = vpop.eup %3070 }
 0x31d   : > { %1532 = vmatprep.subr.bf16.mxu0 %v4974_v2  ;;  %1573 = vmatprep.subr.bf16.mxu1 %v4975_v60  ;;  %3072 = vtanh.f32 %v1437_v62  ;;  %v4339_v54 = vsel %vm1638_vm1, %v1437_v62, %v1319_v28  ;;  %v4982_v2 = vld [vmem:[#allocation70_spill] sm:$0xff]  ;;  %v4983_v60 = vld [vmem:[#allocation71_spill] sm:$0xff]  ;;  %v4984_v28 = vld [vmem:[#allocation72_spill] sm:$0xff] }
 0x31e   : > { %v4985_v62 = vld [vmem:[#allocation73_spill] sm:$0xff] }
 0x320   : > { %1533 = vmatpush1.bf16.msra.mxu0 %v4976_v51  ;;  %1574 = vmatpush1.bf16.msra.mxu1 %v4977_v61  ;;  %v4986_v51 = vld [vmem:[#allocation74_spill] sm:$0xff]  ;;  %v4987_v61 = vld [vmem:[#allocation75_spill] sm:$0xff] }
 0x321   : > { %1534 = vmatprep.subr.bf16.mxu0 %v4978_v25  ;;  %1575 = vmatprep.subr.bf16.mxu1 %v4979_v50  ;;  %v4988_v50 = vld [vmem:[#allocation76_spill] sm:$0xff] }
 0x324   : > { %1535 = vmatpush1.bf16.msra.mxu0 %v4980_v23  ;;  %1576 = vmatpush1.bf16.msra.mxu1 %v4981_v59  ;;  %v4989_v23 = vld [vmem:[#allocation77_spill] sm:$0xff] }
 0x325   : > { %1536 = vmatprep.subr.bf16.mxu0 %v4982_v2  ;;  %1577 = vmatprep.subr.bf16.mxu1 %v4983_v60  ;;  %v4359_v60 = vld [vmem:[#allocation9 + $0x4] ss:$16 sps:$4 sm:$0xff]  }
 0x327   : > { %v3073_v7 = vpop.eup %3072 }
 0x328   : > { %1537 = vmatpush1.bf16.msra.mxu0 %v4984_v28  ;;  %1578 = vmatpush1.bf16.msra.mxu1 %v4985_v62  ;;  %v4353_v25 = vmul.f32 %v3073_v7, %v3071_v21  ;;  %v4362_v28 = vld [vmem:[#allocation9 + $0xc] ss:$16 sps:$4 sm:$0xff]   ;;  %v4368_v21 = vld [vmem:[#allocation9 + $0x8] ss:$16 sps:$4 sm:$0xff]   ;;  %v4371_v7 = vld [vmem:[#allocation9 + $0x24] ss:$16 sps:$4 sm:$0xff]  }
 0x329   : > { %1538 = vmatprep.subr.bf16.mxu0 %v4986_v51  ;;  %1579 = vmatprep.subr.bf16.mxu1 %v4987_v61  ;;  %4990 = vst [vmem:[#allocation24_spill] sm:$0xff] %v4362_v28  ;;  %v4365_v61 = vld [vmem:[#allocation9] ss:$16 sps:$4 sm:$0xff]   ;;  %4992 = vst [vmem:[#allocation25_spill] sm:$0xff] %v4368_v21 }
 0x32a   : > { %v1440_v2 = vpack.c.bf16 %v4353_v25, %v4353_v25  ;;  %4991 = vst [vmem:[#allocation28_spill] sm:$0xff] %v4365_v61  ;;  %4993 = vst [vmem:[#allocation29_spill] sm:$0xff] %v4371_v7 }
 0x32c   : > { %1539 = vmatpush1.bf16.msra.mxu0 %v4988_v50  ;;  %1580 = vmatpush1.bf16.msra.mxu1 %v4989_v23  ;;  %v4374_v23 = vld [vmem:[#allocation9 + $0x2c] ss:$16 sps:$4 sm:$0xff]  }
 0x32d   : > { %1651 = vmatprep.subr.bf16.mxu0 %v4359_v60  ;;  %1692 = vmatprep.subr.bf16.mxu1 %v4362_v28  ;;  %4994 = vst [vmem:[#allocation27_spill] sm:$0xff] %v4374_v23  ;;  %v4394_v28 = vld [vmem:[#allocation9 + $0x48] ss:$16 sps:$4 sm:$0xff]  }
 0x32e   : > { %5000 = vst [vmem:[#allocation34_spill] sm:$0xff] %v4394_v28 }
 0x32f   : > { %1557 = vmatmul.mubr.bf16.vlgmr.msra.gmra.mrb[20].mxu0 %v1440_v2  ;;  %1598 = vmatmul.mubr.bf16.vlgmr.msra.gmra.mrb[20].mxu1 %v1440_v2  ;;  %v4379_v2 = vld [vmem:[#allocation9 + $0x20] ss:$16 sps:$4 sm:$0xff]  }
 0x330   : > { %1652 = vmatpush1.bf16.msra.mxu0 %v4365_v61  ;;  %1693 = vmatpush1.bf16.msra.mxu1 %v4368_v21  ;;  %4995 = vst [vmem:[#allocation31_spill] sm:$0xff] %v4379_v2  ;;  %v4382_v61 = vld [vmem:[#allocation9 + $0x28] ss:$16 sps:$4 sm:$0xff]   ;;  %v4385_v21 = vld [vmem:[#allocation9 + $0x44] ss:$16 sps:$4 sm:$0xff]  }
 0x331   : > { %1653 = vmatprep.subr.bf16.mxu0 %v4371_v7  ;;  %1694 = vmatprep.subr.bf16.mxu1 %v4374_v23  ;;  %4996 = vst [vmem:[#allocation30_spill] sm:$0xff] %v4382_v61  ;;  %4997 = vst [vmem:[#allocation32_spill] sm:$0xff] %v4385_v21  ;;  %v4388_v7 = vld [vmem:[#allocation9 + $0x4c] ss:$16 sps:$4 sm:$0xff]   ;;  %v4391_v23 = vld [vmem:[#allocation9 + $0x40] ss:$16 sps:$4 sm:$0xff]  }
 0x332   : > { %1683 = vmatprep.mubr.bf16.mxu0 %v4905_v35  ;;  %1724 = vmatprep.mubr.bf16.mxu1 %v4905_v35  ;;  %4998 = vst [vmem:[#allocation33_spill] sm:$0xff] %v4388_v7  ;;  %4999 = vst [vmem:[#allocation35_spill] sm:$0xff] %v4391_v23 }
 0x334   : > { %1654 = vmatpush1.bf16.msra.mxu0 %v4379_v2  ;;  %1695 = vmatpush1.bf16.msra.mxu1 %v4382_v61  ;;  %v4397_v2 = vld [vmem:[#allocation9 + $0x64] ss:$16 sps:$4 sm:$0xff]   ;;  %v4400_v61 = vld [vmem:[#allocation9 + $0x6c] ss:$16 sps:$4 sm:$0xff]  }
 0x335   : > { %1655 = vmatprep.subr.bf16.mxu0 %v4385_v21  ;;  %1696 = vmatprep.subr.bf16.mxu1 %v4388_v7  ;;  %5001 = vst [vmem:[#allocation36_spill] sm:$0xff] %v4397_v2  ;;  %5002 = vst [vmem:[#allocation37_spill] sm:$0xff] %v4400_v61  ;;  %v4403_v21 = vld [vmem:[#allocation9 + $0x60] ss:$16 sps:$4 sm:$0xff]   ;;  %v4406_v7 = vld [vmem:[#allocation9 + $0x68] ss:$16 sps:$4 sm:$0xff]  }
 0x336   : > { %5003 = vst [vmem:[#allocation39_spill] sm:$0xff] %v4403_v21  ;;  %5004 = vst [vmem:[#allocation38_spill] sm:$0xff] %v4406_v7 }
 0x338   : > { %1656 = vmatpush1.bf16.msra.mxu0 %v4391_v23  ;;  %1697 = vmatpush1.bf16.msra.mxu1 %v4394_v28  ;;  %v4409_v23 = vld [vmem:[#allocation9 + $0x84] ss:$16 sps:$4 sm:$0xff]   ;;  %v4412_v28 = vld [vmem:[#allocation9 + $0x8c] ss:$16 sps:$4 sm:$0xff]  }
 0x339   : > { %1657 = vmatprep.subr.bf16.mxu0 %v4397_v2  ;;  %1698 = vmatprep.subr.bf16.mxu1 %v4400_v61  ;;  %5005 = vst [vmem:[#allocation40_spill] sm:$0xff] %v4409_v23  ;;  %5006 = vst [vmem:[#allocation41_spill] sm:$0xff] %v4412_v28  ;;  %v4415_v2 = vld [vmem:[#allocation9 + $0x80] ss:$16 sps:$4 sm:$0xff]   ;;  %v4418_v61 = vld [vmem:[#allocation9 + $0x88] ss:$16 sps:$4 sm:$0xff]  }
 0x33a   : > { %5007 = vst [vmem:[#allocation43_spill] sm:$0xff] %v4415_v2  ;;  %5008 = vst [vmem:[#allocation42_spill] sm:$0xff] %v4418_v61 }
 0x33c   : > { %1658 = vmatpush1.bf16.msra.mxu0 %v4403_v21  ;;  %1699 = vmatpush1.bf16.msra.mxu1 %v4406_v7  ;;  %v4421_v21 = vld [vmem:[#allocation9 + $0xa4] ss:$16 sps:$4 sm:$0xff]   ;;  %v4424_v7 = vld [vmem:[#allocation9 + $0xac] ss:$16 sps:$4 sm:$0xff]  }
 0x33d   : > { %1659 = vmatprep.subr.bf16.mxu0 %v4409_v23  ;;  %1700 = vmatprep.subr.bf16.mxu1 %v4412_v28  ;;  %5009 = vst [vmem:[#allocation45_spill] sm:$0xff] %v4421_v21  ;;  %5010 = vst [vmem:[#allocation48_spill] sm:$0xff] %v4424_v7  ;;  %v4427_v23 = vld [vmem:[#allocation9 + $0xa0] ss:$16 sps:$4 sm:$0xff]   ;;  %v4430_v28 = vld [vmem:[#allocation9 + $0xa8] ss:$16 sps:$4 sm:$0xff]  }
 0x33e   : > { %5011 = vst [vmem:[#allocation49_spill] sm:$0xff] %v4427_v23 }
 0x340   : > { %1660 = vmatpush1.bf16.msra.mxu0 %v4415_v2  ;;  %1701 = vmatpush1.bf16.msra.mxu1 %v4418_v61  ;;  %v4433_v2 = vld [vmem:[#allocation9 + $0xc4] ss:$16 sps:$4 sm:$0xff]   ;;  %v4436_v61 = vld [vmem:[#allocation9 + $0xcc] ss:$16 sps:$4 sm:$0xff]  }
 0x341   : > { %1661 = vmatprep.subr.bf16.mxu0 %v4421_v21  ;;  %1702 = vmatprep.subr.bf16.mxu1 %v4424_v7  ;;  %5012 = vst [vmem:[#allocation50_spill] sm:$0xff] %v4433_v2  ;;  %5013 = vst [vmem:[#allocation51_spill] sm:$0xff] %v4436_v61  ;;  %v4439_v21 = vld [vmem:[#allocation9 + $0xc0] ss:$16 sps:$4 sm:$0xff]   ;;  %v4442_v7 = vld [vmem:[#allocation9 + $0xc8] ss:$16 sps:$4 sm:$0xff]  }
 0x342   : > { %5014 = vst [vmem:[#allocation52_spill] sm:$0xff] %v4439_v21  ;;  %5015 = vst [vmem:[#allocation53_spill] sm:$0xff] %v4442_v7 }
 0x344   : > { %1662 = vmatpush1.bf16.msra.mxu0 %v4427_v23  ;;  %1703 = vmatpush1.bf16.msra.mxu1 %v4430_v28  ;;  %v4445_v23 = vld [vmem:[#allocation9 + $0xe4] ss:$16 sps:$4 sm:$0xff]  }
 0x345   : > { %1663 = vmatprep.subr.bf16.mxu0 %v4433_v2  ;;  %1704 = vmatprep.subr.bf16.mxu1 %v4436_v61  ;;  %v4453_v2 = vsel %vm1638_vm1, %v4353_v25, %v4236_v5  ;;  %v4455_v61 = vld [vmem:[#allocation9 + $0xe0] ss:$16 sps:$4 sm:$0xff]  }
 0x348   : > { %1664 = vmatpush1.bf16.msra.mxu0 %v4439_v21  ;;  %1705 = vmatpush1.bf16.msra.mxu1 %v4442_v7  ;;  %v1650_v7 = vpack.c.bf16 %v4453_v2, %v4453_v2  ;;  %v4461_v21 = vld [vmem:[#allocation12 + $0x4] ss:$16 sps:$4 sm:$0xff]  }
 0x349   : > { %1665 = vmatprep.subr.bf16.mxu0 %v4445_v23  ;;  %1706 = vmatprep.subr.bf16.mxu1 %v3977_v34  ;;  %v5016_v34 = vld [vmem:[#allocation44_spill] sm:$0xff] }
 0x34c   : > { %1666 = vmatpush1.bf16.msra.mxu0 %v4455_v61  ;;  %1707 = vmatpush1.bf16.msra.mxu1 %v3981_v36  ;;  %v5017_v36 = vld [vmem:[#allocation46_spill] sm:$0xff] }
 0x34d   : > { %1763 = vmatprep.subr.bf16.mxu0 %v4461_v21  ;;  %1804 = vmatprep.subr.bf16.mxu1 %v3991_v39 }
 0x34f   : > { %1684 = vmatmul.mubr.bf16.vlgmr.msra.gmra.mrb[24].mxu0 %v1650_v7  ;;  %1725 = vmatmul.mubr.bf16.vlgmr.msra.gmra.mrb[24].mxu1 %v1650_v7 }
 0x350   : > { %1764 = vmatpush1.bf16.msra.mxu0 %v3984_v37  ;;  %1805 = vmatpush1.bf16.msra.mxu1 %v3995_v41  ;;  %v5018_v37 = vld [vmem:[#allocation47_spill] sm:$0xff] }
 0x351   : > { %1765 = vmatprep.subr.bf16.mxu0 %v3988_v38  ;;  %1806 = vmatprep.subr.bf16.mxu1 %v4000_v43 }
 0x352   : > { %1795 = vmatprep.mubr.bf16.mxu0 %v4905_v35  ;;  %1836 = vmatprep.mubr.bf16.mxu1 %v4905_v35 }
 0x354   : > { %1766 = vmatpush1.bf16.msra.mxu0 %v3993_v40  ;;  %1807 = vmatpush1.bf16.msra.mxu1 %v4008_v45 }
 0x355   : > { %1767 = vmatprep.subr.bf16.mxu0 %v3997_v42  ;;  %1808 = vmatprep.subr.bf16.mxu1 %v4013_v47 }
 0x358   : > { %1768 = vmatpush1.bf16.msra.mxu0 %v4006_v44  ;;  %1809 = vmatpush1.bf16.msra.mxu1 %v4934_v8 }
 0x359   : > { %1769 = vmatprep.subr.bf16.mxu0 %v4935_v9  ;;  %1810 = vmatprep.subr.bf16.mxu1 %v4936_v10 }
 0x35c   : > { %1770 = vmatpush1.bf16.msra.mxu0 %v4937_v11  ;;  %1811 = vmatpush1.bf16.msra.mxu1 %v4938_v12 }
 0x35d   : > { %1771 = vmatprep.subr.bf16.mxu0 %v4939_v13  ;;  %1812 = vmatprep.subr.bf16.mxu1 %v4940_v14 }
 0x360   : > { %1772 = vmatpush1.bf16.msra.mxu0 %v4941_v16  ;;  %1813 = vmatpush1.bf16.msra.mxu1 %v4942_v17 }
 0x361   : > { %1773 = vmatprep.subr.bf16.mxu0 %v4943_v19  ;;  %1814 = vmatprep.subr.bf16.mxu1 %v4944_v20 }
 0x364   : > { %1774 = vmatpush1.bf16.msra.mxu0 %v4945_v26  ;;  %1815 = vmatpush1.bf16.msra.mxu1 %v4946_v27 }
 0x365   : > { %1775 = vmatprep.subr.bf16.mxu0 %v4947_v29  ;;  %1816 = vmatprep.subr.bf16.mxu1 %v4948_v30 }
 0x368   : > { %1776 = vmatpush1.bf16.msra.mxu0 %v4949_v31  ;;  %1817 = vmatpush1.bf16.msra.mxu1 %v4950_v32  ;;  %v5019_v31 = vld [vmem:[#allocation26_spill] sm:$0xff] }
 0x369   : > { %1777 = vmatprep.subr.bf16.mxu0 %v4951_v33  ;;  %1818 = vmatprep.subr.bf16.mxu1 %v4952_v0 }
 0x36c   : > { %1778 = vmatpush1.bf16.msra.mxu0 %v4953_v63  ;;  %1819 = vmatpush1.bf16.msra.mxu1 %v5016_v34  ;;  %v2650_v34 = vld [vmem:[%s3864_s12 + $0x20] sm:$0xff] }
 0x36d   : > { %1845 = vmatprep.subr.bf16.mxu0 %v5017_v36  ;;  %1886 = vmatprep.subr.bf16.mxu1 %v5018_v37 }
 0x3e2   : > { %v1476_v38 = vpop.f32.mrb[16].mxu0  ;;  %v1517_v39 = vpop.f32.mrb[16].mxu1 }
 0x3e3   : > { %v1478_v40 = vpop.f32.mrb[17].mxu0  ;;  %v1519_v41 = vpop.f32.mrb[17].mxu1 }
 0x3e4   : > { %v1480_v42 = vpop.f32.mrb[18].mxu0  ;;  %v1521_v43 = vpop.f32.mrb[18].mxu1 }
 0x3e5   : > { %v1481_v44 = vpop.f32.mrb[19].mxu0  ;;  %v1522_v45 = vpop.f32.mrb[19].mxu1 }
 0x3e6   : > { %v1321_v44 = vsel %vm4229_vm0, %v4294_v57, %v4291_v1 }
 0x402   : > { %v1558_v47 = vpop.f32.mrb[20].mxu0  ;;  %v1599_v5 = vpop.f32.mrb[20].mxu1 }
 0x403   : > { %v1559_v8 = vadd.f32 %v1558_v47, %v1476_v38  ;;  %v1600_v9 = vadd.f32 %v1599_v5, %v1517_v39  ;;  %v1560_v10 = vpop.f32.mrb[21].mxu0  ;;  %v1601_v11 = vpop.f32.mrb[21].mxu1  ;;  %v1646_v38 = vunpack.c.l.bf16 %v2650_v34 }
 0x404   : > { %v1561_v12 = vadd.f32 %v1560_v10, %v1478_v40  ;;  %v1602_v13 = vadd.f32 %v1601_v11, %v1519_v41  ;;  %v1562_v14 = vpop.f32.mrb[22].mxu0  ;;  %v1603_v16 = vpop.f32.mrb[22].mxu1  ;;  %v1647_v40 = vunpack.c.h.bf16 %v2650_v34 }
 0x405   : > { %v1606_v17 = vadd.f32 %v1559_v8, %v4278_v52  ;;  %v1563_v19 = vpop.f32.mrb[23].mxu0  ;;  %v1604_v20 = vpop.f32.mrb[23].mxu1  ;;  %v1608_v30 = vadd.f32 %v1600_v9, %v4284_v15 }
 0x406   : > { %v1607_v26 = vadd.f32 %v1561_v12, %v4280_v48  ;;  %v1609_v32 = vadd.f32 %v1602_v13, %v5019_v31 }
 0x407   : > { %v2647_v27 = vmul.f32 -1.442695, %v1606_v17  ;;  %v2649_v33 = vmul.f32 -1.442695, %v1608_v30  ;;  %v2651_v17 = vld [vmem:[%s3864_s12 + $0x28] sm:$0xff] }
 0x408   : > { %v2648_v29 = vmul.f32 -1.442695, %v1607_v26  ;;  %v1648_v1 = vunpack.c.l.bf16 %v2651_v17  ;;  %v1649_v57 = vunpack.c.h.bf16 %v2651_v17  ;;  %v5038_v17 = vld [vmem:[#allocation24_spill] sm:$0xff] }
 0x409   : > { %3074 = vpow2.f32 %v2647_v27 }
 0x40a   : > { %3076 = vpow2.f32 %v2648_v29 }
 0x40b   : > { %3078 = vtanh.f32 %v1609_v32 }
 0x40c   : > { %3080 = vpow2.f32 %v2649_v33 }
 0x413   : > { %v3075_v0 = vpop.eup %3074 }
 0x414   : > { %v1619_v63 = vadd.f32 1.0, %v3075_v0  ;;  %v3077_v25 = vpop.eup %3076 }
 0x415   : > { %v1620_v7 = vadd.f32 1.0, %v3077_v25  ;;  %v3079_v36 = vpop.eup %3078 }
 0x416   : > { %3082 = vrcp.f32 %v1619_v63  ;;  %v3081_v37 = vpop.eup %3080 }
 0x417   : > { %3084 = vrcp.f32 %v1620_v7  ;;  %v1621_v43 = vadd.f32 1.0, %v3081_v37 }
 0x419   : > { %3086 = vrcp.f32 %v1621_v43  ;;  %v5026_v43 = vld [vmem:[#allocation62_spill] sm:$0xff] }
 0x420   : > { %v3083_v39 = vpop.eup %3082 }
 0x421   : > { %v1630_v41 = vmul.f32 %v3083_v39, %v3079_v36  ;;  %v3085_v42 = vpop.eup %3084  ;;  %v4539_v39 = vstv %s1957_s10 }
 0x422   : > { %v1685_v45 = vpop.f32.mrb[24].mxu0  ;;  %v1726_v47 = vpop.f32.mrb[24].mxu1  ;;  %v1629_v5 = vmul.f32 %v3085_v42, %v1321_v44  ;;  %vm1959_vm2 = vcmp.eq.s32.totalorder %v4539_v39, 1  ;;  %v5025_v42 = vld [vmem:[#allocation61_spill] sm:$0xff] }
 0x423   : > { %v1733_v8 = vadd.f32 %v1685_v45, %v1646_v38  ;;  %v1687_v9 = vpop.f32.mrb[25].mxu0  ;;  %v1728_v10 = vpop.f32.mrb[25].mxu1  ;;  %v1735_v27 = vadd.f32 %v1726_v47, %v1648_v1  ;;  %v5022_v38 = vld [vmem:[#allocation56_spill] sm:$0xff]  ;;  %v5029_v45 = vld [vmem:[#allocation65_spill] sm:$0xff]  ;;  %v5030_v47 = vld [vmem:[#allocation66_spill] sm:$0xff] }
 0x424   : > { %v1734_v11 = vadd.f32 %v1687_v9, %v1647_v40  ;;  %v1689_v12 = vpop.f32.mrb[26].mxu0  ;;  %v1730_v13 = vpop.f32.mrb[26].mxu1  ;;  %v1631_v14 = vadd.f32 %v1630_v41, %v1629_v5  ;;  %v1736_v29 = vadd.f32 %v1728_v10, %v1649_v57  ;;  %v5024_v41 = vld [vmem:[#allocation60_spill] sm:$0xff]  ;;  %v5031_v5 = vld [vmem:[#allocation67_spill] sm:$0xff]  ;;  %v5033_v9 = vld [vmem:[#allocation70_spill] sm:$0xff] }
 0x425   : > { %v2652_v16 = vmul.f32 -1.442695, %v1733_v8  ;;  %v1690_v19 = vpop.f32.mrb[27].mxu0  ;;  %v1731_v20 = vpop.f32.mrb[27].mxu1  ;;  %v2654_v32 = vmul.f32 -1.442695, %v1735_v27 }
 0x426   : > { %v2653_v26 = vmul.f32 -1.442695, %v1734_v11  ;;  %3088 = vtanh.f32 %v1631_v14  ;;  %v4511_v4 = vsel %vm1638_vm1, %v1631_v14, %v1321_v44  ;;  %v3087_v30 = vpop.eup %3086  ;;  %v5027_v44 = vld [vmem:[#allocation63_spill] sm:$0xff]  ;;  %v5032_v8 = vld [vmem:[#allocation68_spill] sm:$0xff]  ;;  %v5040_v20 = vld [vmem:[#allocation25_spill] sm:$0xff] }
 0x427   : > { %3090 = vpow2.f32 %v2652_v16  ;;  %v5034_v10 = vld [vmem:[#allocation71_spill] sm:$0xff]  ;;  %v5037_v16 = vld [vmem:[#allocation77_spill] sm:$0xff]  ;;  %v5039_v19 = vld [vmem:[#allocation28_spill] sm:$0xff] }
 0x428   : > { %3092 = vpow2.f32 %v2653_v26  ;;  %v5036_v13 = vld [vmem:[#allocation75_spill] sm:$0xff]  ;;  %v5044_v26 = vld [vmem:[#allocation30_spill] sm:$0xff]  ;;  %v5046_v1 = vld [vmem:[#allocation33_spill] sm:$0xff] }
 0x429   : > { %3094 = vtanh.f32 %v1736_v29  ;;  %v5047_v57 = vld [vmem:[#allocation35_spill] sm:$0xff]  ;;  %v5048_v27 = vld [vmem:[#allocation34_spill] sm:$0xff]  ;;  %v5049_v29 = vld [vmem:[#allocation36_spill] sm:$0xff] }
 0x42a   : > { %3096 = vpow2.f32 %v2654_v32  ;;  %v5051_v32 = vld [vmem:[#allocation39_spill] sm:$0xff] }
 0x42b   : > { %v3223_v39 = vld [vmem:[#allocation11 + $0x2c] ss:$16 sps:$4 sm:$0xff]  }
 0x430   : > { %v3089_v33 = vpop.eup %3088 }
 0x431   : > { %v3091_v0 = vpop.eup %3090  ;;  %v1633_v63 = vmul.f32 %v3089_v33, %v3087_v30  ;;  %v5050_v30 = vld [vmem:[#allocation37_spill] sm:$0xff]  ;;  %v5052_v33 = vld [vmem:[#allocation38_spill] sm:$0xff] }
 0x432   : > { %v1746_v25 = vadd.f32 1.0, %v3091_v0  ;;  %v3093_v7 = vpop.eup %3092  ;;  %v5053_v0 = vld [vmem:[#allocation40_spill] sm:$0xff] }
 0x433   : > { %v4516_v34 = vsel %vm1638_vm1, %v1633_v63, %v4301_v6  ;;  %v1747_v36 = vadd.f32 1.0, %v3093_v7  ;;  %v3095_v6 = vpop.eup %3094  ;;  %v5054_v63 = vld [vmem:[#allocation41_spill] sm:$0xff]  ;;  %v5056_v7 = vld [vmem:[#allocation42_spill] sm:$0xff] }
 0x434   : > { %3098 = vrcp.f32 %v1746_v25  ;;  %v1762_v37 = vpack.c.bf16 %v4516_v34, %v4516_v34  ;;  %v5055_v25 = vld [vmem:[#allocation43_spill] sm:$0xff] }
 0x435   : > { %3100 = vrcp.f32 %v1747_v36  ;;  %v5057_v36 = vld [vmem:[#allocation45_spill] sm:$0xff] }
 0x436   : > { %1796 = vmatmul.mubr.bf16.vlgmr.msra.gmra.mrb[28].mxu0 %v1762_v37  ;;  %1837 = vmatmul.mubr.bf16.vlgmr.msra.gmra.mrb[28].mxu1 %v1762_v37  ;;  %v5058_v37 = vld [vmem:[#allocation48_spill] sm:$0xff] }
 0x437   : > { %1846 = vmatpush1.bf16.msra.mxu0 %v4959_v53  ;;  %1887 = vmatpush1.bf16.msra.mxu1 %v4960_v24  ;;  %v5021_v53 = vld [vmem:[#allocation55_spill] sm:$0xff]  ;;  %v3097_v24 = vpop.eup %3096 }
 0x438   : > { %1847 = vmatprep.subr.bf16.mxu0 %v4962_v55  ;;  %1888 = vmatprep.subr.bf16.mxu1 %v4963_v58  ;;  %v5023_v58 = vld [vmem:[#allocation57_spill] sm:$0xff] }
 0x439   : > { %1877 = vmatprep.mubr.bf16.mxu0 %v4905_v35  ;;  %1918 = vmatprep.mubr.bf16.mxu1 %v4905_v35 }
 0x43b   : > { %1848 = vmatpush1.bf16.msra.mxu0 %v4964_v3  ;;  %1889 = vmatpush1.bf16.msra.mxu1 %v4965_v49  ;;  %v1748_v3 = vadd.f32 1.0, %v3097_v24  ;;  %v5061_v24 = vld [vmem:[#allocation51_spill] sm:$0xff] }
 0x43c   : > { %1849 = vmatprep.subr.bf16.mxu0 %v4966_v56  ;;  %1890 = vmatprep.subr.bf16.mxu1 %v5021_v53  ;;  %v5060_v53 = vld [vmem:[#allocation50_spill] sm:$0xff] }
 0x43d   : > { %3102 = vrcp.f32 %v1748_v3  ;;  %v3187_v3 = vld [vmem:[#allocation12 + $0xc] ss:$16 sps:$4 sm:$0xff]  }
 0x43e   : > { %v3099_v46 = vpop.eup %3098 }
 0x43f   : > { %v1757_v55 = vmul.f32 %v3099_v46, %v3095_v6  ;;  %1850 = vmatpush1.bf16.msra.mxu0 %v5022_v38  ;;  %1891 = vmatpush1.bf16.msra.mxu1 %v5023_v58  ;;  %v3101_v40 = vpop.eup %3100  ;;  %v5059_v6 = vld [vmem:[#allocation49_spill] sm:$0xff]  ;;  %v5062_v46 = vld [vmem:[#allocation52_spill] sm:$0xff] }
 0x440   : > { %1851 = vmatprep.subr.bf16.mxu0 %v4970_v22  ;;  %1892 = vmatprep.subr.bf16.mxu1 %v4971_v18  ;;  %v1756_v49 = vmul.f32 %v3101_v40, %v4339_v54  ;;  %v5028_v18 = vld [vmem:[#allocation64_spill] sm:$0xff] }
 0x441   : > { %v3185_v38 = vld [vmem:[#allocation9 + $0xec] ss:$16 sps:$4 sm:$0xff]  }
 0x442   : > { %v1758_v56 = vadd.f32 %v1757_v55, %v1756_v49  ;;  %v5063_v55 = vld [vmem:[#allocation53_spill] sm:$0xff] }
 0x443   : > { %1852 = vmatpush1.bf16.msra.mxu0 %v5024_v41  ;;  %1893 = vmatpush1.bf16.msra.mxu1 %v5025_v42  ;;  %v3189_v49 = vld [vmem:[#allocation12 + $0x8] ss:$16 sps:$4 sm:$0xff]   ;;  %v3195_v42 = vld [vmem:[#allocation12 + $0x4c] ss:$16 sps:$4 sm:$0xff]  }
 0x444   : > { %1853 = vmatprep.subr.bf16.mxu0 %v5026_v43  ;;  %1894 = vmatprep.subr.bf16.mxu1 %v5027_v44  ;;  %3104 = vtanh.f32 %v1758_v56  ;;  %v4552_v22 = vsel %vm1959_vm2, %v1758_v56, %v4339_v54  ;;  %v5035_v54 = vld [vmem:[#allocation72_spill] sm:$0xff]  ;;  %v3193_v41 = vld [vmem:[#allocation12 + $0x28] ss:$16 sps:$4 sm:$0xff]  }
 0x445   : > { %v3190_v56 = vld [vmem:[#allocation12 + $0x24] ss:$16 sps:$4 sm:$0xff]   ;;  %v3196_v43 = vld [vmem:[#allocation12 + $0x40] ss:$16 sps:$4 sm:$0xff]   ;;  %v3197_v44 = vld [vmem:[#allocation12 + $0x48] ss:$16 sps:$4 sm:$0xff]  }
 0x447   : > { %1854 = vmatpush1.bf16.msra.mxu0 %v5028_v18  ;;  %1895 = vmatpush1.bf16.msra.mxu1 %v5029_v45  ;;  %v3103_v11 = vpop.eup %3102  ;;  %v3198_v18 = vld [vmem:[#allocation12 + $0x64] ss:$16 sps:$4 sm:$0xff]   ;;  %v3199_v45 = vld [vmem:[#allocation12 + $0x6c] ss:$16 sps:$4 sm:$0xff]  }
 0x448   : > { %1855 = vmatprep.subr.bf16.mxu0 %v5030_v47  ;;  %1896 = vmatprep.subr.bf16.mxu1 %v5031_v5  ;;  %v3200_v47 = vld [vmem:[#allocation12 + $0x60] ss:$16 sps:$4 sm:$0xff]   ;;  %v3201_v5 = vld [vmem:[#allocation12 + $0x68] ss:$16 sps:$4 sm:$0xff]  }
 0x44b   : > { %1856 = vmatpush1.bf16.msra.mxu0 %v5032_v8  ;;  %1897 = vmatpush1.bf16.msra.mxu1 %v4981_v59  ;;  %v3202_v8 = vld [vmem:[#allocation12 + $0x84] ss:$16 sps:$4 sm:$0xff]  }
 0x44c   : > { %1857 = vmatprep.subr.bf16.mxu0 %v5033_v9  ;;  %1898 = vmatprep.subr.bf16.mxu1 %v5034_v10  ;;  %v3203_v9 = vld [vmem:[#allocation12 + $0x8c] ss:$16 sps:$4 sm:$0xff]   ;;  %v3204_v10 = vld [vmem:[#allocation12 + $0x80] ss:$16 sps:$4 sm:$0xff]  }
 0x44e   : > { %v3105_v12 = vpop.eup %3104 }
 0x44f   : > { %1858 = vmatpush1.bf16.msra.mxu0 %v5035_v54  ;;  %1899 = vmatpush1.bf16.msra.mxu1 %v4985_v62  ;;  %v1760_v14 = vmul.f32 %v3105_v12, %v3103_v11  ;;  %v5041_v62 = vld [vmem:[#allocation29_spill] sm:$0xff] }
 0x450   : > { %1859 = vmatprep.subr.bf16.mxu0 %v4986_v51  ;;  %1900 = vmatprep.subr.bf16.mxu1 %v5036_v13  ;;  %v5042_v51 = vld [vmem:[#allocation27_spill] sm:$0xff]  ;;  %v3208_v13 = vld [vmem:[#allocation12 + $0xa0] ss:$16 sps:$4 sm:$0xff]  }
 0x451   : > { %v1761_v59 = vpack.c.bf16 %v1760_v14, %v1760_v14  ;;  %v4602_v58 = vsel %vm1959_vm2, %v1760_v14, %v4453_v2  ;;  %v3191_v2 = vld [vmem:[#allocation12 + $0x2c] ss:$16 sps:$4 sm:$0xff]   ;;  %v3205_v11 = vld [vmem:[#allocation12 + $0x88] ss:$16 sps:$4 sm:$0xff]   ;;  %v3206_v12 = vld [vmem:[#allocation12 + $0xa4] ss:$16 sps:$4 sm:$0xff]  }
 0x452   : > { %v1971_v40 = vpack.c.bf16 %v4602_v58, %v4602_v58  ;;  %v3207_v54 = vld [vmem:[#allocation12 + $0xac] ss:$16 sps:$4 sm:$0xff]   ;;  %v3209_v14 = vld [vmem:[#allocation12 + $0xa8] ss:$16 sps:$4 sm:$0xff]  }
 0x453   : > { %1860 = vmatpush1.bf16.msra.mxu0 %v4988_v50  ;;  %1901 = vmatpush1.bf16.msra.mxu1 %v5037_v16  ;;  %v5043_v50 = vld [vmem:[#allocation31_spill] sm:$0xff] }
 0x454   : > { %1972 = vmatprep.subr.bf16.mxu0 %v4359_v60  ;;  %2013 = vmatprep.subr.bf16.mxu1 %v5038_v17  ;;  %v5045_v60 = vld [vmem:[#allocation32_spill] sm:$0xff] }
 0x455   : > { %v3210_v16 = vld [vmem:[#allocation12 + $0xc4] ss:$16 sps:$4 sm:$0xff]   ;;  %v3212_v17 = vld [vmem:[#allocation12 + $0xc0] ss:$16 sps:$4 sm:$0xff]  }
 0x456   : > { %1878 = vmatmul.mubr.bf16.vlgmr.msra.gmra.mrb[32].mxu0 %v1761_v59  ;;  %1919 = vmatmul.mubr.bf16.vlgmr.msra.gmra.mrb[32].mxu1 %v1761_v59  ;;  %v3211_v59 = vld [vmem:[#allocation12 + $0xcc] ss:$16 sps:$4 sm:$0xff]  }
 0x457   : > { %1973 = vmatpush1.bf16.msra.mxu0 %v5039_v19  ;;  %2014 = vmatpush1.bf16.msra.mxu1 %v5040_v20  ;;  %v3213_v19 = vld [vmem:[#allocation12 + $0xc8] ss:$16 sps:$4 sm:$0xff]   ;;  %v3214_v20 = vld [vmem:[#allocation12 + $0xe4] ss:$16 sps:$4 sm:$0xff]  }
 0x458   : > { %1974 = vmatprep.subr.bf16.mxu0 %v5041_v62  ;;  %2015 = vmatprep.subr.bf16.mxu1 %v5042_v51  ;;  %v3215_v62 = vld [vmem:[#allocation12 + $0xec] ss:$16 sps:$4 sm:$0xff]   ;;  %v3216_v51 = vld [vmem:[#allocation12 + $0xe0] ss:$16 sps:$4 sm:$0xff]  }
 0x459   : > { %2004 = vmatprep.mubr.bf16.mxu0 %v4905_v35  ;;  %2045 = vmatprep.mubr.bf16.mxu1 %v4905_v35 }
 0x45b   : > { %1975 = vmatpush1.bf16.msra.mxu0 %v5043_v50  ;;  %2016 = vmatpush1.bf16.msra.mxu1 %v5044_v26  ;;  %v3217_v50 = vld [vmem:[#allocation12 + $0xe8] ss:$16 sps:$4 sm:$0xff]   ;;  %v3218_v26 = vld [vmem:[#allocation11 + $0x4] ss:$16 sps:$4 sm:$0xff]  }
 0x45c   : > { %1976 = vmatprep.subr.bf16.mxu0 %v5045_v60  ;;  %2017 = vmatprep.subr.bf16.mxu1 %v5046_v1  ;;  %v3219_v60 = vld [vmem:[#allocation11 + $0xc] ss:$16 sps:$4 sm:$0xff]  }
 0x45f   : > { %1977 = vmatpush1.bf16.msra.mxu0 %v5047_v57  ;;  %2018 = vmatpush1.bf16.msra.mxu1 %v5048_v27 }
 0x460   : > { %1978 = vmatprep.subr.bf16.mxu0 %v5049_v29  ;;  %2019 = vmatprep.subr.bf16.mxu1 %v5050_v30 }
 0x463   : > { %1979 = vmatpush1.bf16.msra.mxu0 %v5051_v32  ;;  %2020 = vmatpush1.bf16.msra.mxu1 %v5052_v33 }
 0x464   : > { %1980 = vmatprep.subr.bf16.mxu0 %v5053_v0  ;;  %2021 = vmatprep.subr.bf16.mxu1 %v5054_v63 }
 0x467   : > { %1981 = vmatpush1.bf16.msra.mxu0 %v5055_v25  ;;  %2022 = vmatpush1.bf16.msra.mxu1 %v5056_v7 }
 0x468   : > { %1982 = vmatprep.subr.bf16.mxu0 %v5057_v36  ;;  %2023 = vmatprep.subr.bf16.mxu1 %v5058_v37 }
 0x46b   : > { %1983 = vmatpush1.bf16.msra.mxu0 %v5059_v6  ;;  %2024 = vmatpush1.bf16.msra.mxu1 %v4430_v28  ;;  %v3186_v28 = vld [vmem:[#allocation9 + $0xe8] ss:$16 sps:$4 sm:$0xff]  }
 0x46c   : > { %1984 = vmatprep.subr.bf16.mxu0 %v5060_v53  ;;  %2025 = vmatprep.subr.bf16.mxu1 %v5061_v24 }
 0x46f   : > { %1985 = vmatpush1.bf16.msra.mxu0 %v5062_v46  ;;  %2026 = vmatpush1.bf16.msra.mxu1 %v5063_v55 }
 0x470   : > { %1986 = vmatprep.subr.bf16.mxu0 %v4445_v23  ;;  %2027 = vmatprep.subr.bf16.mxu1 %v3185_v38  ;;  %v3188_v23 = vld [vmem:[#allocation12] ss:$16 sps:$4 sm:$0xff]  }
 0x473   : > { %1987 = vmatpush1.bf16.msra.mxu0 %v4455_v61  ;;  %2028 = vmatpush1.bf16.msra.mxu1 %v3186_v28  ;;  %v3192_v61 = vld [vmem:[#allocation12 + $0x20] ss:$16 sps:$4 sm:$0xff]  }
 0x474   : > { %2084 = vmatprep.subr.bf16.mxu0 %v4461_v21  ;;  %2125 = vmatprep.subr.bf16.mxu1 %v3187_v3  ;;  %v3194_v21 = vld [vmem:[#allocation12 + $0x44] ss:$16 sps:$4 sm:$0xff]  }
 0x476   : > { %2005 = vmatmul.mubr.bf16.vlgmr.msra.gmra.mrb[36].mxu0 %v1971_v40  ;;  %2046 = vmatmul.mubr.bf16.vlgmr.msra.gmra.mrb[36].mxu1 %v1971_v40 }
 0x477   : > { %2085 = vmatpush1.bf16.msra.mxu0 %v3188_v23  ;;  %2126 = vmatpush1.bf16.msra.mxu1 %v3189_v49 }
 0x478   : > { %2086 = vmatprep.subr.bf16.mxu0 %v3190_v56  ;;  %2127 = vmatprep.subr.bf16.mxu1 %v3191_v2 }
 0x479   : > { %2116 = vmatprep.mubr.bf16.mxu0 %v4905_v35  ;;  %2157 = vmatprep.mubr.bf16.mxu1 %v4905_v35 }
 0x47b   : > { %2087 = vmatpush1.bf16.msra.mxu0 %v3192_v61  ;;  %2128 = vmatpush1.bf16.msra.mxu1 %v3193_v41 }
 0x47c   : > { %2088 = vmatprep.subr.bf16.mxu0 %v3194_v21  ;;  %2129 = vmatprep.subr.bf16.mxu1 %v3195_v42 }
 0x47f   : > { %2089 = vmatpush1.bf16.msra.mxu0 %v3196_v43  ;;  %2130 = vmatpush1.bf16.msra.mxu1 %v3197_v44  ;;  %v2658_v44 = vld [vmem:[%s3864_s12 + $0x30] sm:$0xff] }
 0x480   : > { %2090 = vmatprep.subr.bf16.mxu0 %v3198_v18  ;;  %2131 = vmatprep.subr.bf16.mxu1 %v3199_v45 }
 0x483   : > { %2091 = vmatpush1.bf16.msra.mxu0 %v3200_v47  ;;  %2132 = vmatpush1.bf16.msra.mxu1 %v3201_v5  ;;  %v1967_v47 = vunpack.c.l.bf16 %v2658_v44 }
 0x484   : > { %2092 = vmatprep.subr.bf16.mxu0 %v3202_v8  ;;  %2133 = vmatprep.subr.bf16.mxu1 %v3203_v9  ;;  %v1968_v8 = vunpack.c.h.bf16 %v2658_v44 }
 0x487   : > { %2093 = vmatpush1.bf16.msra.mxu0 %v3204_v10  ;;  %2134 = vmatpush1.bf16.msra.mxu1 %v3205_v11 }
 0x488   : > { %2094 = vmatprep.subr.bf16.mxu0 %v3206_v12  ;;  %2135 = vmatprep.subr.bf16.mxu1 %v3207_v54 }
 0x48b   : > { %2095 = vmatpush1.bf16.msra.mxu0 %v3208_v13  ;;  %2136 = vmatpush1.bf16.msra.mxu1 %v3209_v14 }
 0x48c   : > { %2096 = vmatprep.subr.bf16.mxu0 %v3210_v16  ;;  %2137 = vmatprep.subr.bf16.mxu1 %v3211_v59 }
 0x48f   : > { %2097 = vmatpush1.bf16.msra.mxu0 %v3212_v17  ;;  %2138 = vmatpush1.bf16.msra.mxu1 %v3213_v19 }
 0x490   : > { %2098 = vmatprep.subr.bf16.mxu0 %v3214_v20  ;;  %2139 = vmatprep.subr.bf16.mxu1 %v3215_v62 }
 0x493   : > { %2099 = vmatpush1.bf16.msra.mxu0 %v3216_v51  ;;  %2140 = vmatpush1.bf16.msra.mxu1 %v3217_v50  ;;  %v2659_v50 = vld [vmem:[%s3864_s12 + $0x38] sm:$0xff] }
 0x494   : > { %2166 = vmatprep.subr.bf16.mxu0 %v3218_v26  ;;  %2207 = vmatprep.subr.bf16.mxu1 %v3219_v60 }
 0x509   : > { %v1797_v1 = vpop.f32.mrb[28].mxu0  ;;  %v1838_v57 = vpop.f32.mrb[28].mxu1 }
 0x50a   : > { %v1799_v27 = vpop.f32.mrb[29].mxu0  ;;  %v1840_v29 = vpop.f32.mrb[29].mxu1 }
 0x50b   : > { %v1801_v30 = vpop.f32.mrb[30].mxu0  ;;  %v1842_v32 = vpop.f32.mrb[30].mxu1 }
 0x50c   : > { %v1802_v33 = vpop.f32.mrb[31].mxu0  ;;  %v1843_v0 = vpop.f32.mrb[31].mxu1 }
 0x529   : > { %v1879_v63 = vpop.f32.mrb[32].mxu0  ;;  %v1920_v25 = vpop.f32.mrb[32].mxu1 }
 0x52a   : > { %v1880_v7 = vadd.f32 %v1879_v63, %v1797_v1  ;;  %v1921_v36 = vadd.f32 %v1920_v25, %v1838_v57  ;;  %v1881_v37 = vpop.f32.mrb[33].mxu0  ;;  %v1922_v6 = vpop.f32.mrb[33].mxu1 }
 0x52b   : > { %v1882_v53 = vadd.f32 %v1881_v37, %v1799_v27  ;;  %v1923_v24 = vadd.f32 %v1922_v6, %v1840_v29  ;;  %v1883_v46 = vpop.f32.mrb[34].mxu0  ;;  %v1924_v55 = vpop.f32.mrb[34].mxu1  ;;  %v1969_v27 = vunpack.c.l.bf16 %v2659_v50  ;;  %v1970_v29 = vunpack.c.h.bf16 %v2659_v50 }
 0x52c   : > { %v1927_v38 = vadd.f32 %v1880_v7, %v4278_v52  ;;  %v1884_v28 = vpop.f32.mrb[35].mxu0  ;;  %v1925_v40 = vpop.f32.mrb[35].mxu1  ;;  %v1929_v56 = vadd.f32 %v1921_v36, %v4284_v15  ;;  %v3221_v46 = vld [vmem:[#allocation11 + $0x8] ss:$16 sps:$4 sm:$0xff]   ;;  %v3224_v55 = vld [vmem:[#allocation11 + $0x20] ss:$16 sps:$4 sm:$0xff]  }
 0x52d   : > { %v1928_v3 = vadd.f32 %v1882_v53, %v4280_v48  ;;  %v1930_v2 = vadd.f32 %v1923_v24, %v5019_v31  ;;  %v3220_v24 = vld [vmem:[#allocation11] ss:$16 sps:$4 sm:$0xff]   ;;  %v3226_v40 = vld [vmem:[#allocation11 + $0x44] ss:$16 sps:$4 sm:$0xff]  }
 0x52e   : > { %v2655_v23 = vmul.f32 -1.442695, %v1927_v38  ;;  %v2657_v61 = vmul.f32 -1.442695, %v1929_v56  ;;  %v3225_v38 = vld [vmem:[#allocation11 + $0x28] ss:$16 sps:$4 sm:$0xff]  }
 0x52f   : > { %v2656_v49 = vmul.f32 -1.442695, %v1928_v3  ;;  %v3227_v3 = vld [vmem:[#allocation11 + $0x4c] ss:$16 sps:$4 sm:$0xff]  }
 0x530   : > { %3106 = vpow2.f32 %v2655_v23 }
 0x531   : > { %3108 = vpow2.f32 %v2656_v49 }
 0x532   : > { %3110 = vtanh.f32 %v1930_v2  ;;  %v3228_v2 = vld [vmem:[#allocation11 + $0x40] ss:$16 sps:$4 sm:$0xff]  }
 0x533   : > { %3112 = vpow2.f32 %v2657_v61  ;;  %v3229_v61 = vld [vmem:[#allocation11 + $0x48] ss:$16 sps:$4 sm:$0xff]  }
 0x53a   : > { %v3107_v41 = vpop.eup %3106 }
 0x53b   : > { %v1940_v21 = vadd.f32 1.0, %v3107_v41  ;;  %v3109_v42 = vpop.eup %3108  ;;  %v4638_v41 = vstv %s2278_s24 }
 0x53c   : > { %v1941_v43 = vadd.f32 1.0, %v3109_v42  ;;  %v3111_v18 = vpop.eup %3110  ;;  %v3230_v42 = vld [vmem:[#allocation11 + $0x64] ss:$16 sps:$4 sm:$0xff]   ;;  %vm2280_vm3 = vcmp.eq.s32.totalorder %v4638_v41, 1  ;;  %v2298_v41 = vld [vmem:[#allocation15 + $0x28] sm:$0xff] (!%p2666_p5) }
 0x53d   : > { %3114 = vrcp.f32 %v1940_v21  ;;  %v3113_v45 = vpop.eup %3112 }
 0x53e   : > { %3116 = vrcp.f32 %v1941_v43  ;;  %v1942_v11 = vadd.f32 1.0, %v3113_v45  ;;  %v3231_v43 = vld [vmem:[#allocation11 + $0x6c] ss:$16 sps:$4 sm:$0xff]   ;;  %v3232_v45 = vld [vmem:[#allocation11 + $0x60] ss:$16 sps:$4 sm:$0xff]  }
 0x540   : > { %3118 = vrcp.f32 %v1942_v11  ;;  %v3237_v11 = vld [vmem:[#allocation11 + $0x88] ss:$16 sps:$4 sm:$0xff]  }
 0x547   : > { %v3115_v5 = vpop.eup %3114 }
 0x548   : > { %v1951_v9 = vmul.f32 %v3115_v5, %v3111_v18  ;;  %v3117_v10 = vpop.eup %3116  ;;  %v3234_v5 = vld [vmem:[#allocation11 + $0x84] ss:$16 sps:$4 sm:$0xff]  }
 0x549   : > { %v2006_v12 = vpop.f32.mrb[36].mxu0  ;;  %v2047_v54 = vpop.f32.mrb[36].mxu1  ;;  %v1950_v13 = vmul.f32 %v3117_v10, %v4511_v4  ;;  %v3236_v10 = vld [vmem:[#allocation11 + $0x80] ss:$16 sps:$4 sm:$0xff]  }
 0x54a   : > { %v2054_v14 = vadd.f32 %v2006_v12, %v1967_v47  ;;  %v2008_v16 = vpop.f32.mrb[37].mxu0  ;;  %v2049_v59 = vpop.f32.mrb[37].mxu1  ;;  %v2056_v30 = vadd.f32 %v2047_v54, %v1969_v27  ;;  %v3233_v47 = vld [vmem:[#allocation11 + $0x68] ss:$16 sps:$4 sm:$0xff]   ;;  %v3238_v12 = vld [vmem:[#allocation11 + $0xa4] ss:$16 sps:$4 sm:$0xff]  }
 0x54b   : > { %v2055_v17 = vadd.f32 %v2008_v16, %v1968_v8  ;;  %v2010_v19 = vpop.f32.mrb[38].mxu0  ;;  %v2051_v20 = vpop.f32.mrb[38].mxu1  ;;  %v1952_v62 = vadd.f32 %v1951_v9, %v1950_v13  ;;  %v2057_v32 = vadd.f32 %v2049_v59, %v1970_v29  ;;  %v3235_v8 = vld [vmem:[#allocation11 + $0x8c] ss:$16 sps:$4 sm:$0xff]   ;;  %v3240_v13 = vld [vmem:[#allocation11 + $0xa0] ss:$16 sps:$4 sm:$0xff]  }
 0x54c   : > { %v2660_v51 = vmul.f32 -1.442695, %v2054_v14  ;;  %v2011_v26 = vpop.f32.mrb[39].mxu0  ;;  %v2052_v60 = vpop.f32.mrb[39].mxu1  ;;  %v2662_v0 = vmul.f32 -1.442695, %v2056_v30 }
 0x54d   : > { %v2661_v1 = vmul.f32 -1.442695, %v2055_v17  ;;  %3120 = vtanh.f32 %v1952_v62  ;;  %v4620_v57 = vsel %vm1959_vm2, %v1952_v62, %v4511_v4  ;;  %v3119_v33 = vpop.eup %3118  ;;  %v3239_v54 = vld [vmem:[#allocation11 + $0xac] ss:$16 sps:$4 sm:$0xff]   ;;  %v3241_v14 = vld [vmem:[#allocation11 + $0xa8] ss:$16 sps:$4 sm:$0xff]  }
 0x54e   : > { %3122 = vpow2.f32 %v2660_v51  ;;  %v3242_v16 = vld [vmem:[#allocation11 + $0xc4] ss:$16 sps:$4 sm:$0xff]   ;;  %v3243_v59 = vld [vmem:[#allocation11 + $0xcc] ss:$16 sps:$4 sm:$0xff]   ;;  %v3245_v20 = vld [vmem:[#allocation11 + $0xc8] ss:$16 sps:$4 sm:$0xff]  }
 0x54f   : > { %3124 = vpow2.f32 %v2661_v1  ;;  %v3246_v62 = vld [vmem:[#allocation11 + $0xe4] ss:$16 sps:$4 sm:$0xff]   ;;  %v3247_v51 = vld [vmem:[#allocation11 + $0xec] ss:$16 sps:$4 sm:$0xff]   ;;  %v3248_v60 = vld [vmem:[#allocation11 + $0xe0] ss:$16 sps:$4 sm:$0xff]  }
 0x550   : > { %3126 = vtanh.f32 %v2057_v32  ;;  %v3249_v1 = vld [vmem:[#allocation11 + $0xe8] ss:$16 sps:$4 sm:$0xff]  }
 0x551   : > { %3128 = vpow2.f32 %v2662_v0 }
 0x557   : > { %v3121_v63 = vpop.eup %3120 }
 0x558   : > { %v3123_v25 = vpop.eup %3122  ;;  %v1954_v7 = vmul.f32 %v3121_v63, %v3119_v33 }
 0x559   : > { %v2067_v36 = vadd.f32 1.0, %v3123_v25  ;;  %v3125_v37 = vpop.eup %3124 }
 0x55a   : > { %v4625_v4 = vsel %vm1959_vm2, %v1954_v7, %v4516_v34  ;;  %v2068_v6 = vadd.f32 1.0, %v3125_v37  ;;  %v3222_v34 = vld [vmem:[#allocation11 + $0x24] ss:$16 sps:$4 sm:$0xff]   ;;  %v3127_v28 = vpop.eup %3126 }
 0x55b   : > { %3130 = vrcp.f32 %v2067_v36  ;;  %v2083_v53 = vpack.c.bf16 %v4625_v4, %v4625_v4  ;;  %v3129_v23 = vpop.eup %3128 }
 0x55c   : > { %3132 = vrcp.f32 %v2068_v6  ;;  %v2069_v21 = vadd.f32 1.0, %v3129_v23 }
 0x55d   : > { %2117 = vmatmul.mubr.bf16.vlgmr.msra.gmra.mrb[40].mxu0 %v2083_v53  ;;  %2158 = vmatmul.mubr.bf16.vlgmr.msra.gmra.mrb[40].mxu1 %v2083_v53 }
 0x55e   : > { %2167 = vmatpush1.bf16.msra.mxu0 %v3220_v24  ;;  %2208 = vmatpush1.bf16.msra.mxu1 %v3221_v46  ;;  %3134 = vrcp.f32 %v2069_v21 }
 0x55f   : > { %2168 = vmatprep.subr.bf16.mxu0 %v3222_v34  ;;  %2209 = vmatprep.subr.bf16.mxu1 %v3223_v39 }
 0x560   : > { %2198 = vmatprep.mubr.bf16.mxu0 %v4905_v35  ;;  %2239 = vmatprep.mubr.bf16.mxu1 %v4905_v35 }
 0x562   : > { %2169 = vmatpush1.bf16.msra.mxu0 %v3224_v55  ;;  %2210 = vmatpush1.bf16.msra.mxu1 %v3225_v38 }
 0x563   : > { %2170 = vmatprep.subr.bf16.mxu0 %v3226_v40  ;;  %2211 = vmatprep.subr.bf16.mxu1 %v3227_v3 }
 0x565   : > { %v3131_v49 = vpop.eup %3130 }
 0x566   : > { %v2078_v56 = vmul.f32 %v3131_v49, %v3127_v28  ;;  %2171 = vmatpush1.bf16.msra.mxu0 %v3228_v2  ;;  %2212 = vmatpush1.bf16.msra.mxu1 %v3229_v61  ;;  %v3133_v35 = vpop.eup %3132 }
 0x567   : > { %2172 = vmatprep.subr.bf16.mxu0 %v3230_v42  ;;  %2213 = vmatprep.subr.bf16.mxu1 %v3231_v43  ;;  %v2077_v44 = vmul.f32 %v3133_v35, %v4552_v22 }
 0x568   : > { %v3135_v17 = vpop.eup %3134 }
 0x569   : > { %v2079_v18 = vadd.f32 %v2078_v56, %v2077_v44 }
 0x56a   : > { %2173 = vmatpush1.bf16.msra.mxu0 %v3232_v45  ;;  %2214 = vmatpush1.bf16.msra.mxu1 %v3233_v47 }
 0x56b   : > { %2174 = vmatprep.subr.bf16.mxu0 %v3234_v5  ;;  %2215 = vmatprep.subr.bf16.mxu1 %v3235_v8  ;;  %3136 = vtanh.f32 %v2079_v18  ;;  %v2282_v9 = vsel %vm2280_vm3, %v2079_v18, %v4552_v22  ;;  %v3244_v22 = vld [vmem:[#allocation11 + $0xc0] ss:$16 sps:$4 sm:$0xff]  }
 0x56c   : > { %2286 = vst [vmem:[#allocation3] sm:$0xff] %v2282_v9 }
 0x56e   : > { %2175 = vmatpush1.bf16.msra.mxu0 %v3236_v10  ;;  %2216 = vmatpush1.bf16.msra.mxu1 %v3237_v11 }
 0x56f   : > { %2176 = vmatprep.subr.bf16.mxu0 %v3238_v12  ;;  %2217 = vmatprep.subr.bf16.mxu1 %v3239_v54  ;;  %v2293_v12 = vld [vmem:[#allocation15] sm:$0xff] (!%p2666_p5)  ;;  %v2294_v54 = vld [vmem:[#allocation15 + $0x8] sm:$0xff] (!%p2666_p5) }
 0x572   : > { %2177 = vmatpush1.bf16.msra.mxu0 %v3240_v13  ;;  %2218 = vmatpush1.bf16.msra.mxu1 %v3241_v14  ;;  %v2295_v13 = vld [vmem:[#allocation15 + $0x10] sm:$0xff] (!%p2666_p5)  ;;  %v3555_v14 = vmov (!%p2666_p5), 0.0|0.0  }
 0x573   : > { %2178 = vmatprep.subr.bf16.mxu0 %v3242_v16  ;;  %2219 = vmatprep.subr.bf16.mxu1 %v3243_v59  ;;  %v2727_v16 = vpack.c.bf16 (!%p2666_p5), %v2294_v54, %v2293_v12  ;;  %v2296_v59 = vld [vmem:[#allocation15 + $0x18] sm:$0xff] (!%p2666_p5) }
 0x575   : > { %v3137_v19 = vpop.eup %3136 }
 0x576   : > { %2179 = vmatpush1.bf16.msra.mxu0 %v3244_v22  ;;  %2220 = vmatpush1.bf16.msra.mxu1 %v3245_v20  ;;  %v2081_v50 = vmul.f32 %v3137_v19, %v3135_v17  ;;  %v2730_v17 = vpack.c.bf16 (!%p2666_p5), %v2296_v59, %v2295_v13  ;;  %v2297_v19 = vld [vmem:[#allocation15 + $0x20] sm:$0xff] (!%p2666_p5)  ;;  %v2299_v22 = vld [vmem:[#allocation15 + $0x30] sm:$0xff] (!%p2666_p5)  ;;  %v2300_v20 = vld [vmem:[#allocation15 + $0x38] sm:$0xff] (!%p2666_p5) }
 0x577   : > { %2180 = vmatprep.subr.bf16.mxu0 %v3246_v62  ;;  %2221 = vmatprep.subr.bf16.mxu1 %v3247_v51  ;;  %v2736_v62 = vpack.c.bf16 (!%p2666_p5), %v2300_v20, %v2299_v22  ;;  %v2301_v51 = vld [vmem:[#allocation15 + $0x40] sm:$0xff] (!%p2666_p5) }
 0x578   : > { %v2281_v26 = vsel %vm2280_vm3, %v2081_v50, %v4602_v58  ;;  %v2082_v27 = vpack.c.bf16 %v2081_v50, %v2081_v50  ;;  %v2302_v50 = vld [vmem:[#allocation15 + $0x48] sm:$0xff] (!%p2666_p5) }
 0x579   : > { %2285 = vst [vmem:[#allocation2] sm:$0xff] %v2281_v26  ;;  %v2739_v26 = vpack.c.bf16 (!%p2666_p5), %v2302_v50, %v2301_v51 }
 0x57a   : > { %2181 = vmatpush1.bf16.msra.mxu0 %v3248_v60  ;;  %2222 = vmatpush1.bf16.msra.mxu1 %v3249_v1  ;;  %v2303_v60 = vld [vmem:[#allocation15 + $0x50] sm:$0xff] (!%p2666_p5)  ;;  %v2304_v1 = vld [vmem:[#allocation15 + $0x58] sm:$0xff] (!%p2666_p5) }
 0x57b   : > { %2726 = vmatprep.subr.bf16.mxu0 (!%p2666_p5), %v3555_v14 }
 0x57d   : > { %2199 = vmatmul.mubr.bf16.vlgmr.msra.gmra.mrb[44].mxu0 %v2082_v27  ;;  %2240 = vmatmul.mubr.bf16.vlgmr.msra.gmra.mrb[44].mxu1 %v2082_v27  ;;  %v2742_v27 = vpack.c.bf16 (!%p2666_p5), %v2304_v1, %v2303_v60 }
 0x57e   : > { %2728 = vmatpush3.bf16.msra.mxu0 (!%p2666_p5), %v2727_v16 }
 0x57f   : > { %2729 = vmatprep.subr.bf16.mxu0 (!%p2666_p5), %v3555_v14 }
 0x582   : > { %2731 = vmatpush3.bf16.msra.mxu0 (!%p2666_p5), %v2730_v17 }
 0x583   : > { %2732 = vmatprep.subr.bf16.mxu0 (!%p2666_p5), %v3555_v14 }
 0x630   : > { %v2118_v29 = vpop.f32.mrb[40].mxu0  ;;  %v2159_v30 = vpop.f32.mrb[40].mxu1 }
 0x631   : > { %v2120_v32 = vpop.f32.mrb[41].mxu0  ;;  %v2161_v33 = vpop.f32.mrb[41].mxu1 }
 0x632   : > { %v2122_v0 = vpop.f32.mrb[42].mxu0  ;;  %v2163_v63 = vpop.f32.mrb[42].mxu1 }
 0x633   : > { %v2123_v25 = vpop.f32.mrb[43].mxu0  ;;  %v2164_v7 = vpop.f32.mrb[43].mxu1  ;;  %v2308_v0 = vld [vmem:[#allocation15 + $0x78] sm:$0xff] (!%p2666_p5) }
 0x634   : > { %v2667_v25 = vld [vmem:[#allocation17] ss:$0 sm:$0xff] (!%p2666_p5) }
 0x650   : > { %v2200_v36 = vpop.f32.mrb[44].mxu0  ;;  %v2241_v37 = vpop.f32.mrb[44].mxu1 }
 0x651   : > { %v2201_v6 = vadd.f32 %v2200_v36, %v2118_v29  ;;  %v2242_v58 = vadd.f32 %v2241_v37, %v2159_v30  ;;  %v2202_v53 = vpop.f32.mrb[45].mxu0  ;;  %v2243_v24 = vpop.f32.mrb[45].mxu1  ;;  %v2305_v29 = vld [vmem:[#allocation15 + $0x60] sm:$0xff] (!%p2666_p5)  ;;  %v2306_v30 = vld [vmem:[#allocation15 + $0x68] sm:$0xff] (!%p2666_p5) }
 0x652   : > { %v2203_v46 = vadd.f32 %v2202_v53, %v2120_v32  ;;  %v2244_v34 = vadd.f32 %v2243_v24, %v2161_v33  ;;  %v2204_v39 = vpop.f32.mrb[46].mxu0  ;;  %v2245_v55 = vpop.f32.mrb[46].mxu1  ;;  %v2745_v32 = vpack.c.bf16 (!%p2666_p5), %v2306_v30, %v2305_v29  ;;  %v2307_v33 = vld [vmem:[#allocation15 + $0x70] sm:$0xff] (!%p2666_p5) }
 0x653   : > { %v2248_v38 = vadd.f32 %v2201_v6, %v4278_v52  ;;  %v2205_v28 = vpop.f32.mrb[47].mxu0  ;;  %v2246_v40 = vpop.f32.mrb[47].mxu1  ;;  %v2250_v56 = vadd.f32 %v2242_v58, %v4284_v15  ;;  %v2748_v63 = vpack.c.bf16 (!%p2666_p5), %v2308_v0, %v2307_v33 }
 0x654   : > { %v2249_v3 = vadd.f32 %v2203_v46, %v4280_v48  ;;  %v2251_v2 = vadd.f32 %v2244_v34, %v5019_v31 }
 0x655   : > { %v2663_v23 = vmul.f32 -1.442695, %v2248_v38  ;;  %v2665_v61 = vmul.f32 -1.442695, %v2250_v56 }
 0x656   : > { %v2664_v49 = vmul.f32 -1.442695, %v2249_v3 }
 0x657   : > { %3138 = vpow2.f32 %v2663_v23 }
 0x658   : > { %3140 = vpow2.f32 %v2664_v49 }
 0x659   : > { %3142 = vtanh.f32 %v2251_v2 }
 0x65a   : > { %3144 = vpow2.f32 %v2665_v61 }
 0x661   : > { %v3139_v35 = vpop.eup %3138 }
 0x662   : > { %v2261_v21 = vadd.f32 1.0, %v3139_v35  ;;  %v3141_v42 = vpop.eup %3140 }
 0x663   : > { %v2262_v52 = vadd.f32 1.0, %v3141_v42  ;;  %v3143_v43 = vpop.eup %3142 }
 0x664   : > { %3146 = vrcp.f32 %v2261_v21  ;;  %v3145_v44 = vpop.eup %3144 }
 0x665   : > { %3148 = vrcp.f32 %v2262_v52  ;;  %v2263_v47 = vadd.f32 1.0, %v3145_v44 }
 0x667   : > { %3150 = vrcp.f32 %v2263_v47 }
 0x66e   : > { %v3147_v48 = vpop.eup %3146 }
 0x66f   : > { %v2272_v18 = vmul.f32 %v3147_v48, %v3143_v43  ;;  %v3149_v45 = vpop.eup %3148 }
 0x670   : > { %v2271_v5 = vmul.f32 %v3149_v45, %v4620_v57 }
 0x671   : > { %v3151_v8 = vpop.eup %3150 }
 0x672   : > { %v2273_v15 = vadd.f32 %v2272_v18, %v2271_v5 }
 0x674   : > { %3152 = vtanh.f32 %v2273_v15  ;;  %v2284_v31 = vsel %vm2280_vm3, %v2273_v15, %v4620_v57  ;;  %v3557_v57 = vmov (!%p2666_p5), 0.0  }
 0x675   : > { %2288 = vst [vmem:[#allocation5] sm:$0xff] %v2284_v31  ;;  %2723 = vmatprep.mubr.msk.f32.mxu0 (!%p2666_p5), %vm3556_vm4, %v3557_v57 }
 0x67c   : > { %2292 = sbr.rel (%p2666_p5) target bundleno = 1905 (0x771), region = 84 }
 0x67e   : > { %v3153_v9 = vpop.eup %3152 }
 0x67f   : > { %v2275_v10 = vmul.f32 %v3153_v9, %v3151_v8 }
 0x681   : > { %v2283_v11 = vsel %vm2280_vm3, %v2275_v10, %v4625_v4  ;;  %v2733_v4 = vpack.c.bf16 (!%p2666_p5), %v2298_v41, %v2297_v19 }
 0x682   : > { %2287 = vst [vmem:[#allocation4] sm:$0xff] %v2283_v11 }
 0x683   : > { %2734 = vmatpush3.bf16.msra.mxu0 %v2733_v4 }
 0x684   : > { %2735 = vmatprep.subr.bf16.mxu0 %v3555_v14 }
 0x687   : > { %2737 = vmatpush3.bf16.msra.mxu0 %v2736_v62 }
 0x688   : > { %2738 = vmatprep.subr.bf16.mxu0 %v3555_v14 }
 0x68b   : > { %2740 = vmatpush3.bf16.msra.mxu0 %v2739_v26 }
 0x68c   : > { %2741 = vmatprep.subr.bf16.mxu0 %v3555_v14 }
 0x68f   : > { %2743 = vmatpush3.bf16.msra.mxu0 %v2742_v27 }
 0x690   : > { %2744 = vmatprep.subr.bf16.mxu0 %v3555_v14 }
 0x693   : > { %2746 = vmatpush3.bf16.msra.mxu0 %v2745_v32 }
 0x694   : > { %2747 = vmatprep.subr.bf16.mxu0 %v3555_v14 }
 0x697   : > { %2749 = vmatpush3.bf16.msra.mxu0 %v2748_v63 }
 0x69a   : > { %2724 = vmatmul.mubr.f32.vlgmr.msra.gmra.mrb[0].mxu0 %v2283_v11 }
 0x76d   : > { %v2382_v7 = vpop.f32.mrb[0].mxu0 }
 0x76e   : > { %v2383_v36 = vadd.f32 %v2667_v25, %v2382_v7  ;;  %v2725_v37 = vpop.f32.mrb[1].mxu0 }
 0x770   : > { %2386 = vst [vmem:[#allocation18] sm:$0xff] %v2383_v36 }
 0x771 PF: > { %s5065_s27 = sadd.s32 4294967295, %s3540_s29   ;;  %s3558_s30 = smov [#allocation18]  }
 0x772   : > { %p4662_p2 = scmp.eq.s32.totalorder %s5065_s27, 2  ;;  %s2396_s18 = sshll.u32 %s3558_s30, 4  ;;  %s2397_s18 = int_to_ptr.vmem [resolvable:$true] %s2396_s18 }
 0x773   : > { %s3448_s21 = scalar_lea.vmem %s2397_s18, 128  ;;  %p3455_p1 = scmp.lt.s32.totalorder %s2397_s18, %s2397_s18 }
 0x774   : > { %p3449_p6 = scmp.ne.s32.totalorder %s2397_s18, %s3448_s21  ;;  %p3456_p3 = scmp.lt.s32.totalorder %s3448_s21, %s3448_s21 }
 0x776   : > { %p3450_p9 = pnand %p3449_p6, %p4662_p2  ;;  %p3457_p8 = por %p3456_p3, %p3455_p1 }
 0x778   : > { %p3451_p7 = pneg %p3450_p9 }
 0x77a   : > { %p3458_p10 = pnand %p3457_p8, %p3451_p7 }
 0x77c   : > { %3461 = shalt.err (!%p3458_p10)
}
 0x77d   : > { %s5067_s1 = sld [smem:[#allocation80_spill]] }
 0x783   : > { %s3462_s12 = scalar_lea.hbm %s5067_s1, 128 }
 0x784   : > { %p3463_p0 = scmp.ne.s32.totalorder %s5067_s1, %s3462_s12  ;;  %p3468_p12 = scmp.lt.u32.totalorder %s3462_s12, %s5067_s1 }
 0x786   : > { %p3464_p4 = pnand %p3463_p0, %p4662_p2 }
 0x788   : > { %p3465_p11 = pneg %p3464_p4 }
 0x78a   : > { %p3470_p13 = pnand %p3468_p12, %p3465_p11 }
 0x78c   : > { %3473 = shalt.err (!%p3470_p13)
}
 0x78d   : > { %2777 = dma.vmem_to_hbm [thread:$0]  (%p4662_p2), %s2397_s18, 128, %s5067_s1, [#allocation8]  }
 0x78e   : > { %3515 = dma.done.wait (%p4662_p2), [#allocation8], 128  }
 0x78f   : > { %3517 = vsyncadd (%p4662_p2), [#allocation8], 4294967168 }
 0x790 PF: > { %s24_s29 = sadd.s32 1, %s3540_s29   ;;  %s5068_s24 = smov %s3524_s25 }
 0x791   : > { %p21_p5 = scmp.ge.s32.totalorder %s24_s29, 5   ;;  %s5069_s25 = smov %s3528_s26 }
 0x792   : > { %s5070_s26 = smov %s3814_s7  ;;  %s5071_s27 = smov %s3536_s28 }
 0x793   : > { %s5072_s28 = smov %s5074_s22  ;;  %23 = sbr.rel (!%p21_p5) target bundleno = 12 (0xc), region = 121 }
 0x79a   :  { %2409 = vsyncpa [#allocation7], 1 }
 0x79b   :  { %2411 = vsyncpa [#allocation7 + $0x1], 1 }
 0x79c   :  { %2412 = vsyncpa [#allocation10], 1 }
 0x79d   :  { %2413 = vsyncpa [#allocation13], 1 }
 0x79e   :  { %2414 = vsyncpa [#allocation16], 1 }
 0x79f   :  { %2415 = vsyncpa [#allocation8], 1 }
 0x7a0   :  { %2417 = vsyncpa [#allocation8 + $0x1], 1 }

</bundles_post_ra>
